<compile_context>
chip_gen: v6e
topology: v6e:2x2x1
jax: 0.10.0
libtpu: 0.0.40
codegen_flags: <defaults>
</compile_context>

<pallas_src>
import functools
import math

import jax
import jax.numpy as jnp
import numpy as np
from jax.experimental import pallas as pl
from jax.experimental.pallas import tpu as pltpu

NUM_HEADS = 4

# rows of the packed vector-parameter array (each row zero-padded to W lanes)
_VEC_ROWS = ["ln1_g", "ln1_b", "bqkv", "bo", "ln2_g", "ln2_b", "b1", "b2", "bc"]


# ---------------------------------------------------------------------------
# in-kernel helpers (only ops with guaranteed Mosaic lowerings)
# ---------------------------------------------------------------------------
def _erf(x):
    # Abramowitz & Stegun 7.1.26 rational approximation, |err| < 1.5e-7.
    a1, a2, a3, a4, a5 = 0.254829592, -0.284496736, 1.421413741, -1.453152027, 1.061405429
    p = 0.3275911
    sign = jnp.where(x >= 0.0, 1.0, -1.0)
    ax = jnp.abs(x)
    t = 1.0 / (1.0 + p * ax)
    poly = ((((a5 * t + a4) * t + a3) * t + a2) * t + a1) * t
    return sign * (1.0 - poly * jnp.exp(-ax * ax))


def _gelu_exact(x):
    # matches torch.nn.GELU() default (erf formulation)
    return 0.5 * x * (1.0 + _erf(x * (1.0 / math.sqrt(2.0))))


def _layernorm(x, g, b, eps=1e-5):
    mu = jnp.mean(x, axis=-1, keepdims=True)
    var = jnp.mean(jnp.square(x - mu), axis=-1, keepdims=True)
    return (x - mu) * jax.lax.rsqrt(var + eps) * g + b


# ---------------------------------------------------------------------------
# the fused layer kernel (TB batch elements per grid step)
# ---------------------------------------------------------------------------
def _layer_kernel(x_ref, mask_ref, cons_ref,
                  wqkv_ref, wo_ref, w1_ref, w2_ref, wc_ref, vecs_ref,
                  out_ref, attn_ref, *, num_heads):
    TB = mask_ref.shape[0]                       # batch tile
    S = mask_ref.shape[2]                        # seq len
    M, D = x_ref.shape                           # M = TB * S
    F = w1_ref.shape[1]
    SP = attn_ref.shape[3]                       # key axis padded to mult. of 128
    H = num_heads
    Dh = D // H
    scale = 1.0 / math.sqrt(Dh)
    cdt = jnp.bfloat16                           # MXU operand dtype (f32 accum)

    # ---- packed vector params (static row / lane-from-0 slices) -----------
    ln1_g = vecs_ref[0:1, 0:D]
    ln1_b = vecs_ref[1:2, 0:D]
    bqkv = vecs_ref[2:3, 0:3 * D]
    bo = vecs_ref[3:4, 0:D]
    ln2_g = vecs_ref[4:5, 0:D]
    ln2_b = vecs_ref[5:6, 0:D]
    b1 = vecs_ref[6:7, 0:F]
    b2 = vecs_ref[7:8, 0:D]
    bc = vecs_ref[8:9, 0:D]

    x = x_ref[...]                               # [M, D] f32
    cons = cons_ref[...]                         # [M, D] f32

    # ---- LayerNorm 1 + fused QKV projection (bf16 MXU, f32 accum) ----------
    xn = _layernorm(x, ln1_g, ln1_b)
    qkv = jnp.dot(xn.astype(cdt), wqkv_ref[...],
                  preferred_element_type=jnp.float32) + bqkv          # [M, 3D]
    q = qkv[:, 0:D]
    k = qkv[:, D:2 * D]
    v = qkv[:, 2 * D:3 * D]

    # 1/sqrt(Dh) folded into Q once (removes the per-score scale multiply)
    q3 = (q * scale).reshape(TB, S, D).astype(cdt)                    # [TB,S,D]
    k3 = k.reshape(TB, S, D)
    v3 = v.reshape(TB, S, D)

    key_mask = mask_ref[...]                                          # [TB,1,S]
    lane = jax.lax.broadcasted_iota(jnp.int32, (1, 1, D), 2)

    zeros_pad = None
    if SP > S:
        zeros_pad = jnp.zeros((TB, S, SP - S), jnp.float32)

    # ---- multi-head attention: short unrolled per-head loop ----------------
    # K/V are lane-masked per head; the sum over heads of (P_h @ V_h)
    # reconstitutes the concatenated head output directly in [M, D] layout
    # (no Q broadcast, no lane concatenation, no transposes).
    attn_out = jnp.zeros((TB, S, D), jnp.float32)
    for h in range(H):
        sel = (lane >= h * Dh) & (lane < (h + 1) * Dh)                # [1,1,D]
        kh = jnp.where(sel, k3, 0.0).astype(cdt)                      # [TB,S,D]
        vh = jnp.where(sel, v3, 0.0).astype(cdt)

        s_h = jnp.einsum("bqd,bkd->bqk", q3, kh,
                         preferred_element_type=jnp.float32)          # [TB,S,S]
        s_h = jnp.where(key_mask == 0.0, -1e9, s_h)                   # masked_fill

        m_h = jnp.max(s_h, axis=-1, keepdims=True)
        e_h = jnp.exp(s_h - m_h)
        p_h = e_h / jnp.sum(e_h, axis=-1, keepdims=True)              # exact softmax

        # lane-dense attention-weights store (padded key lanes are zeros)
        if zeros_pad is not None:
            p_pad = jnp.concatenate([p_h, zeros_pad], axis=-1)        # [TB,S,SP]
        else:
            p_pad = p_h
        attn_ref[:, h:h + 1, :, :] = p_pad.reshape(TB, 1, S, SP)

        og_h = jnp.einsum("bqk,bkd->bqd", p_h.astype(cdt), vh,
                          preferred_element_type=jnp.float32)         # [TB,S,D]
        attn_out = attn_out + og_h

    attn_flat = attn_out.reshape(M, D)
    attn_proj = jnp.dot(attn_flat.astype(cdt), wo_ref[...],
                        preferred_element_type=jnp.float32) + bo

    # ---- residual + LayerNorm 2 + GELU MLP ----------------------------------
    x1 = x + attn_proj
    xn2 = _layernorm(x1, ln2_g, ln2_b)
    h1 = jnp.dot(xn2.astype(cdt), w1_ref[...],
                 preferred_element_type=jnp.float32) + b1
    g = _gelu_exact(h1)
    ff = jnp.dot(g.astype(cdt), w2_ref[...],
                 preferred_element_type=jnp.float32) + b2

    # ---- constraint gate -----------------------------------------------------
    cg = jax.nn.sigmoid(
        jnp.dot(cons.astype(cdt), wc_ref[...],
                preferred_element_type=jnp.float32) + bc)
    ff = ff * cg + cons * (1.0 - cg)

    out_ref[...] = x1 + ff


# ---------------------------------------------------------------------------
# wrapper-side tiling / VMEM budgeting
# ---------------------------------------------------------------------------
def _round_up(x, m):
    return ((x + m - 1) // m) * m


def _vmem_budget_and_target():
    """Generation-aware VMEM budget (bytes) and target matmul rows per step."""
    cap = None
    try:
        info = pltpu.get_tpu_info()
        cap = int(getattr(info, "vmem_capacity_bytes", 0)) or None
    except Exception:
        cap = None
    if cap is None or cap <= 0:
        cap = 64 * 1024 * 1024            # conservative default == v7x per-TC
    budget = (cap * 3) // 4
    target_rows = 512 if cap >= 96 * 1024 * 1024 else 256
    return int(budget), int(target_rows)


def _vmem_estimate_bytes(TB, S, D, F, H, SP):
    """Rough per-grid-step VMEM estimate (streamed blocks + weights + temps)."""
    M = TB * S
    f32, bf16 = 4, 2
    stream = 2 * (2 * M * D * f32                 # x, constraints (double-buf)
                  + TB * S * f32                  # mask
                  + M * D * f32                   # out
                  + TB * H * S * SP * f32)        # attention weights
    weights = (3 * D * D + D * D + D * F + F * D + D * D) * bf16 \
        + 9 * max(3 * D, F, 128) * f32            # single-buffered params
    temps = (M * 3 * D * f32                      # qkv
             + 6 * M * D * f32                    # xn / x1 / xn2 / ff / proj ...
             + 2 * M * F * f32                    # h1, gelu
             + 4 * TB * S * D * f32               # per-head masked k/v, og, acc
             + 3 * TB * S * SP * f32)             # scores / softmax / padded p
    return int(1.25 * (stream + weights + temps))


def _pick_block_batch(B, S, D, F, H, SP, budget_bytes, target_rows):
    """Largest legal TB dividing B that fits VMEM, preferring >= 2 grid steps."""
    divisors = [t for t in range(1, B + 1) if B % t == 0]
    legal = [t for t in divisors if (t * S) % 8 == 0 or t == B]
    if not legal:
        legal = divisors
    fitting = [t for t in legal
               if _vmem_estimate_bytes(t, S, D, F, H, SP) <= budget_bytes]
    if not fitting:
        fitting = [min(legal)]
    multi = [t for t in fitting if B // t >= 2]   # >=2 steps: megacore + overlap
    pool = multi if multi else fitting
    under = [t for t in pool if t * S <= target_rows]
    return max(under) if under else min(pool)


# ---------------------------------------------------------------------------
# wrapper
# ---------------------------------------------------------------------------
def neuro_symbolic_layer(x, attention_mask, constraints, params, num_heads=NUM_HEADS):
    B, S, D = x.shape
    H = num_heads
    assert D % H == 0
    F = params["w1"].shape[1]
    SP = _round_up(S, 128)                        # lane-dense key axis for attn out

    budget, target_rows = _vmem_budget_and_target()
    TB = _pick_block_batch(B, S, D, F, H, SP, budget, target_rows)
    M = TB * S
    n_steps = B // TB

    # ---- host-side parameter packing (weights -> bf16) ----------------------
    wqkv = jnp.concatenate([params["wq"], params["wk"], params["wv"]],
                           axis=1).astype(jnp.bfloat16)               # [D,3D]
    wo = params["wo"].astype(jnp.bfloat16)
    w1 = params["w1"].astype(jnp.bfloat16)
    w2 = params["w2"].astype(jnp.bfloat16)
    wc = params["wc"].astype(jnp.bfloat16)

    bqkv = jnp.concatenate([params["bq"], params["bk"], params["bv"]], axis=1)
    W = _round_up(max(3 * D, F), 128)

    def row(vec):
        v = jnp.asarray(vec, jnp.float32).reshape(1, -1)
        return jnp.pad(v, ((0, 0), (0, W - v.shape[1])))

    vec_src = {"ln1_g": params["ln1_g"], "ln1_b": params["ln1_b"], "bqkv": bqkv,
               "bo": params["bo"], "ln2_g": params["ln2_g"], "ln2_b": params["ln2_b"],
               "b1": params["b1"], "b2": params["b2"], "bc": params["bc"]}
    vecs = jnp.concatenate([row(vec_src[name]) for name in _VEC_ROWS], axis=0)  # [9,W]

    # ---- activations: flat [B*S, D] (f32; cast to bf16 at matmul operands) --
    x_flat = x.reshape(B * S, D).astype(jnp.float32)
    cons_flat = constraints.reshape(B * S, D).astype(jnp.float32)
    mask3 = attention_mask.reshape(B, 1, S).astype(jnp.float32)

    kernel = functools.partial(_layer_kernel, num_heads=H)

    def build(single_buffer_weights):
        def const_spec(shape):
            imap = lambda i: (0,) * len(shape)
            if single_buffer_weights:
                return pl.BlockSpec(shape, imap, pipeline_mode=pl.Buffered(1))
            return pl.BlockSpec(shape, imap)

        in_specs = [
            pl.BlockSpec((M, D), lambda i: (i, 0)),          # x (flattened)
            pl.BlockSpec((TB, 1, S), lambda i: (i, 0, 0)),   # key mask
            pl.BlockSpec((M, D), lambda i: (i, 0)),          # constraints (flat)
            const_spec(wqkv.shape),                          # fused QKV weight
            const_spec(wo.shape),
            const_spec(w1.shape),
            const_spec(w2.shape),
            const_spec(wc.shape),
            const_spec(vecs.shape),                          # packed vector params
        ]
        out_specs = [
            pl.BlockSpec((M, D), lambda i: (i, 0)),              # layer output
            pl.BlockSpec((TB, H, S, SP), lambda i: (i, 0, 0, 0)),  # attn weights
        ]
        out_shape = [
            jax.ShapeDtypeStruct((B * S, D), jnp.float32),
            jax.ShapeDtypeStruct((B, H, S, SP), jnp.float32),
        ]
        return pl.pallas_call(
            kernel,
            grid=(n_steps,),
            in_specs=in_specs,
            out_specs=out_specs,
            out_shape=out_shape,
            compiler_params=pltpu.CompilerParams(
                dimension_semantics=("parallel",),
                vmem_limit_bytes=int(budget)),
        )

    args = (x_flat, mask3, cons_flat, wqkv, wo, w1, w2, wc, vecs)
    try:
        out_flat, attn_pad = build(True)(*args)
    except Exception:
        # fall back to default double-buffering if Buffered(1) is unsupported
        out_flat, attn_pad = build(False)(*args)

    out = out_flat.reshape(B, S, D)
    attn = attn_pad[..., :S]                      # drop the lane padding
    return out, attn


# ---------------------------------------------------------------------------
# deterministic parameter init (torch nn.Linear-style uniform, LayerNorm 1/0)
# ---------------------------------------------------------------------------
def init_params(key, D, F):
    keys = jax.random.split(key, 16)
    kit = iter(keys)

    def linear(fan_in, fan_out):
        k1, k2 = jax.random.split(next(kit))
        bound = 1.0 / math.sqrt(fan_in)
        w = jax.random.uniform(k1, (fan_in, fan_out), jnp.float32, -bound, bound)
        b = jax.random.uniform(k2, (1, fan_out), jnp.float32, -bound, bound)
        return w, b

    p = {}
    p["ln1_g"] = jnp.ones((1, D), jnp.float32)
    p["ln1_b"] = jnp.zeros((1, D), jnp.float32)
    p["wq"], p["bq"] = linear(D, D)
    p["wk"], p["bk"] = linear(D, D)
    p["wv"], p["bv"] = linear(D, D)
    p["wo"], p["bo"] = linear(D, D)
    p["ln2_g"] = jnp.ones((1, D), jnp.float32)
    p["ln2_b"] = jnp.zeros((1, D), jnp.float32)
    p["w1"], p["b1"] = linear(D, F)
    p["w2"], p["b2"] = linear(F, D)
    p["wc"], p["bc"] = linear(D, D)
    return p


# ---------------------------------------------------------------------------
# pure-JAX reference (mirrors the PyTorch forward, kg path disabled, f32)
# ---------------------------------------------------------------------------
def reference_forward(x, mask, constraints, params, num_heads=NUM_HEADS):
    P = jax.lax.Precision.HIGHEST

    def ln(t, g, b):
        mu = jnp.mean(t, -1, keepdims=True)
        var = jnp.mean((t - mu) ** 2, -1, keepdims=True)
        return (t - mu) / jnp.sqrt(var + 1e-5) * g + b

    B, S, D = x.shape
    H = num_heads
    Dh = D // H
    xn = ln(x, params["ln1_g"], params["ln1_b"])
    q = jnp.dot(xn, params["wq"], precision=P) + params["bq"]
    k = jnp.dot(xn, params["wk"], precision=P) + params["bk"]
    v = jnp.dot(xn, params["wv"], precision=P) + params["bv"]
    q = q.reshape(B, S, H, Dh).transpose(0, 2, 1, 3)
    k = k.reshape(B, S, H, Dh).transpose(0, 2, 1, 3)
    v = v.reshape(B, S, H, Dh).transpose(0, 2, 1, 3)
    scores = jnp.einsum("bhqd,bhkd->bhqk", q, k, precision=P) / math.sqrt(Dh)
    scores = jnp.where(mask[:, None, None, :] == 0.0, -1e9, scores)
    attn = jax.nn.softmax(scores, axis=-1)
    ao = jnp.einsum("bhqk,bhkd->bhqd", attn, v, precision=P)
    ao = ao.transpose(0, 2, 1, 3).reshape(B, S, D)
    ao = jnp.dot(ao, params["wo"], precision=P) + params["bo"]
    x1 = x + ao
    xn2 = ln(x1, params["ln2_g"], params["ln2_b"])
    h1 = jnp.dot(xn2, params["w1"], precision=P) + params["b1"]
    g = jax.nn.gelu(h1, approximate=False)
    ff = jnp.dot(g, params["w2"], precision=P) + params["b2"]
    cg = jax.nn.sigmoid(jnp.dot(constraints, params["wc"], precision=P) + params["bc"])
    ff = ff * cg + constraints * (1.0 - cg)
    return x1 + ff, attn


# ---------------------------------------------------------------------------
if __name__ == "__main__":
    B, S, D, F = 2, 8, 32, 64   # batch, seq, embed_dim, ff_dim; heads = 4

    root = jax.random.PRNGKey(0)
    k_param, k_x, k_c = jax.random.split(root, 3)

    params = init_params(k_param, D, F)
    x = jax.random.normal(k_x, (B, S, D), jnp.float32)
    constraints = 0.5 * jax.random.normal(k_c, (B, S, D), jnp.float32)

    # key-position mask [B, S]: batch 1 has its last two positions masked out
    attention_mask = jnp.ones((B, S), jnp.float32)
    attention_mask = attention_mask.at[1, S - 2:].set(0.0)

    out, attn_w = neuro_symbolic_layer(x, attention_mask, constraints, params)
    out, attn_w = jax.block_until_ready((out, attn_w))

    ref_out, ref_attn = reference_forward(x, attention_mask, constraints, params)
    # bf16 MXU operands (f32 accumulation) => looser tolerance than pure f32
    np.testing.assert_allclose(np.asarray(out), np.asarray(ref_out),
                               rtol=5e-2, atol=5e-2)
    np.testing.assert_allclose(np.asarray(attn_w), np.asarray(ref_attn),
                               rtol=3e-2, atol=3e-2)

    print("KERNEL_OK")
</pallas_src>

<mosaic_0001>
module attributes {stable_mosaic.version = 11 : i64} {
  func.func @_layer_kernel(%arg0: i32, %arg1: memref<8x32xf32, #tpu.memory_space<vmem>>, %arg2: memref<1x1x8xf32, #tpu.memory_space<vmem>>, %arg3: memref<8x32xf32, #tpu.memory_space<vmem>>, %arg4: memref<32x96xbf16, #tpu.memory_space<vmem>>, %arg5: memref<32x32xbf16, #tpu.memory_space<vmem>>, %arg6: memref<32x64xbf16, #tpu.memory_space<vmem>>, %arg7: memref<64x32xbf16, #tpu.memory_space<vmem>>, %arg8: memref<32x32xbf16, #tpu.memory_space<vmem>>, %arg9: memref<9x128xf32, #tpu.memory_space<vmem>>, %arg10: memref<8x32xf32, #tpu.memory_space<vmem>>, %arg11: memref<1x4x8x128xf32, #tpu.memory_space<vmem>>) attributes {dimension_semantics = [#tpu.dimension_semantics<parallel>], iteration_bounds = array<i64: 2>, scalar_prefetch = 0 : i64, scratch_operands = 0 : i64, tpu.core_type = #tpu.core_type<tc>, window_params = [{transform_indices = @transform_0, window_bounds = array<i64: 8, 32>}, {transform_indices = @transform_1, window_bounds = array<i64: 1, 1, 8>}, {transform_indices = @transform_2, window_bounds = array<i64: 8, 32>}, {pipeline_mode = #tpu.pipeline_mode<synchronous>, transform_indices = @transform_3, window_bounds = array<i64: 32, 96>}, {pipeline_mode = #tpu.pipeline_mode<synchronous>, transform_indices = @transform_4, window_bounds = array<i64: 32, 32>}, {pipeline_mode = #tpu.pipeline_mode<synchronous>, transform_indices = @transform_5, window_bounds = array<i64: 32, 64>}, {pipeline_mode = #tpu.pipeline_mode<synchronous>, transform_indices = @transform_6, window_bounds = array<i64: 64, 32>}, {pipeline_mode = #tpu.pipeline_mode<synchronous>, transform_indices = @transform_7, window_bounds = array<i64: 32, 32>}, {pipeline_mode = #tpu.pipeline_mode<synchronous>, transform_indices = @transform_8, window_bounds = array<i64: 9, 128>}, {transform_indices = @transform_9, window_bounds = array<i64: 8, 32>}, {transform_indices = @transform_10, window_bounds = array<i64: 1, 4, 8, 128>}]} {
    %c0 = arith.constant 0 : index
    %c0_0 = arith.constant 0 : index
    %0 = vector.load %arg9[%c0, %c0_0] : memref<9x128xf32, #tpu.memory_space<vmem>>, vector<1x32xf32>
    %c1 = arith.constant 1 : index
    %c0_1 = arith.constant 0 : index
    %1 = vector.load %arg9[%c1, %c0_1] : memref<9x128xf32, #tpu.memory_space<vmem>>, vector<1x32xf32>
    %c2 = arith.constant 2 : index
    %c0_2 = arith.constant 0 : index
    %2 = vector.load %arg9[%c2, %c0_2] : memref<9x128xf32, #tpu.memory_space<vmem>>, vector<1x96xf32>
    %c3 = arith.constant 3 : index
    %c0_3 = arith.constant 0 : index
    %3 = vector.load %arg9[%c3, %c0_3] : memref<9x128xf32, #tpu.memory_space<vmem>>, vector<1x32xf32>
    %c4 = arith.constant 4 : index
    %c0_4 = arith.constant 0 : index
    %4 = vector.load %arg9[%c4, %c0_4] : memref<9x128xf32, #tpu.memory_space<vmem>>, vector<1x32xf32>
    %c5 = arith.constant 5 : index
    %c0_5 = arith.constant 0 : index
    %5 = vector.load %arg9[%c5, %c0_5] : memref<9x128xf32, #tpu.memory_space<vmem>>, vector<1x32xf32>
    %c6 = arith.constant 6 : index
    %c0_6 = arith.constant 0 : index
    %6 = vector.load %arg9[%c6, %c0_6] : memref<9x128xf32, #tpu.memory_space<vmem>>, vector<1x64xf32>
    %c7 = arith.constant 7 : index
    %c0_7 = arith.constant 0 : index
    %7 = vector.load %arg9[%c7, %c0_7] : memref<9x128xf32, #tpu.memory_space<vmem>>, vector<1x32xf32>
    %c8 = arith.constant 8 : index
    %c0_8 = arith.constant 0 : index
    %8 = vector.load %arg9[%c8, %c0_8] : memref<9x128xf32, #tpu.memory_space<vmem>>, vector<1x32xf32>
    %c0_9 = arith.constant 0 : index
    %c0_10 = arith.constant 0 : index
    %9 = vector.load %arg1[%c0_9, %c0_10] : memref<8x32xf32, #tpu.memory_space<vmem>>, vector<8x32xf32>
    %c0_11 = arith.constant 0 : index
    %c0_12 = arith.constant 0 : index
    %10 = vector.load %arg3[%c0_11, %c0_12] : memref<8x32xf32, #tpu.memory_space<vmem>>, vector<8x32xf32>
    %cst = arith.constant dense<0.000000e+00> : vector<8xf32>
    %11 = vector.multi_reduction <add>, %9, %cst [1] : vector<8x32xf32> to vector<8xf32>
    %12 = vector.shape_cast %11 : vector<8xf32> to vector<8x1xf32>
    %cst_13 = arith.constant 3.200000e+01 : f32
    %13 = vector.broadcast %cst_13 : f32 to vector<8x1xf32>
    %14 = arith.divf %12, %13 : vector<8x1xf32>
    %15 = vector.broadcast %14 : vector<8x1xf32> to vector<8x32xf32>
    %16 = arith.subf %9, %15 : vector<8x32xf32>
    %17 = arith.mulf %16, %16 : vector<8x32xf32>
    %cst_14 = arith.constant dense<0.000000e+00> : vector<8xf32>
    %18 = vector.multi_reduction <add>, %17, %cst_14 [1] : vector<8x32xf32> to vector<8xf32>
    %19 = vector.shape_cast %18 : vector<8xf32> to vector<8x1xf32>
    %cst_15 = arith.constant 3.200000e+01 : f32
    %20 = vector.broadcast %cst_15 : f32 to vector<8x1xf32>
    %21 = arith.divf %19, %20 : vector<8x1xf32>
    %22 = vector.broadcast %14 : vector<8x1xf32> to vector<8x32xf32>
    %23 = arith.subf %9, %22 : vector<8x32xf32>
    %cst_16 = arith.constant 9.99999974E-6 : f32
    %24 = vector.broadcast %cst_16 : f32 to vector<8x1xf32>
    %25 = arith.addf %21, %24 : vector<8x1xf32>
    %26 = math.rsqrt %25 : vector<8x1xf32>
    %27 = vector.broadcast %26 : vector<8x1xf32> to vector<8x32xf32>
    %28 = arith.mulf %23, %27 : vector<8x32xf32>
    %29 = vector.broadcast %0 : vector<1x32xf32> to vector<8x32xf32>
    %30 = arith.mulf %28, %29 : vector<8x32xf32>
    %31 = vector.broadcast %1 : vector<1x32xf32> to vector<8x32xf32>
    %32 = arith.addf %30, %31 : vector<8x32xf32>
    %33 = arith.truncf %32 : vector<8x32xf32> to vector<8x32xbf16>
    %c0_17 = arith.constant 0 : index
    %c0_18 = arith.constant 0 : index
    %34 = vector.load %arg4[%c0_17, %c0_18] : memref<32x96xbf16, #tpu.memory_space<vmem>>, vector<32x96xbf16>
    %cst_19 = arith.constant dense<0.000000e+00> : vector<8x96xf32>
    %35 = tpu.matmul %33, %34, %cst_19 {dimension_numbers = #tpu.dot_dimension_numbers<[1], [0], [0], [1], [0, 0, 1, 1], [], []>} : vector<8x32xbf16>, vector<32x96xbf16>, vector<8x96xf32> -> vector<8x96xf32>
    %36 = vector.broadcast %2 : vector<1x96xf32> to vector<8x96xf32>
    %37 = arith.addf %35, %36 : vector<8x96xf32>
    %38 = vector.extract_strided_slice %37 {offsets = [0, 0], sizes = [8, 32], strides = [1, 1]} : vector<8x96xf32> to vector<8x32xf32>
    %39 = vector.extract_strided_slice %37 {offsets = [0, 32], sizes = [8, 32], strides = [1, 1]} : vector<8x96xf32> to vector<8x32xf32>
    %40 = vector.extract_strided_slice %37 {offsets = [0, 64], sizes = [8, 32], strides = [1, 1]} : vector<8x96xf32> to vector<8x32xf32>
    %cst_20 = arith.constant 0.353553385 : f32
    %41 = vector.broadcast %cst_20 : f32 to vector<8x32xf32>
    %42 = arith.mulf %38, %41 : vector<8x32xf32>
    %43 = vector.shape_cast %42 : vector<8x32xf32> to vector<1x8x32xf32>
    %44 = arith.truncf %43 : vector<1x8x32xf32> to vector<1x8x32xbf16>
    %45 = vector.shape_cast %39 : vector<8x32xf32> to vector<1x8x32xf32>
    %46 = vector.shape_cast %40 : vector<8x32xf32> to vector<1x8x32xf32>
    %c0_21 = arith.constant 0 : index
    %c0_22 = arith.constant 0 : index
    %c0_23 = arith.constant 0 : index
    %47 = vector.load %arg2[%c0_21, %c0_22, %c0_23] : memref<1x1x8xf32, #tpu.memory_space<vmem>>, vector<1x1x8xf32>
    %48 = tpu.iota {dimensions = array<i32: 2>} : vector<1x1x32xi32>
    %cst_24 = arith.constant 0.000000e+00 : f32
    %49 = vector.broadcast %cst_24 : f32 to vector<1x8x120xf32>
    %cst_25 = arith.constant 0.000000e+00 : f32
    %50 = vector.broadcast %cst_25 : f32 to vector<1x8x32xf32>
    %c0_i32 = arith.constant 0 : i32
    %51 = vector.broadcast %c0_i32 : i32 to vector<1x1x32xi32>
    %52 = arith.cmpi sge, %48, %51 : vector<1x1x32xi32>
    %c8_i32 = arith.constant 8 : i32
    %53 = vector.broadcast %c8_i32 : i32 to vector<1x1x32xi32>
    %54 = arith.cmpi slt, %48, %53 : vector<1x1x32xi32>
    %55 = arith.andi %52, %54 : vector<1x1x32xi1>
    %cst_26 = arith.constant 0.000000e+00 : f32
    %56 = vector.shape_cast %55 : vector<1x1x32xi1> to vector<1x1x32xi1>
    %57 = vector.broadcast %56 : vector<1x1x32xi1> to vector<1x8x32xi1>
    %58 = vector.broadcast %cst_26 : f32 to vector<1x8x32xf32>
    %59 = arith.select %57, %45, %58 : vector<1x8x32xi1>, vector<1x8x32xf32>
    %60 = arith.truncf %59 : vector<1x8x32xf32> to vector<1x8x32xbf16>
    %cst_27 = arith.constant 0.000000e+00 : f32
    %61 = vector.shape_cast %55 : vector<1x1x32xi1> to vector<1x1x32xi1>
    %62 = vector.broadcast %61 : vector<1x1x32xi1> to vector<1x8x32xi1>
    %63 = vector.broadcast %cst_27 : f32 to vector<1x8x32xf32>
    %64 = arith.select %62, %46, %63 : vector<1x8x32xi1>, vector<1x8x32xf32>
    %65 = arith.truncf %64 : vector<1x8x32xf32> to vector<1x8x32xbf16>
    "tpu.trace_start"() <{level = 10 : i32, message = "bqd,bkd->bqk"}> : () -> ()
    %cst_28 = arith.constant dense<0.000000e+00> : vector<1x8x8xf32>
    %66 = tpu.matmul %44, %60, %cst_28 {dimension_numbers = #tpu.dot_dimension_numbers<[2], [2], [1], [1], [0, 0, 0, 1, 1, 1], [0], [0]>} : vector<1x8x32xbf16>, vector<1x8x32xbf16>, vector<1x8x8xf32> -> vector<1x8x8xf32>
    %cst_29 = arith.constant 0.000000e+00 : f32
    "tpu.trace_stop"() : () -> ()
    %67 = vector.broadcast %cst_29 : f32 to vector<1x1x8xf32>
    %68 = arith.cmpf oeq, %47, %67 : vector<1x1x8xf32>
    %cst_30 = arith.constant -1.000000e+09 : f32
    %69 = vector.shape_cast %68 : vector<1x1x8xi1> to vector<1x1x8xi1>
    %70 = vector.broadcast %69 : vector<1x1x8xi1> to vector<1x8x8xi1>
    %71 = vector.broadcast %cst_30 : f32 to vector<1x8x8xf32>
    %72 = arith.select %70, %71, %66 : vector<1x8x8xi1>, vector<1x8x8xf32>
    %cst_31 = arith.constant dense<0xFF800000> : vector<1x8xf32>
    %73 = vector.multi_reduction <maximumf>, %72, %cst_31 [2] : vector<1x8x8xf32> to vector<1x8xf32>
    %74 = vector.shape_cast %73 : vector<1x8xf32> to vector<1x8x1xf32>
    %75 = vector.broadcast %74 : vector<1x8x1xf32> to vector<1x8x8xf32>
    %76 = arith.subf %72, %75 : vector<1x8x8xf32>
    %77 = math.exp %76 : vector<1x8x8xf32>
    %cst_32 = arith.constant dense<0.000000e+00> : vector<1x8xf32>
    %78 = vector.multi_reduction <add>, %77, %cst_32 [2] : vector<1x8x8xf32> to vector<1x8xf32>
    %79 = vector.shape_cast %78 : vector<1x8xf32> to vector<1x8x1xf32>
    %80 = vector.broadcast %79 : vector<1x8x1xf32> to vector<1x8x8xf32>
    %81 = arith.divf %77, %80 : vector<1x8x8xf32>
    %82 = tpu.concatenate %81, %49 in 2 : vector<1x8x8xf32>, vector<1x8x120xf32> -> vector<1x8x128xf32>
    %83 = vector.shape_cast %82 : vector<1x8x128xf32> to vector<1x1x8x128xf32>
    %c0_33 = arith.constant 0 : index
    %c0_34 = arith.constant 0 : index
    %c0_35 = arith.constant 0 : index
    %c0_36 = arith.constant 0 : index
    %84 = vector.load %arg11[%c0_33, %c0_34, %c0_35, %c0_36] : memref<1x4x8x128xf32, #tpu.memory_space<vmem>>, vector<1x1x8x128xf32>
    tpu.vector_store %arg11[%c0_33, %c0_34, %c0_35, %c0_36], %83 {strides = array<i32>} : memref<1x4x8x128xf32, #tpu.memory_space<vmem>>, vector<1x1x8x128xf32>,
    %85 = arith.truncf %81 : vector<1x8x8xf32> to vector<1x8x8xbf16>
    "tpu.trace_start"() <{level = 10 : i32, message = "bqk,bkd->bqd"}> : () -> ()
    %cst_37 = arith.constant dense<0.000000e+00> : vector<1x8x32xf32>
    %86 = tpu.matmul %85, %65, %cst_37 {dimension_numbers = #tpu.dot_dimension_numbers<[2], [1], [1], [2], [0, 0, 0, 1, 1, 2], [0], [0]>} : vector<1x8x8xbf16>, vector<1x8x32xbf16>, vector<1x8x32xf32> -> vector<1x8x32xf32>
    "tpu.trace_stop"() : () -> ()
    %87 = arith.addf %50, %86 : vector<1x8x32xf32>
    %c8_i32_38 = arith.constant 8 : i32
    %88 = vector.broadcast %c8_i32_38 : i32 to vector<1x1x32xi32>
    %89 = arith.cmpi sge, %48, %88 : vector<1x1x32xi32>
    %c16_i32 = arith.constant 16 : i32
    %90 = vector.broadcast %c16_i32 : i32 to vector<1x1x32xi32>
    %91 = arith.cmpi slt, %48, %90 : vector<1x1x32xi32>
    %92 = arith.andi %89, %91 : vector<1x1x32xi1>
    %cst_39 = arith.constant 0.000000e+00 : f32
    %93 = vector.shape_cast %92 : vector<1x1x32xi1> to vector<1x1x32xi1>
    %94 = vector.broadcast %93 : vector<1x1x32xi1> to vector<1x8x32xi1>
    %95 = vector.broadcast %cst_39 : f32 to vector<1x8x32xf32>
    %96 = arith.select %94, %45, %95 : vector<1x8x32xi1>, vector<1x8x32xf32>
    %97 = arith.truncf %96 : vector<1x8x32xf32> to vector<1x8x32xbf16>
    %cst_40 = arith.constant 0.000000e+00 : f32
    %98 = vector.shape_cast %92 : vector<1x1x32xi1> to vector<1x1x32xi1>
    %99 = vector.broadcast %98 : vector<1x1x32xi1> to vector<1x8x32xi1>
    %100 = vector.broadcast %cst_40 : f32 to vector<1x8x32xf32>
    %101 = arith.select %99, %46, %100 : vector<1x8x32xi1>, vector<1x8x32xf32>
    %102 = arith.truncf %101 : vector<1x8x32xf32> to vector<1x8x32xbf16>
    "tpu.trace_start"() <{level = 10 : i32, message = "bqd,bkd->bqk"}> : () -> ()
    %cst_41 = arith.constant dense<0.000000e+00> : vector<1x8x8xf32>
    %103 = tpu.matmul %44, %97, %cst_41 {dimension_numbers = #tpu.dot_dimension_numbers<[2], [2], [1], [1], [0, 0, 0, 1, 1, 1], [0], [0]>} : vector<1x8x32xbf16>, vector<1x8x32xbf16>, vector<1x8x8xf32> -> vector<1x8x8xf32>
    %cst_42 = arith.constant 0.000000e+00 : f32
    "tpu.trace_stop"() : () -> ()
    %104 = vector.broadcast %cst_42 : f32 to vector<1x1x8xf32>
    %105 = arith.cmpf oeq, %47, %104 : vector<1x1x8xf32>
    %cst_43 = arith.constant -1.000000e+09 : f32
    %106 = vector.shape_cast %105 : vector<1x1x8xi1> to vector<1x1x8xi1>
    %107 = vector.broadcast %106 : vector<1x1x8xi1> to vector<1x8x8xi1>
    %108 = vector.broadcast %cst_43 : f32 to vector<1x8x8xf32>
    %109 = arith.select %107, %108, %103 : vector<1x8x8xi1>, vector<1x8x8xf32>
    %cst_44 = arith.constant dense<0xFF800000> : vector<1x8xf32>
    %110 = vector.multi_reduction <maximumf>, %109, %cst_44 [2] : vector<1x8x8xf32> to vector<1x8xf32>
    %111 = vector.shape_cast %110 : vector<1x8xf32> to vector<1x8x1xf32>
    %112 = vector.broadcast %111 : vector<1x8x1xf32> to vector<1x8x8xf32>
    %113 = arith.subf %109, %112 : vector<1x8x8xf32>
    %114 = math.exp %113 : vector<1x8x8xf32>
    %cst_45 = arith.constant dense<0.000000e+00> : vector<1x8xf32>
    %115 = vector.multi_reduction <add>, %114, %cst_45 [2] : vector<1x8x8xf32> to vector<1x8xf32>
    %116 = vector.shape_cast %115 : vector<1x8xf32> to vector<1x8x1xf32>
    %117 = vector.broadcast %116 : vector<1x8x1xf32> to vector<1x8x8xf32>
    %118 = arith.divf %114, %117 : vector<1x8x8xf32>
    %119 = tpu.concatenate %118, %49 in 2 : vector<1x8x8xf32>, vector<1x8x120xf32> -> vector<1x8x128xf32>
    %120 = vector.shape_cast %119 : vector<1x8x128xf32> to vector<1x1x8x128xf32>
    %c0_46 = arith.constant 0 : index
    %c1_47 = arith.constant 1 : index
    %c0_48 = arith.constant 0 : index
    %c0_49 = arith.constant 0 : index
    %121 = vector.load %arg11[%c0_46, %c1_47, %c0_48, %c0_49] : memref<1x4x8x128xf32, #tpu.memory_space<vmem>>, vector<1x1x8x128xf32>
    tpu.vector_store %arg11[%c0_46, %c1_47, %c0_48, %c0_49], %120 {strides = array<i32>} : memref<1x4x8x128xf32, #tpu.memory_space<vmem>>, vector<1x1x8x128xf32>,
    %122 = arith.truncf %118 : vector<1x8x8xf32> to vector<1x8x8xbf16>
    "tpu.trace_start"() <{level = 10 : i32, message = "bqk,bkd->bqd"}> : () -> ()
    %cst_50 = arith.constant dense<0.000000e+00> : vector<1x8x32xf32>
    %123 = tpu.matmul %122, %102, %cst_50 {dimension_numbers = #tpu.dot_dimension_numbers<[2], [1], [1], [2], [0, 0, 0, 1, 1, 2], [0], [0]>} : vector<1x8x8xbf16>, vector<1x8x32xbf16>, vector<1x8x32xf32> -> vector<1x8x32xf32>
    "tpu.trace_stop"() : () -> ()
    %124 = arith.addf %87, %123 : vector<1x8x32xf32>
    %c16_i32_51 = arith.constant 16 : i32
    %125 = vector.broadcast %c16_i32_51 : i32 to vector<1x1x32xi32>
    %126 = arith.cmpi sge, %48, %125 : vector<1x1x32xi32>
    %c24_i32 = arith.constant 24 : i32
    %127 = vector.broadcast %c24_i32 : i32 to vector<1x1x32xi32>
    %128 = arith.cmpi slt, %48, %127 : vector<1x1x32xi32>
    %129 = arith.andi %126, %128 : vector<1x1x32xi1>
    %cst_52 = arith.constant 0.000000e+00 : f32
    %130 = vector.shape_cast %129 : vector<1x1x32xi1> to vector<1x1x32xi1>
    %131 = vector.broadcast %130 : vector<1x1x32xi1> to vector<1x8x32xi1>
    %132 = vector.broadcast %cst_52 : f32 to vector<1x8x32xf32>
    %133 = arith.select %131, %45, %132 : vector<1x8x32xi1>, vector<1x8x32xf32>
    %134 = arith.truncf %133 : vector<1x8x32xf32> to vector<1x8x32xbf16>
    %cst_53 = arith.constant 0.000000e+00 : f32
    %135 = vector.shape_cast %129 : vector<1x1x32xi1> to vector<1x1x32xi1>
    %136 = vector.broadcast %135 : vector<1x1x32xi1> to vector<1x8x32xi1>
    %137 = vector.broadcast %cst_53 : f32 to vector<1x8x32xf32>
    %138 = arith.select %136, %46, %137 : vector<1x8x32xi1>, vector<1x8x32xf32>
    %139 = arith.truncf %138 : vector<1x8x32xf32> to vector<1x8x32xbf16>
    "tpu.trace_start"() <{level = 10 : i32, message = "bqd,bkd->bqk"}> : () -> ()
    %cst_54 = arith.constant dense<0.000000e+00> : vector<1x8x8xf32>
    %140 = tpu.matmul %44, %134, %cst_54 {dimension_numbers = #tpu.dot_dimension_numbers<[2], [2], [1], [1], [0, 0, 0, 1, 1, 1], [0], [0]>} : vector<1x8x32xbf16>, vector<1x8x32xbf16>, vector<1x8x8xf32> -> vector<1x8x8xf32>
    %cst_55 = arith.constant 0.000000e+00 : f32
    "tpu.trace_stop"() : () -> ()
    %141 = vector.broadcast %cst_55 : f32 to vector<1x1x8xf32>
    %142 = arith.cmpf oeq, %47, %141 : vector<1x1x8xf32>
    %cst_56 = arith.constant -1.000000e+09 : f32
    %143 = vector.shape_cast %142 : vector<1x1x8xi1> to vector<1x1x8xi1>
    %144 = vector.broadcast %143 : vector<1x1x8xi1> to vector<1x8x8xi1>
    %145 = vector.broadcast %cst_56 : f32 to vector<1x8x8xf32>
    %146 = arith.select %144, %145, %140 : vector<1x8x8xi1>, vector<1x8x8xf32>
    %cst_57 = arith.constant dense<0xFF800000> : vector<1x8xf32>
    %147 = vector.multi_reduction <maximumf>, %146, %cst_57 [2] : vector<1x8x8xf32> to vector<1x8xf32>
    %148 = vector.shape_cast %147 : vector<1x8xf32> to vector<1x8x1xf32>
    %149 = vector.broadcast %148 : vector<1x8x1xf32> to vector<1x8x8xf32>
    %150 = arith.subf %146, %149 : vector<1x8x8xf32>
    %151 = math.exp %150 : vector<1x8x8xf32>
    %cst_58 = arith.constant dense<0.000000e+00> : vector<1x8xf32>
    %152 = vector.multi_reduction <add>, %151, %cst_58 [2] : vector<1x8x8xf32> to vector<1x8xf32>
    %153 = vector.shape_cast %152 : vector<1x8xf32> to vector<1x8x1xf32>
    %154 = vector.broadcast %153 : vector<1x8x1xf32> to vector<1x8x8xf32>
    %155 = arith.divf %151, %154 : vector<1x8x8xf32>
    %156 = tpu.concatenate %155, %49 in 2 : vector<1x8x8xf32>, vector<1x8x120xf32> -> vector<1x8x128xf32>
    %157 = vector.shape_cast %156 : vector<1x8x128xf32> to vector<1x1x8x128xf32>
    %c0_59 = arith.constant 0 : index
    %c2_60 = arith.constant 2 : index
    %c0_61 = arith.constant 0 : index
    %c0_62 = arith.constant 0 : index
    %158 = vector.load %arg11[%c0_59, %c2_60, %c0_61, %c0_62] : memref<1x4x8x128xf32, #tpu.memory_space<vmem>>, vector<1x1x8x128xf32>
    tpu.vector_store %arg11[%c0_59, %c2_60, %c0_61, %c0_62], %157 {strides = array<i32>} : memref<1x4x8x128xf32, #tpu.memory_space<vmem>>, vector<1x1x8x128xf32>,
    %159 = arith.truncf %155 : vector<1x8x8xf32> to vector<1x8x8xbf16>
    "tpu.trace_start"() <{level = 10 : i32, message = "bqk,bkd->bqd"}> : () -> ()
    %cst_63 = arith.constant dense<0.000000e+00> : vector<1x8x32xf32>
    %160 = tpu.matmul %159, %139, %cst_63 {dimension_numbers = #tpu.dot_dimension_numbers<[2], [1], [1], [2], [0, 0, 0, 1, 1, 2], [0], [0]>} : vector<1x8x8xbf16>, vector<1x8x32xbf16>, vector<1x8x32xf32> -> vector<1x8x32xf32>
    "tpu.trace_stop"() : () -> ()
    %161 = arith.addf %124, %160 : vector<1x8x32xf32>
    %c24_i32_64 = arith.constant 24 : i32
    %162 = vector.broadcast %c24_i32_64 : i32 to vector<1x1x32xi32>
    %163 = arith.cmpi sge, %48, %162 : vector<1x1x32xi32>
    %c32_i32 = arith.constant 32 : i32
    %164 = vector.broadcast %c32_i32 : i32 to vector<1x1x32xi32>
    %165 = arith.cmpi slt, %48, %164 : vector<1x1x32xi32>
    %166 = arith.andi %163, %165 : vector<1x1x32xi1>
    %cst_65 = arith.constant 0.000000e+00 : f32
    %167 = vector.shape_cast %166 : vector<1x1x32xi1> to vector<1x1x32xi1>
    %168 = vector.broadcast %167 : vector<1x1x32xi1> to vector<1x8x32xi1>
    %169 = vector.broadcast %cst_65 : f32 to vector<1x8x32xf32>
    %170 = arith.select %168, %45, %169 : vector<1x8x32xi1>, vector<1x8x32xf32>
    %171 = arith.truncf %170 : vector<1x8x32xf32> to vector<1x8x32xbf16>
    %cst_66 = arith.constant 0.000000e+00 : f32
    %172 = vector.shape_cast %166 : vector<1x1x32xi1> to vector<1x1x32xi1>
    %173 = vector.broadcast %172 : vector<1x1x32xi1> to vector<1x8x32xi1>
    %174 = vector.broadcast %cst_66 : f32 to vector<1x8x32xf32>
    %175 = arith.select %173, %46, %174 : vector<1x8x32xi1>, vector<1x8x32xf32>
    %176 = arith.truncf %175 : vector<1x8x32xf32> to vector<1x8x32xbf16>
    "tpu.trace_start"() <{level = 10 : i32, message = "bqd,bkd->bqk"}> : () -> ()
    %cst_67 = arith.constant dense<0.000000e+00> : vector<1x8x8xf32>
    %177 = tpu.matmul %44, %171, %cst_67 {dimension_numbers = #tpu.dot_dimension_numbers<[2], [2], [1], [1], [0, 0, 0, 1, 1, 1], [0], [0]>} : vector<1x8x32xbf16>, vector<1x8x32xbf16>, vector<1x8x8xf32> -> vector<1x8x8xf32>
    %cst_68 = arith.constant 0.000000e+00 : f32
    "tpu.trace_stop"() : () -> ()
    %178 = vector.broadcast %cst_68 : f32 to vector<1x1x8xf32>
    %179 = arith.cmpf oeq, %47, %178 : vector<1x1x8xf32>
    %cst_69 = arith.constant -1.000000e+09 : f32
    %180 = vector.shape_cast %179 : vector<1x1x8xi1> to vector<1x1x8xi1>
    %181 = vector.broadcast %180 : vector<1x1x8xi1> to vector<1x8x8xi1>
    %182 = vector.broadcast %cst_69 : f32 to vector<1x8x8xf32>
    %183 = arith.select %181, %182, %177 : vector<1x8x8xi1>, vector<1x8x8xf32>
    %cst_70 = arith.constant dense<0xFF800000> : vector<1x8xf32>
    %184 = vector.multi_reduction <maximumf>, %183, %cst_70 [2] : vector<1x8x8xf32> to vector<1x8xf32>
    %185 = vector.shape_cast %184 : vector<1x8xf32> to vector<1x8x1xf32>
    %186 = vector.broadcast %185 : vector<1x8x1xf32> to vector<1x8x8xf32>
    %187 = arith.subf %183, %186 : vector<1x8x8xf32>
    %188 = math.exp %187 : vector<1x8x8xf32>
    %cst_71 = arith.constant dense<0.000000e+00> : vector<1x8xf32>
    %189 = vector.multi_reduction <add>, %188, %cst_71 [2] : vector<1x8x8xf32> to vector<1x8xf32>
    %190 = vector.shape_cast %189 : vector<1x8xf32> to vector<1x8x1xf32>
    %191 = vector.broadcast %190 : vector<1x8x1xf32> to vector<1x8x8xf32>
    %192 = arith.divf %188, %191 : vector<1x8x8xf32>
    %193 = tpu.concatenate %192, %49 in 2 : vector<1x8x8xf32>, vector<1x8x120xf32> -> vector<1x8x128xf32>
    %194 = vector.shape_cast %193 : vector<1x8x128xf32> to vector<1x1x8x128xf32>
    %c0_72 = arith.constant 0 : index
    %c3_73 = arith.constant 3 : index
    %c0_74 = arith.constant 0 : index
    %c0_75 = arith.constant 0 : index
    %195 = vector.load %arg11[%c0_72, %c3_73, %c0_74, %c0_75] : memref<1x4x8x128xf32, #tpu.memory_space<vmem>>, vector<1x1x8x128xf32>
    tpu.vector_store %arg11[%c0_72, %c3_73, %c0_74, %c0_75], %194 {strides = array<i32>} : memref<1x4x8x128xf32, #tpu.memory_space<vmem>>, vector<1x1x8x128xf32>,
    %196 = arith.truncf %192 : vector<1x8x8xf32> to vector<1x8x8xbf16>
    "tpu.trace_start"() <{level = 10 : i32, message = "bqk,bkd->bqd"}> : () -> ()
    %cst_76 = arith.constant dense<0.000000e+00> : vector<1x8x32xf32>
    %197 = tpu.matmul %196, %176, %cst_76 {dimension_numbers = #tpu.dot_dimension_numbers<[2], [1], [1], [2], [0, 0, 0, 1, 1, 2], [0], [0]>} : vector<1x8x8xbf16>, vector<1x8x32xbf16>, vector<1x8x32xf32> -> vector<1x8x32xf32>
    "tpu.trace_stop"() : () -> ()
    %198 = arith.addf %161, %197 : vector<1x8x32xf32>
    %199 = vector.shape_cast %198 : vector<1x8x32xf32> to vector<8x32xf32>
    %200 = arith.truncf %199 : vector<8x32xf32> to vector<8x32xbf16>
    %c0_77 = arith.constant 0 : index
    %c0_78 = arith.constant 0 : index
    %201 = vector.load %arg5[%c0_77, %c0_78] : memref<32x32xbf16, #tpu.memory_space<vmem>>, vector<32x32xbf16>
    %cst_79 = arith.constant dense<0.000000e+00> : vector<8x32xf32>
    %202 = tpu.matmul %200, %201, %cst_79 {dimension_numbers = #tpu.dot_dimension_numbers<[1], [0], [0], [1], [0, 0, 1, 1], [], []>} : vector<8x32xbf16>, vector<32x32xbf16>, vector<8x32xf32> -> vector<8x32xf32>
    %203 = vector.broadcast %3 : vector<1x32xf32> to vector<8x32xf32>
    %204 = arith.addf %202, %203 : vector<8x32xf32>
    %205 = arith.addf %9, %204 : vector<8x32xf32>
    %cst_80 = arith.constant dense<0.000000e+00> : vector<8xf32>
    %206 = vector.multi_reduction <add>, %205, %cst_80 [1] : vector<8x32xf32> to vector<8xf32>
    %207 = vector.shape_cast %206 : vector<8xf32> to vector<8x1xf32>
    %cst_81 = arith.constant 3.200000e+01 : f32
    %208 = vector.broadcast %cst_81 : f32 to vector<8x1xf32>
    %209 = arith.divf %207, %208 : vector<8x1xf32>
    %210 = vector.broadcast %209 : vector<8x1xf32> to vector<8x32xf32>
    %211 = arith.subf %205, %210 : vector<8x32xf32>
    %212 = arith.mulf %211, %211 : vector<8x32xf32>
    %cst_82 = arith.constant dense<0.000000e+00> : vector<8xf32>
    %213 = vector.multi_reduction <add>, %212, %cst_82 [1] : vector<8x32xf32> to vector<8xf32>
    %214 = vector.shape_cast %213 : vector<8xf32> to vector<8x1xf32>
    %cst_83 = arith.constant 3.200000e+01 : f32
    %215 = vector.broadcast %cst_83 : f32 to vector<8x1xf32>
    %216 = arith.divf %214, %215 : vector<8x1xf32>
    %217 = vector.broadcast %209 : vector<8x1xf32> to vector<8x32xf32>
    %218 = arith.subf %205, %217 : vector<8x32xf32>
    %cst_84 = arith.constant 9.99999974E-6 : f32
    %219 = vector.broadcast %cst_84 : f32 to vector<8x1xf32>
    %220 = arith.addf %216, %219 : vector<8x1xf32>
    %221 = math.rsqrt %220 : vector<8x1xf32>
    %222 = vector.broadcast %221 : vector<8x1xf32> to vector<8x32xf32>
    %223 = arith.mulf %218, %222 : vector<8x32xf32>
    %224 = vector.broadcast %4 : vector<1x32xf32> to vector<8x32xf32>
    %225 = arith.mulf %223, %224 : vector<8x32xf32>
    %226 = vector.broadcast %5 : vector<1x32xf32> to vector<8x32xf32>
    %227 = arith.addf %225, %226 : vector<8x32xf32>
    %228 = arith.truncf %227 : vector<8x32xf32> to vector<8x32xbf16>
    %c0_85 = arith.constant 0 : index
    %c0_86 = arith.constant 0 : index
    %229 = vector.load %arg6[%c0_85, %c0_86] : memref<32x64xbf16, #tpu.memory_space<vmem>>, vector<32x64xbf16>
    %cst_87 = arith.constant dense<0.000000e+00> : vector<8x64xf32>
    %230 = tpu.matmul %228, %229, %cst_87 {dimension_numbers = #tpu.dot_dimension_numbers<[1], [0], [0], [1], [0, 0, 1, 1], [], []>} : vector<8x32xbf16>, vector<32x64xbf16>, vector<8x64xf32> -> vector<8x64xf32>
    %231 = vector.broadcast %6 : vector<1x64xf32> to vector<8x64xf32>
    %232 = arith.addf %230, %231 : vector<8x64xf32>
    %cst_88 = arith.constant 5.000000e-01 : f32
    %233 = vector.broadcast %cst_88 : f32 to vector<8x64xf32>
    %234 = arith.mulf %233, %232 : vector<8x64xf32>
    %cst_89 = arith.constant 0.707106769 : f32
    %235 = vector.broadcast %cst_89 : f32 to vector<8x64xf32>
    %236 = arith.mulf %232, %235 : vector<8x64xf32>
    %cst_90 = arith.constant 0.000000e+00 : f32
    %237 = vector.broadcast %cst_90 : f32 to vector<8x64xf32>
    %238 = arith.cmpf oge, %236, %237 : vector<8x64xf32>
    %cst_91 = arith.constant 1.000000e+00 : f32
    %cst_92 = arith.constant -1.000000e+00 : f32
    %239 = vector.broadcast %cst_91 : f32 to vector<8x64xf32>
    %240 = vector.broadcast %cst_92 : f32 to vector<8x64xf32>
    %241 = arith.select %238, %239, %240 : vector<8x64xi1>, vector<8x64xf32>
    %242 = math.absf %236 : vector<8x64xf32>
    %cst_93 = arith.constant 0.327591091 : f32
    %243 = vector.broadcast %cst_93 : f32 to vector<8x64xf32>
    %244 = arith.mulf %243, %242 : vector<8x64xf32>
    %cst_94 = arith.constant 1.000000e+00 : f32
    %245 = vector.broadcast %cst_94 : f32 to vector<8x64xf32>
    %246 = arith.addf %245, %244 : vector<8x64xf32>
    %cst_95 = arith.constant 1.000000e+00 : f32
    %247 = vector.broadcast %cst_95 : f32 to vector<8x64xf32>
    %248 = arith.divf %247, %246 : vector<8x64xf32>
    %cst_96 = arith.constant 1.06140542 : f32
    %249 = vector.broadcast %cst_96 : f32 to vector<8x64xf32>
    %250 = arith.mulf %249, %248 : vector<8x64xf32>
    %cst_97 = arith.constant -1.45315206 : f32
    %251 = vector.broadcast %cst_97 : f32 to vector<8x64xf32>
    %252 = arith.addf %250, %251 : vector<8x64xf32>
    %253 = arith.mulf %252, %248 : vector<8x64xf32>
    %cst_98 = arith.constant 1.42141378 : f32
    %254 = vector.broadcast %cst_98 : f32 to vector<8x64xf32>
    %255 = arith.addf %253, %254 : vector<8x64xf32>
    %256 = arith.mulf %255, %248 : vector<8x64xf32>
    %cst_99 = arith.constant -0.284496725 : f32
    %257 = vector.broadcast %cst_99 : f32 to vector<8x64xf32>
    %258 = arith.addf %256, %257 : vector<8x64xf32>
    %259 = arith.mulf %258, %248 : vector<8x64xf32>
    %cst_100 = arith.constant 0.254829586 : f32
    %260 = vector.broadcast %cst_100 : f32 to vector<8x64xf32>
    %261 = arith.addf %259, %260 : vector<8x64xf32>
    %262 = arith.mulf %261, %248 : vector<8x64xf32>
    %cst_101 = arith.constant 0.000000e+00 : f32
    %263 = vector.broadcast %cst_101 : f32 to vector<8x64xf32>
    %264 = arith.subf %263, %242 : vector<8x64xf32>
    %265 = arith.mulf %264, %242 : vector<8x64xf32>
    %266 = math.exp %265 : vector<8x64xf32>
    %267 = arith.mulf %262, %266 : vector<8x64xf32>
    %cst_102 = arith.constant 1.000000e+00 : f32
    %268 = vector.broadcast %cst_102 : f32 to vector<8x64xf32>
    %269 = arith.subf %268, %267 : vector<8x64xf32>
    %270 = arith.mulf %241, %269 : vector<8x64xf32>
    %cst_103 = arith.constant 1.000000e+00 : f32
    %271 = vector.broadcast %cst_103 : f32 to vector<8x64xf32>
    %272 = arith.addf %271, %270 : vector<8x64xf32>
    %273 = arith.mulf %234, %272 : vector<8x64xf32>
    %274 = arith.truncf %273 : vector<8x64xf32> to vector<8x64xbf16>
    %c0_104 = arith.constant 0 : index
    %c0_105 = arith.constant 0 : index
    %275 = vector.load %arg7[%c0_104, %c0_105] : memref<64x32xbf16, #tpu.memory_space<vmem>>, vector<64x32xbf16>
    %cst_106 = arith.constant dense<0.000000e+00> : vector<8x32xf32>
    %276 = tpu.matmul %274, %275, %cst_106 {dimension_numbers = #tpu.dot_dimension_numbers<[1], [0], [0], [1], [0, 0, 1, 1], [], []>} : vector<8x64xbf16>, vector<64x32xbf16>, vector<8x32xf32> -> vector<8x32xf32>
    %277 = vector.broadcast %7 : vector<1x32xf32> to vector<8x32xf32>
    %278 = arith.addf %276, %277 : vector<8x32xf32>
    %279 = arith.truncf %10 : vector<8x32xf32> to vector<8x32xbf16>
    %c0_107 = arith.constant 0 : index
    %c0_108 = arith.constant 0 : index
    %280 = vector.load %arg8[%c0_107, %c0_108] : memref<32x32xbf16, #tpu.memory_space<vmem>>, vector<32x32xbf16>
    %cst_109 = arith.constant dense<0.000000e+00> : vector<8x32xf32>
    %281 = tpu.matmul %279, %280, %cst_109 {dimension_numbers = #tpu.dot_dimension_numbers<[1], [0], [0], [1], [0, 0, 1, 1], [], []>} : vector<8x32xbf16>, vector<32x32xbf16>, vector<8x32xf32> -> vector<8x32xf32>
    %282 = vector.broadcast %8 : vector<1x32xf32> to vector<8x32xf32>
    %283 = arith.addf %281, %282 : vector<8x32xf32>
    %284 = arith.negf %283 : vector<8x32xf32>
    %285 = math.exp %284 : vector<8x32xf32>
    %cst_110 = arith.constant 1.000000e+00 : f32
    %286 = vector.broadcast %cst_110 : f32 to vector<8x32xf32>
    %287 = arith.addf %286, %285 : vector<8x32xf32>
    %288 = arith.divf %286, %287 : vector<8x32xf32>
    %289 = arith.mulf %278, %288 : vector<8x32xf32>
    %cst_111 = arith.constant 1.000000e+00 : f32
    %290 = vector.broadcast %cst_111 : f32 to vector<8x32xf32>
    %291 = arith.subf %290, %288 : vector<8x32xf32>
    %292 = arith.mulf %10, %291 : vector<8x32xf32>
    %293 = arith.addf %289, %292 : vector<8x32xf32>
    %294 = arith.addf %205, %293 : vector<8x32xf32>
    %c0_112 = arith.constant 0 : index
    %c0_113 = arith.constant 0 : index
    %295 = vector.load %arg10[%c0_112, %c0_113] : memref<8x32xf32, #tpu.memory_space<vmem>>, vector<8x32xf32>
    tpu.vector_store %arg10[%c0_112, %c0_113], %294 {strides = array<i32>} : memref<8x32xf32, #tpu.memory_space<vmem>>, vector<8x32xf32>,
    return
  }
  func.func @transform_0(%arg0: i32) -> (i32, i32) {
    %c0_i32 = arith.constant 0 : i32
    %c0_i32_0 = arith.constant 0 : i32
    return %arg0, %c0_i32 : i32, i32
  }
  func.func @transform_1(%arg0: i32) -> (i32, i32, i32) {
    %c0_i32 = arith.constant 0 : i32
    %c0_i32_0 = arith.constant 0 : i32
    %c0_i32_1 = arith.constant 0 : i32
    return %arg0, %c0_i32, %c0_i32_0 : i32, i32, i32
  }
  func.func @transform_2(%arg0: i32) -> (i32, i32) {
    %c0_i32 = arith.constant 0 : i32
    %c0_i32_0 = arith.constant 0 : i32
    return %arg0, %c0_i32 : i32, i32
  }
  func.func @transform_3(%arg0: i32) -> (i32, i32) {
    %c0_i32 = arith.constant 0 : i32
    %c0_i32_0 = arith.constant 0 : i32
    %c0_i32_1 = arith.constant 0 : i32
    return %c0_i32, %c0_i32_0 : i32, i32
  }
  func.func @transform_4(%arg0: i32) -> (i32, i32) {
    %c0_i32 = arith.constant 0 : i32
    %c0_i32_0 = arith.constant 0 : i32
    %c0_i32_1 = arith.constant 0 : i32
    return %c0_i32, %c0_i32_0 : i32, i32
  }
  func.func @transform_5(%arg0: i32) -> (i32, i32) {
    %c0_i32 = arith.constant 0 : i32
    %c0_i32_0 = arith.constant 0 : i32
    %c0_i32_1 = arith.constant 0 : i32
    return %c0_i32, %c0_i32_0 : i32, i32
  }
  func.func @transform_6(%arg0: i32) -> (i32, i32) {
    %c0_i32 = arith.constant 0 : i32
    %c0_i32_0 = arith.constant 0 : i32
    %c0_i32_1 = arith.constant 0 : i32
    return %c0_i32, %c0_i32_0 : i32, i32
  }
  func.func @transform_7(%arg0: i32) -> (i32, i32) {
    %c0_i32 = arith.constant 0 : i32
    %c0_i32_0 = arith.constant 0 : i32
    %c0_i32_1 = arith.constant 0 : i32
    return %c0_i32, %c0_i32_0 : i32, i32
  }
  func.func @transform_8(%arg0: i32) -> (i32, i32) {
    %c0_i32 = arith.constant 0 : i32
    %c0_i32_0 = arith.constant 0 : i32
    %c0_i32_1 = arith.constant 0 : i32
    return %c0_i32, %c0_i32_0 : i32, i32
  }
  func.func @transform_9(%arg0: i32) -> (i32, i32) {
    %c0_i32 = arith.constant 0 : i32
    %c0_i32_0 = arith.constant 0 : i32
    return %arg0, %c0_i32 : i32, i32
  }
  func.func @transform_10(%arg0: i32) -> (i32, i32, i32, i32) {
    %c0_i32 = arith.constant 0 : i32
    %c0_i32_0 = arith.constant 0 : i32
    %c0_i32_1 = arith.constant 0 : i32
    %c0_i32_2 = arith.constant 0 : i32
    return %arg0, %c0_i32, %c0_i32_0, %c0_i32_1 : i32, i32, i32, i32
  }
}

module attributes {stable_mosaic.version = 11 : i64} {
  func.func @_layer_kernel(%arg0: i32, %arg1: memref<8x32xf32, #tpu.memory_space<vmem>>, %arg2: memref<1x1x8xf32, #tpu.memory_space<vmem>>, %arg3: memref<8x32xf32, #tpu.memory_space<vmem>>, %arg4: memref<32x96xbf16, #tpu.memory_space<vmem>>, %arg5: memref<32x32xbf16, #tpu.memory_space<vmem>>, %arg6: memref<32x64xbf16, #tpu.memory_space<vmem>>, %arg7: memref<64x32xbf16, #tpu.memory_space<vmem>>, %arg8: memref<32x32xbf16, #tpu.memory_space<vmem>>, %arg9: memref<9x128xf32, #tpu.memory_space<vmem>>, %arg10: memref<8x32xf32, #tpu.memory_space<vmem>>, %arg11: memref<1x4x8x128xf32, #tpu.memory_space<vmem>>) attributes {dimension_semantics = [#tpu.dimension_semantics<parallel>], iteration_bounds = array<i64: 2>, scalar_prefetch = 0 : i64, scratch_operands = 0 : i64, tpu.core_type = #tpu.core_type<tc>, window_params = [{transform_indices = @transform_0, window_bounds = array<i64: 8, 32>}, {transform_indices = @transform_1, window_bounds = array<i64: 1, 1, 8>}, {transform_indices = @transform_2, window_bounds = array<i64: 8, 32>}, {pipeline_mode = #tpu.pipeline_mode<synchronous>, transform_indices = @transform_3, window_bounds = array<i64: 32, 96>}, {pipeline_mode = #tpu.pipeline_mode<synchronous>, transform_indices = @transform_4, window_bounds = array<i64: 32, 32>}, {pipeline_mode = #tpu.pipeline_mode<synchronous>, transform_indices = @transform_5, window_bounds = array<i64: 32, 64>}, {pipeline_mode = #tpu.pipeline_mode<synchronous>, transform_indices = @transform_6, window_bounds = array<i64: 64, 32>}, {pipeline_mode = #tpu.pipeline_mode<synchronous>, transform_indices = @transform_7, window_bounds = array<i64: 32, 32>}, {pipeline_mode = #tpu.pipeline_mode<synchronous>, transform_indices = @transform_8, window_bounds = array<i64: 9, 128>}, {transform_indices = @transform_9, window_bounds = array<i64: 8, 32>}, {transform_indices = @transform_10, window_bounds = array<i64: 1, 4, 8, 128>}]} {
    %c0 = arith.constant 0 : index
    %c0_0 = arith.constant 0 : index
    %0 = vector.load %arg9[%c0, %c0_0] : memref<9x128xf32, #tpu.memory_space<vmem>>, vector<1x32xf32>
    %c1 = arith.constant 1 : index
    %c0_1 = arith.constant 0 : index
    %1 = vector.load %arg9[%c1, %c0_1] : memref<9x128xf32, #tpu.memory_space<vmem>>, vector<1x32xf32>
    %c2 = arith.constant 2 : index
    %c0_2 = arith.constant 0 : index
    %2 = vector.load %arg9[%c2, %c0_2] : memref<9x128xf32, #tpu.memory_space<vmem>>, vector<1x96xf32>
    %c3 = arith.constant 3 : index
    %c0_3 = arith.constant 0 : index
    %3 = vector.load %arg9[%c3, %c0_3] : memref<9x128xf32, #tpu.memory_space<vmem>>, vector<1x32xf32>
    %c4 = arith.constant 4 : index
    %c0_4 = arith.constant 0 : index
    %4 = vector.load %arg9[%c4, %c0_4] : memref<9x128xf32, #tpu.memory_space<vmem>>, vector<1x32xf32>
    %c5 = arith.constant 5 : index
    %c0_5 = arith.constant 0 : index
    %5 = vector.load %arg9[%c5, %c0_5] : memref<9x128xf32, #tpu.memory_space<vmem>>, vector<1x32xf32>
    %c6 = arith.constant 6 : index
    %c0_6 = arith.constant 0 : index
    %6 = vector.load %arg9[%c6, %c0_6] : memref<9x128xf32, #tpu.memory_space<vmem>>, vector<1x64xf32>
    %c7 = arith.constant 7 : index
    %c0_7 = arith.constant 0 : index
    %7 = vector.load %arg9[%c7, %c0_7] : memref<9x128xf32, #tpu.memory_space<vmem>>, vector<1x32xf32>
    %c8 = arith.constant 8 : index
    %c0_8 = arith.constant 0 : index
    %8 = vector.load %arg9[%c8, %c0_8] : memref<9x128xf32, #tpu.memory_space<vmem>>, vector<1x32xf32>
    %c0_9 = arith.constant 0 : index
    %c0_10 = arith.constant 0 : index
    %9 = vector.load %arg1[%c0_9, %c0_10] : memref<8x32xf32, #tpu.memory_space<vmem>>, vector<8x32xf32>
    %c0_11 = arith.constant 0 : index
    %c0_12 = arith.constant 0 : index
    %10 = vector.load %arg3[%c0_11, %c0_12] : memref<8x32xf32, #tpu.memory_space<vmem>>, vector<8x32xf32>
    %cst = arith.constant dense<0.000000e+00> : vector<8xf32>
    %11 = vector.multi_reduction <add>, %9, %cst [1] : vector<8x32xf32> to vector<8xf32>
    %12 = vector.shape_cast %11 : vector<8xf32> to vector<8x1xf32>
    %cst_13 = arith.constant 3.200000e+01 : f32
    %13 = vector.broadcast %cst_13 : f32 to vector<8x1xf32>
    %14 = arith.divf %12, %13 : vector<8x1xf32>
    %15 = vector.broadcast %14 : vector<8x1xf32> to vector<8x32xf32>
    %16 = arith.subf %9, %15 : vector<8x32xf32>
    %17 = arith.mulf %16, %16 : vector<8x32xf32>
    %cst_14 = arith.constant dense<0.000000e+00> : vector<8xf32>
    %18 = vector.multi_reduction <add>, %17, %cst_14 [1] : vector<8x32xf32> to vector<8xf32>
    %19 = vector.shape_cast %18 : vector<8xf32> to vector<8x1xf32>
    %cst_15 = arith.constant 3.200000e+01 : f32
    %20 = vector.broadcast %cst_15 : f32 to vector<8x1xf32>
    %21 = arith.divf %19, %20 : vector<8x1xf32>
    %22 = vector.broadcast %14 : vector<8x1xf32> to vector<8x32xf32>
    %23 = arith.subf %9, %22 : vector<8x32xf32>
    %cst_16 = arith.constant 9.99999974E-6 : f32
    %24 = vector.broadcast %cst_16 : f32 to vector<8x1xf32>
    %25 = arith.addf %21, %24 : vector<8x1xf32>
    %26 = math.rsqrt %25 : vector<8x1xf32>
    %27 = vector.broadcast %26 : vector<8x1xf32> to vector<8x32xf32>
    %28 = arith.mulf %23, %27 : vector<8x32xf32>
    %29 = vector.broadcast %0 : vector<1x32xf32> to vector<8x32xf32>
    %30 = arith.mulf %28, %29 : vector<8x32xf32>
    %31 = vector.broadcast %1 : vector<1x32xf32> to vector<8x32xf32>
    %32 = arith.addf %30, %31 : vector<8x32xf32>
    %33 = arith.truncf %32 : vector<8x32xf32> to vector<8x32xbf16>
    %c0_17 = arith.constant 0 : index
    %c0_18 = arith.constant 0 : index
    %34 = vector.load %arg4[%c0_17, %c0_18] : memref<32x96xbf16, #tpu.memory_space<vmem>>, vector<32x96xbf16>
    %cst_19 = arith.constant dense<0.000000e+00> : vector<8x96xf32>
    %35 = tpu.matmul %33, %34, %cst_19 {dimension_numbers = #tpu.dot_dimension_numbers<[1], [0], [0], [1], [0, 0, 1, 1], [], []>} : vector<8x32xbf16>, vector<32x96xbf16>, vector<8x96xf32> -> vector<8x96xf32>
    %36 = vector.broadcast %2 : vector<1x96xf32> to vector<8x96xf32>
    %37 = arith.addf %35, %36 : vector<8x96xf32>
    %38 = vector.extract_strided_slice %37 {offsets = [0, 0], sizes = [8, 32], strides = [1, 1]} : vector<8x96xf32> to vector<8x32xf32>
    %39 = vector.extract_strided_slice %37 {offsets = [0, 32], sizes = [8, 32], strides = [1, 1]} : vector<8x96xf32> to vector<8x32xf32>
    %40 = vector.extract_strided_slice %37 {offsets = [0, 64], sizes = [8, 32], strides = [1, 1]} : vector<8x96xf32> to vector<8x32xf32>
    %cst_20 = arith.constant 0.353553385 : f32
    %41 = vector.broadcast %cst_20 : f32 to vector<8x32xf32>
    %42 = arith.mulf %38, %41 : vector<8x32xf32>
    %43 = vector.shape_cast %42 : vector<8x32xf32> to vector<1x8x32xf32>
    %44 = arith.truncf %43 : vector<1x8x32xf32> to vector<1x8x32xbf16>
    %45 = vector.shape_cast %39 : vector<8x32xf32> to vector<1x8x32xf32>
    %46 = vector.shape_cast %40 : vector<8x32xf32> to vector<1x8x32xf32>
    %c0_21 = arith.constant 0 : index
    %c0_22 = arith.constant 0 : index
    %c0_23 = arith.constant 0 : index
    %47 = vector.load %arg2[%c0_21, %c0_22, %c0_23] : memref<1x1x8xf32, #tpu.memory_space<vmem>>, vector<1x1x8xf32>
    %48 = tpu.iota {dimensions = array<i32: 2>} : vector<1x1x32xi32>
    %cst_24 = arith.constant 0.000000e+00 : f32
    %49 = vector.broadcast %cst_24 : f32 to vector<1x8x120xf32>
    %cst_25 = arith.constant 0.000000e+00 : f32
    %50 = vector.broadcast %cst_25 : f32 to vector<1x8x32xf32>
    %c0_i32 = arith.constant 0 : i32
    %51 = vector.broadcast %c0_i32 : i32 to vector<1x1x32xi32>
    %52 = arith.cmpi sge, %48, %51 : vector<1x1x32xi32>
    %c8_i32 = arith.constant 8 : i32
    %53 = vector.broadcast %c8_i32 : i32 to vector<1x1x32xi32>
    %54 = arith.cmpi slt, %48, %53 : vector<1x1x32xi32>
    %55 = arith.andi %52, %54 : vector<1x1x32xi1>
    %cst_26 = arith.constant 0.000000e+00 : f32
    %56 = vector.shape_cast %55 : vector<1x1x32xi1> to vector<1x1x32xi1>
    %57 = vector.broadcast %56 : vector<1x1x32xi1> to vector<1x8x32xi1>
    %58 = vector.broadcast %cst_26 : f32 to vector<1x8x32xf32>
    %59 = arith.select %57, %45, %58 : vector<1x8x32xi1>, vector<1x8x32xf32>
    %60 = arith.truncf %59 : vector<1x8x32xf32> to vector<1x8x32xbf16>
    %cst_27 = arith.constant 0.000000e+00 : f32
    %61 = vector.shape_cast %55 : vector<1x1x32xi1> to vector<1x1x32xi1>
    %62 = vector.broadcast %61 : vector<1x1x32xi1> to vector<1x8x32xi1>
    %63 = vector.broadcast %cst_27 : f32 to vector<1x8x32xf32>
    %64 = arith.select %62, %46, %63 : vector<1x8x32xi1>, vector<1x8x32xf32>
    %65 = arith.truncf %64 : vector<1x8x32xf32> to vector<1x8x32xbf16>
    "tpu.trace_start"() <{level = 10 : i32, message = "bqd,bkd->bqk"}> : () -> ()
    %cst_28 = arith.constant dense<0.000000e+00> : vector<1x8x8xf32>
    %66 = tpu.matmul %44, %60, %cst_28 {dimension_numbers = #tpu.dot_dimension_numbers<[2], [2], [1], [1], [0, 0, 0, 1, 1, 1], [0], [0]>} : vector<1x8x32xbf16>, vector<1x8x32xbf16>, vector<1x8x8xf32> -> vector<1x8x8xf32>
    %cst_29 = arith.constant 0.000000e+00 : f32
    "tpu.trace_stop"() : () -> ()
    %67 = vector.broadcast %cst_29 : f32 to vector<1x1x8xf32>
    %68 = arith.cmpf oeq, %47, %67 : vector<1x1x8xf32>
    %cst_30 = arith.constant -1.000000e+09 : f32
    %69 = vector.shape_cast %68 : vector<1x1x8xi1> to vector<1x1x8xi1>
    %70 = vector.broadcast %69 : vector<1x1x8xi1> to vector<1x8x8xi1>
    %71 = vector.broadcast %cst_30 : f32 to vector<1x8x8xf32>
    %72 = arith.select %70, %71, %66 : vector<1x8x8xi1>, vector<1x8x8xf32>
    %cst_31 = arith.constant dense<0xFF800000> : vector<1x8xf32>
    %73 = vector.multi_reduction <maximumf>, %72, %cst_31 [2] : vector<1x8x8xf32> to vector<1x8xf32>
    %74 = vector.shape_cast %73 : vector<1x8xf32> to vector<1x8x1xf32>
    %75 = vector.broadcast %74 : vector<1x8x1xf32> to vector<1x8x8xf32>
    %76 = arith.subf %72, %75 : vector<1x8x8xf32>
    %77 = math.exp %76 : vector<1x8x8xf32>
    %cst_32 = arith.constant dense<0.000000e+00> : vector<1x8xf32>
    %78 = vector.multi_reduction <add>, %77, %cst_32 [2] : vector<1x8x8xf32> to vector<1x8xf32>
    %79 = vector.shape_cast %78 : vector<1x8xf32> to vector<1x8x1xf32>
    %80 = vector.broadcast %79 : vector<1x8x1xf32> to vector<1x8x8xf32>
    %81 = arith.divf %77, %80 : vector<1x8x8xf32>
    %82 = tpu.concatenate %81, %49 in 2 : vector<1x8x8xf32>, vector<1x8x120xf32> -> vector<1x8x128xf32>
    %83 = vector.shape_cast %82 : vector<1x8x128xf32> to vector<1x1x8x128xf32>
    %c0_33 = arith.constant 0 : index
    %c0_34 = arith.constant 0 : index
    %c0_35 = arith.constant 0 : index
    %c0_36 = arith.constant 0 : index
    %84 = vector.load %arg11[%c0_33, %c0_34, %c0_35, %c0_36] : memref<1x4x8x128xf32, #tpu.memory_space<vmem>>, vector<1x1x8x128xf32>
    tpu.vector_store %arg11[%c0_33, %c0_34, %c0_35, %c0_36], %83 {strides = array<i32>} : memref<1x4x8x128xf32, #tpu.memory_space<vmem>>, vector<1x1x8x128xf32>,
    %85 = arith.truncf %81 : vector<1x8x8xf32> to vector<1x8x8xbf16>
    "tpu.trace_start"() <{level = 10 : i32, message = "bqk,bkd->bqd"}> : () -> ()
    %cst_37 = arith.constant dense<0.000000e+00> : vector<1x8x32xf32>
    %86 = tpu.matmul %85, %65, %cst_37 {dimension_numbers = #tpu.dot_dimension_numbers<[2], [1], [1], [2], [0, 0, 0, 1, 1, 2], [0], [0]>} : vector<1x8x8xbf16>, vector<1x8x32xbf16>, vector<1x8x32xf32> -> vector<1x8x32xf32>
    "tpu.trace_stop"() : () -> ()
    %87 = arith.addf %50, %86 : vector<1x8x32xf32>
    %c8_i32_38 = arith.constant 8 : i32
    %88 = vector.broadcast %c8_i32_38 : i32 to vector<1x1x32xi32>
    %89 = arith.cmpi sge, %48, %88 : vector<1x1x32xi32>
    %c16_i32 = arith.constant 16 : i32
    %90 = vector.broadcast %c16_i32 : i32 to vector<1x1x32xi32>
    %91 = arith.cmpi slt, %48, %90 : vector<1x1x32xi32>
    %92 = arith.andi %89, %91 : vector<1x1x32xi1>
    %cst_39 = arith.constant 0.000000e+00 : f32
    %93 = vector.shape_cast %92 : vector<1x1x32xi1> to vector<1x1x32xi1>
    %94 = vector.broadcast %93 : vector<1x1x32xi1> to vector<1x8x32xi1>
    %95 = vector.broadcast %cst_39 : f32 to vector<1x8x32xf32>
    %96 = arith.select %94, %45, %95 : vector<1x8x32xi1>, vector<1x8x32xf32>
    %97 = arith.truncf %96 : vector<1x8x32xf32> to vector<1x8x32xbf16>
    %cst_40 = arith.constant 0.000000e+00 : f32
    %98 = vector.shape_cast %92 : vector<1x1x32xi1> to vector<1x1x32xi1>
    %99 = vector.broadcast %98 : vector<1x1x32xi1> to vector<1x8x32xi1>
    %100 = vector.broadcast %cst_40 : f32 to vector<1x8x32xf32>
    %101 = arith.select %99, %46, %100 : vector<1x8x32xi1>, vector<1x8x32xf32>
    %102 = arith.truncf %101 : vector<1x8x32xf32> to vector<1x8x32xbf16>
    "tpu.trace_start"() <{level = 10 : i32, message = "bqd,bkd->bqk"}> : () -> ()
    %cst_41 = arith.constant dense<0.000000e+00> : vector<1x8x8xf32>
    %103 = tpu.matmul %44, %97, %cst_41 {dimension_numbers = #tpu.dot_dimension_numbers<[2], [2], [1], [1], [0, 0, 0, 1, 1, 1], [0], [0]>} : vector<1x8x32xbf16>, vector<1x8x32xbf16>, vector<1x8x8xf32> -> vector<1x8x8xf32>
    %cst_42 = arith.constant 0.000000e+00 : f32
    "tpu.trace_stop"() : () -> ()
    %104 = vector.broadcast %cst_42 : f32 to vector<1x1x8xf32>
    %105 = arith.cmpf oeq, %47, %104 : vector<1x1x8xf32>
    %cst_43 = arith.constant -1.000000e+09 : f32
    %106 = vector.shape_cast %105 : vector<1x1x8xi1> to vector<1x1x8xi1>
    %107 = vector.broadcast %106 : vector<1x1x8xi1> to vector<1x8x8xi1>
    %108 = vector.broadcast %cst_43 : f32 to vector<1x8x8xf32>
    %109 = arith.select %107, %108, %103 : vector<1x8x8xi1>, vector<1x8x8xf32>
    %cst_44 = arith.constant dense<0xFF800000> : vector<1x8xf32>
    %110 = vector.multi_reduction <maximumf>, %109, %cst_44 [2] : vector<1x8x8xf32> to vector<1x8xf32>
    %111 = vector.shape_cast %110 : vector<1x8xf32> to vector<1x8x1xf32>
    %112 = vector.broadcast %111 : vector<1x8x1xf32> to vector<1x8x8xf32>
    %113 = arith.subf %109, %112 : vector<1x8x8xf32>
    %114 = math.exp %113 : vector<1x8x8xf32>
    %cst_45 = arith.constant dense<0.000000e+00> : vector<1x8xf32>
    %115 = vector.multi_reduction <add>, %114, %cst_45 [2] : vector<1x8x8xf32> to vector<1x8xf32>
    %116 = vector.shape_cast %115 : vector<1x8xf32> to vector<1x8x1xf32>
    %117 = vector.broadcast %116 : vector<1x8x1xf32> to vector<1x8x8xf32>
    %118 = arith.divf %114, %117 : vector<1x8x8xf32>
    %119 = tpu.concatenate %118, %49 in 2 : vector<1x8x8xf32>, vector<1x8x120xf32> -> vector<1x8x128xf32>
    %120 = vector.shape_cast %119 : vector<1x8x128xf32> to vector<1x1x8x128xf32>
    %c0_46 = arith.constant 0 : index
    %c1_47 = arith.constant 1 : index
    %c0_48 = arith.constant 0 : index
    %c0_49 = arith.constant 0 : index
    %121 = vector.load %arg11[%c0_46, %c1_47, %c0_48, %c0_49] : memref<1x4x8x128xf32, #tpu.memory_space<vmem>>, vector<1x1x8x128xf32>
    tpu.vector_store %arg11[%c0_46, %c1_47, %c0_48, %c0_49], %120 {strides = array<i32>} : memref<1x4x8x128xf32, #tpu.memory_space<vmem>>, vector<1x1x8x128xf32>,
    %122 = arith.truncf %118 : vector<1x8x8xf32> to vector<1x8x8xbf16>
    "tpu.trace_start"() <{level = 10 : i32, message = "bqk,bkd->bqd"}> : () -> ()
    %cst_50 = arith.constant dense<0.000000e+00> : vector<1x8x32xf32>
    %123 = tpu.matmul %122, %102, %cst_50 {dimension_numbers = #tpu.dot_dimension_numbers<[2], [1], [1], [2], [0, 0, 0, 1, 1, 2], [0], [0]>} : vector<1x8x8xbf16>, vector<1x8x32xbf16>, vector<1x8x32xf32> -> vector<1x8x32xf32>
    "tpu.trace_stop"() : () -> ()
    %124 = arith.addf %87, %123 : vector<1x8x32xf32>
    %c16_i32_51 = arith.constant 16 : i32
    %125 = vector.broadcast %c16_i32_51 : i32 to vector<1x1x32xi32>
    %126 = arith.cmpi sge, %48, %125 : vector<1x1x32xi32>
    %c24_i32 = arith.constant 24 : i32
    %127 = vector.broadcast %c24_i32 : i32 to vector<1x1x32xi32>
    %128 = arith.cmpi slt, %48, %127 : vector<1x1x32xi32>
    %129 = arith.andi %126, %128 : vector<1x1x32xi1>
    %cst_52 = arith.constant 0.000000e+00 : f32
    %130 = vector.shape_cast %129 : vector<1x1x32xi1> to vector<1x1x32xi1>
    %131 = vector.broadcast %130 : vector<1x1x32xi1> to vector<1x8x32xi1>
    %132 = vector.broadcast %cst_52 : f32 to vector<1x8x32xf32>
    %133 = arith.select %131, %45, %132 : vector<1x8x32xi1>, vector<1x8x32xf32>
    %134 = arith.truncf %133 : vector<1x8x32xf32> to vector<1x8x32xbf16>
    %cst_53 = arith.constant 0.000000e+00 : f32
    %135 = vector.shape_cast %129 : vector<1x1x32xi1> to vector<1x1x32xi1>
    %136 = vector.broadcast %135 : vector<1x1x32xi1> to vector<1x8x32xi1>
    %137 = vector.broadcast %cst_53 : f32 to vector<1x8x32xf32>
    %138 = arith.select %136, %46, %137 : vector<1x8x32xi1>, vector<1x8x32xf32>
    %139 = arith.truncf %138 : vector<1x8x32xf32> to vector<1x8x32xbf16>
    "tpu.trace_start"() <{level = 10 : i32, message = "bqd,bkd->bqk"}> : () -> ()
    %cst_54 = arith.constant dense<0.000000e+00> : vector<1x8x8xf32>
    %140 = tpu.matmul %44, %134, %cst_54 {dimension_numbers = #tpu.dot_dimension_numbers<[2], [2], [1], [1], [0, 0, 0, 1, 1, 1], [0], [0]>} : vector<1x8x32xbf16>, vector<1x8x32xbf16>, vector<1x8x8xf32> -> vector<1x8x8xf32>
    %cst_55 = arith.constant 0.000000e+00 : f32
    "tpu.trace_stop"() : () -> ()
    %141 = vector.broadcast %cst_55 : f32 to vector<1x1x8xf32>
    %142 = arith.cmpf oeq, %47, %141 : vector<1x1x8xf32>
    %cst_56 = arith.constant -1.000000e+09 : f32
    %143 = vector.shape_cast %142 : vector<1x1x8xi1> to vector<1x1x8xi1>
    %144 = vector.broadcast %143 : vector<1x1x8xi1> to vector<1x8x8xi1>
    %145 = vector.broadcast %cst_56 : f32 to vector<1x8x8xf32>
    %146 = arith.select %144, %145, %140 : vector<1x8x8xi1>, vector<1x8x8xf32>
    %cst_57 = arith.constant dense<0xFF800000> : vector<1x8xf32>
    %147 = vector.multi_reduction <maximumf>, %146, %cst_57 [2] : vector<1x8x8xf32> to vector<1x8xf32>
    %148 = vector.shape_cast %147 : vector<1x8xf32> to vector<1x8x1xf32>
    %149 = vector.broadcast %148 : vector<1x8x1xf32> to vector<1x8x8xf32>
    %150 = arith.subf %146, %149 : vector<1x8x8xf32>
    %151 = math.exp %150 : vector<1x8x8xf32>
    %cst_58 = arith.constant dense<0.000000e+00> : vector<1x8xf32>
    %152 = vector.multi_reduction <add>, %151, %cst_58 [2] : vector<1x8x8xf32> to vector<1x8xf32>
    %153 = vector.shape_cast %152 : vector<1x8xf32> to vector<1x8x1xf32>
    %154 = vector.broadcast %153 : vector<1x8x1xf32> to vector<1x8x8xf32>
    %155 = arith.divf %151, %154 : vector<1x8x8xf32>
    %156 = tpu.concatenate %155, %49 in 2 : vector<1x8x8xf32>, vector<1x8x120xf32> -> vector<1x8x128xf32>
    %157 = vector.shape_cast %156 : vector<1x8x128xf32> to vector<1x1x8x128xf32>
    %c0_59 = arith.constant 0 : index
    %c2_60 = arith.constant 2 : index
    %c0_61 = arith.constant 0 : index
    %c0_62 = arith.constant 0 : index
    %158 = vector.load %arg11[%c0_59, %c2_60, %c0_61, %c0_62] : memref<1x4x8x128xf32, #tpu.memory_space<vmem>>, vector<1x1x8x128xf32>
    tpu.vector_store %arg11[%c0_59, %c2_60, %c0_61, %c0_62], %157 {strides = array<i32>} : memref<1x4x8x128xf32, #tpu.memory_space<vmem>>, vector<1x1x8x128xf32>,
    %159 = arith.truncf %155 : vector<1x8x8xf32> to vector<1x8x8xbf16>
    "tpu.trace_start"() <{level = 10 : i32, message = "bqk,bkd->bqd"}> : () -> ()
    %cst_63 = arith.constant dense<0.000000e+00> : vector<1x8x32xf32>
    %160 = tpu.matmul %159, %139, %cst_63 {dimension_numbers = #tpu.dot_dimension_numbers<[2], [1], [1], [2], [0, 0, 0, 1, 1, 2], [0], [0]>} : vector<1x8x8xbf16>, vector<1x8x32xbf16>, vector<1x8x32xf32> -> vector<1x8x32xf32>
    "tpu.trace_stop"() : () -> ()
    %161 = arith.addf %124, %160 : vector<1x8x32xf32>
    %c24_i32_64 = arith.constant 24 : i32
    %162 = vector.broadcast %c24_i32_64 : i32 to vector<1x1x32xi32>
    %163 = arith.cmpi sge, %48, %162 : vector<1x1x32xi32>
    %c32_i32 = arith.constant 32 : i32
    %164 = vector.broadcast %c32_i32 : i32 to vector<1x1x32xi32>
    %165 = arith.cmpi slt, %48, %164 : vector<1x1x32xi32>
    %166 = arith.andi %163, %165 : vector<1x1x32xi1>
    %cst_65 = arith.constant 0.000000e+00 : f32
    %167 = vector.shape_cast %166 : vector<1x1x32xi1> to vector<1x1x32xi1>
    %168 = vector.broadcast %167 : vector<1x1x32xi1> to vector<1x8x32xi1>
    %169 = vector.broadcast %cst_65 : f32 to vector<1x8x32xf32>
    %170 = arith.select %168, %45, %169 : vector<1x8x32xi1>, vector<1x8x32xf32>
    %171 = arith.truncf %170 : vector<1x8x32xf32> to vector<1x8x32xbf16>
    %cst_66 = arith.constant 0.000000e+00 : f32
    %172 = vector.shape_cast %166 : vector<1x1x32xi1> to vector<1x1x32xi1>
    %173 = vector.broadcast %172 : vector<1x1x32xi1> to vector<1x8x32xi1>
    %174 = vector.broadcast %cst_66 : f32 to vector<1x8x32xf32>
    %175 = arith.select %173, %46, %174 : vector<1x8x32xi1>, vector<1x8x32xf32>
    %176 = arith.truncf %175 : vector<1x8x32xf32> to vector<1x8x32xbf16>
    "tpu.trace_start"() <{level = 10 : i32, message = "bqd,bkd->bqk"}> : () -> ()
    %cst_67 = arith.constant dense<0.000000e+00> : vector<1x8x8xf32>
    %177 = tpu.matmul %44, %171, %cst_67 {dimension_numbers = #tpu.dot_dimension_numbers<[2], [2], [1], [1], [0, 0, 0, 1, 1, 1], [0], [0]>} : vector<1x8x32xbf16>, vector<1x8x32xbf16>, vector<1x8x8xf32> -> vector<1x8x8xf32>
    %cst_68 = arith.constant 0.000000e+00 : f32
    "tpu.trace_stop"() : () -> ()
    %178 = vector.broadcast %cst_68 : f32 to vector<1x1x8xf32>
    %179 = arith.cmpf oeq, %47, %178 : vector<1x1x8xf32>
    %cst_69 = arith.constant -1.000000e+09 : f32
    %180 = vector.shape_cast %179 : vector<1x1x8xi1> to vector<1x1x8xi1>
    %181 = vector.broadcast %180 : vector<1x1x8xi1> to vector<1x8x8xi1>
    %182 = vector.broadcast %cst_69 : f32 to vector<1x8x8xf32>
    %183 = arith.select %181, %182, %177 : vector<1x8x8xi1>, vector<1x8x8xf32>
    %cst_70 = arith.constant dense<0xFF800000> : vector<1x8xf32>
    %184 = vector.multi_reduction <maximumf>, %183, %cst_70 [2] : vector<1x8x8xf32> to vector<1x8xf32>
    %185 = vector.shape_cast %184 : vector<1x8xf32> to vector<1x8x1xf32>
    %186 = vector.broadcast %185 : vector<1x8x1xf32> to vector<1x8x8xf32>
    %187 = arith.subf %183, %186 : vector<1x8x8xf32>
    %188 = math.exp %187 : vector<1x8x8xf32>
    %cst_71 = arith.constant dense<0.000000e+00> : vector<1x8xf32>
    %189 = vector.multi_reduction <add>, %188, %cst_71 [2] : vector<1x8x8xf32> to vector<1x8xf32>
    %190 = vector.shape_cast %189 : vector<1x8xf32> to vector<1x8x1xf32>
    %191 = vector.broadcast %190 : vector<1x8x1xf32> to vector<1x8x8xf32>
    %192 = arith.divf %188, %191 : vector<1x8x8xf32>
    %193 = tpu.concatenate %192, %49 in 2 : vector<1x8x8xf32>, vector<1x8x120xf32> -> vector<1x8x128xf32>
    %194 = vector.shape_cast %193 : vector<1x8x128xf32> to vector<1x1x8x128xf32>
    %c0_72 = arith.constant 0 : index
    %c3_73 = arith.constant 3 : index
    %c0_74 = arith.constant 0 : index
    %c0_75 = arith.constant 0 : index
    %195 = vector.load %arg11[%c0_72, %c3_73, %c0_74, %c0_75] : memref<1x4x8x128xf32, #tpu.memory_space<vmem>>, vector<1x1x8x128xf32>
    tpu.vector_store %arg11[%c0_72, %c3_73, %c0_74, %c0_75], %194 {strides = array<i32>} : memref<1x4x8x128xf32, #tpu.memory_space<vmem>>, vector<1x1x8x128xf32>,
    %196 = arith.truncf %192 : vector<1x8x8xf32> to vector<1x8x8xbf16>
    "tpu.trace_start"() <{level = 10 : i32, message = "bqk,bkd->bqd"}> : () -> ()
    %cst_76 = arith.constant dense<0.000000e+00> : vector<1x8x32xf32>
    %197 = tpu.matmul %196, %176, %cst_76 {dimension_numbers = #tpu.dot_dimension_numbers<[2], [1], [1], [2], [0, 0, 0, 1, 1, 2], [0], [0]>} : vector<1x8x8xbf16>, vector<1x8x32xbf16>, vector<1x8x32xf32> -> vector<1x8x32xf32>
    "tpu.trace_stop"() : () -> ()
    %198 = arith.addf %161, %197 : vector<1x8x32xf32>
    %199 = vector.shape_cast %198 : vector<1x8x32xf32> to vector<8x32xf32>
    %200 = arith.truncf %199 : vector<8x32xf32> to vector<8x32xbf16>
    %c0_77 = arith.constant 0 : index
    %c0_78 = arith.constant 0 : index
    %201 = vector.load %arg5[%c0_77, %c0_78] : memref<32x32xbf16, #tpu.memory_space<vmem>>, vector<32x32xbf16>
    %cst_79 = arith.constant dense<0.000000e+00> : vector<8x32xf32>
    %202 = tpu.matmul %200, %201, %cst_79 {dimension_numbers = #tpu.dot_dimension_numbers<[1], [0], [0], [1], [0, 0, 1, 1], [], []>} : vector<8x32xbf16>, vector<32x32xbf16>, vector<8x32xf32> -> vector<8x32xf32>
    %203 = vector.broadcast %3 : vector<1x32xf32> to vector<8x32xf32>
    %204 = arith.addf %202, %203 : vector<8x32xf32>
    %205 = arith.addf %9, %204 : vector<8x32xf32>
    %cst_80 = arith.constant dense<0.000000e+00> : vector<8xf32>
    %206 = vector.multi_reduction <add>, %205, %cst_80 [1] : vector<8x32xf32> to vector<8xf32>
    %207 = vector.shape_cast %206 : vector<8xf32> to vector<8x1xf32>
    %cst_81 = arith.constant 3.200000e+01 : f32
    %208 = vector.broadcast %cst_81 : f32 to vector<8x1xf32>
    %209 = arith.divf %207, %208 : vector<8x1xf32>
    %210 = vector.broadcast %209 : vector<8x1xf32> to vector<8x32xf32>
    %211 = arith.subf %205, %210 : vector<8x32xf32>
    %212 = arith.mulf %211, %211 : vector<8x32xf32>
    %cst_82 = arith.constant dense<0.000000e+00> : vector<8xf32>
    %213 = vector.multi_reduction <add>, %212, %cst_82 [1] : vector<8x32xf32> to vector<8xf32>
    %214 = vector.shape_cast %213 : vector<8xf32> to vector<8x1xf32>
    %cst_83 = arith.constant 3.200000e+01 : f32
    %215 = vector.broadcast %cst_83 : f32 to vector<8x1xf32>
    %216 = arith.divf %214, %215 : vector<8x1xf32>
    %217 = vector.broadcast %209 : vector<8x1xf32> to vector<8x32xf32>
    %218 = arith.subf %205, %217 : vector<8x32xf32>
    %cst_84 = arith.constant 9.99999974E-6 : f32
    %219 = vector.broadcast %cst_84 : f32 to vector<8x1xf32>
    %220 = arith.addf %216, %219 : vector<8x1xf32>
    %221 = math.rsqrt %220 : vector<8x1xf32>
    %222 = vector.broadcast %221 : vector<8x1xf32> to vector<8x32xf32>
    %223 = arith.mulf %218, %222 : vector<8x32xf32>
    %224 = vector.broadcast %4 : vector<1x32xf32> to vector<8x32xf32>
    %225 = arith.mulf %223, %224 : vector<8x32xf32>
    %226 = vector.broadcast %5 : vector<1x32xf32> to vector<8x32xf32>
    %227 = arith.addf %225, %226 : vector<8x32xf32>
    %228 = arith.truncf %227 : vector<8x32xf32> to vector<8x32xbf16>
    %c0_85 = arith.constant 0 : index
    %c0_86 = arith.constant 0 : index
    %229 = vector.load %arg6[%c0_85, %c0_86] : memref<32x64xbf16, #tpu.memory_space<vmem>>, vector<32x64xbf16>
    %cst_87 = arith.constant dense<0.000000e+00> : vector<8x64xf32>
    %230 = tpu.matmul %228, %229, %cst_87 {dimension_numbers = #tpu.dot_dimension_numbers<[1], [0], [0], [1], [0, 0, 1, 1], [], []>} : vector<8x32xbf16>, vector<32x64xbf16>, vector<8x64xf32> -> vector<8x64xf32>
    %231 = vector.broadcast %6 : vector<1x64xf32> to vector<8x64xf32>
    %232 = arith.addf %230, %231 : vector<8x64xf32>
    %cst_88 = arith.constant 5.000000e-01 : f32
    %233 = vector.broadcast %cst_88 : f32 to vector<8x64xf32>
    %234 = arith.mulf %233, %232 : vector<8x64xf32>
    %cst_89 = arith.constant 0.707106769 : f32
    %235 = vector.broadcast %cst_89 : f32 to vector<8x64xf32>
    %236 = arith.mulf %232, %235 : vector<8x64xf32>
    %cst_90 = arith.constant 0.000000e+00 : f32
    %237 = vector.broadcast %cst_90 : f32 to vector<8x64xf32>
    %238 = arith.cmpf oge, %236, %237 : vector<8x64xf32>
    %cst_91 = arith.constant 1.000000e+00 : f32
    %cst_92 = arith.constant -1.000000e+00 : f32
    %239 = vector.broadcast %cst_91 : f32 to vector<8x64xf32>
    %240 = vector.broadcast %cst_92 : f32 to vector<8x64xf32>
    %241 = arith.select %238, %239, %240 : vector<8x64xi1>, vector<8x64xf32>
    %242 = math.absf %236 : vector<8x64xf32>
    %cst_93 = arith.constant 0.327591091 : f32
    %243 = vector.broadcast %cst_93 : f32 to vector<8x64xf32>
    %244 = arith.mulf %243, %242 : vector<8x64xf32>
    %cst_94 = arith.constant 1.000000e+00 : f32
    %245 = vector.broadcast %cst_94 : f32 to vector<8x64xf32>
    %246 = arith.addf %245, %244 : vector<8x64xf32>
    %cst_95 = arith.constant 1.000000e+00 : f32
    %247 = vector.broadcast %cst_95 : f32 to vector<8x64xf32>
    %248 = arith.divf %247, %246 : vector<8x64xf32>
    %cst_96 = arith.constant 1.06140542 : f32
    %249 = vector.broadcast %cst_96 : f32 to vector<8x64xf32>
    %250 = arith.mulf %249, %248 : vector<8x64xf32>
    %cst_97 = arith.constant -1.45315206 : f32
    %251 = vector.broadcast %cst_97 : f32 to vector<8x64xf32>
    %252 = arith.addf %250, %251 : vector<8x64xf32>
    %253 = arith.mulf %252, %248 : vector<8x64xf32>
    %cst_98 = arith.constant 1.42141378 : f32
    %254 = vector.broadcast %cst_98 : f32 to vector<8x64xf32>
    %255 = arith.addf %253, %254 : vector<8x64xf32>
    %256 = arith.mulf %255, %248 : vector<8x64xf32>
    %cst_99 = arith.constant -0.284496725 : f32
    %257 = vector.broadcast %cst_99 : f32 to vector<8x64xf32>
    %258 = arith.addf %256, %257 : vector<8x64xf32>
    %259 = arith.mulf %258, %248 : vector<8x64xf32>
    %cst_100 = arith.constant 0.254829586 : f32
    %260 = vector.broadcast %cst_100 : f32 to vector<8x64xf32>
    %261 = arith.addf %259, %260 : vector<8x64xf32>
    %262 = arith.mulf %261, %248 : vector<8x64xf32>
    %cst_101 = arith.constant 0.000000e+00 : f32
    %263 = vector.broadcast %cst_101 : f32 to vector<8x64xf32>
    %264 = arith.subf %263, %242 : vector<8x64xf32>
    %265 = arith.mulf %264, %242 : vector<8x64xf32>
    %266 = math.exp %265 : vector<8x64xf32>
    %267 = arith.mulf %262, %266 : vector<8x64xf32>
    %cst_102 = arith.constant 1.000000e+00 : f32
    %268 = vector.broadcast %cst_102 : f32 to vector<8x64xf32>
    %269 = arith.subf %268, %267 : vector<8x64xf32>
    %270 = arith.mulf %241, %269 : vector<8x64xf32>
    %cst_103 = arith.constant 1.000000e+00 : f32
    %271 = vector.broadcast %cst_103 : f32 to vector<8x64xf32>
    %272 = arith.addf %271, %270 : vector<8x64xf32>
    %273 = arith.mulf %234, %272 : vector<8x64xf32>
    %274 = arith.truncf %273 : vector<8x64xf32> to vector<8x64xbf16>
    %c0_104 = arith.constant 0 : index
    %c0_105 = arith.constant 0 : index
    %275 = vector.load %arg7[%c0_104, %c0_105] : memref<64x32xbf16, #tpu.memory_space<vmem>>, vector<64x32xbf16>
    %cst_106 = arith.constant dense<0.000000e+00> : vector<8x32xf32>
    %276 = tpu.matmul %274, %275, %cst_106 {dimension_numbers = #tpu.dot_dimension_numbers<[1], [0], [0], [1], [0, 0, 1, 1], [], []>} : vector<8x64xbf16>, vector<64x32xbf16>, vector<8x32xf32> -> vector<8x32xf32>
    %277 = vector.broadcast %7 : vector<1x32xf32> to vector<8x32xf32>
    %278 = arith.addf %276, %277 : vector<8x32xf32>
    %279 = arith.truncf %10 : vector<8x32xf32> to vector<8x32xbf16>
    %c0_107 = arith.constant 0 : index
    %c0_108 = arith.constant 0 : index
    %280 = vector.load %arg8[%c0_107, %c0_108] : memref<32x32xbf16, #tpu.memory_space<vmem>>, vector<32x32xbf16>
    %cst_109 = arith.constant dense<0.000000e+00> : vector<8x32xf32>
    %281 = tpu.matmul %279, %280, %cst_109 {dimension_numbers = #tpu.dot_dimension_numbers<[1], [0], [0], [1], [0, 0, 1, 1], [], []>} : vector<8x32xbf16>, vector<32x32xbf16>, vector<8x32xf32> -> vector<8x32xf32>
    %282 = vector.broadcast %8 : vector<1x32xf32> to vector<8x32xf32>
    %283 = arith.addf %281, %282 : vector<8x32xf32>
    %284 = arith.negf %283 : vector<8x32xf32>
    %285 = math.exp %284 : vector<8x32xf32>
    %cst_110 = arith.constant 1.000000e+00 : f32
    %286 = vector.broadcast %cst_110 : f32 to vector<8x32xf32>
    %287 = arith.addf %286, %285 : vector<8x32xf32>
    %288 = arith.divf %286, %287 : vector<8x32xf32>
    %289 = arith.mulf %278, %288 : vector<8x32xf32>
    %cst_111 = arith.constant 1.000000e+00 : f32
    %290 = vector.broadcast %cst_111 : f32 to vector<8x32xf32>
    %291 = arith.subf %290, %288 : vector<8x32xf32>
    %292 = arith.mulf %10, %291 : vector<8x32xf32>
    %293 = arith.addf %289, %292 : vector<8x32xf32>
    %294 = arith.addf %205, %293 : vector<8x32xf32>
    %c0_112 = arith.constant 0 : index
    %c0_113 = arith.constant 0 : index
    %295 = vector.load %arg10[%c0_112, %c0_113] : memref<8x32xf32, #tpu.memory_space<vmem>>, vector<8x32xf32>
    tpu.vector_store %arg10[%c0_112, %c0_113], %294 {strides = array<i32>} : memref<8x32xf32, #tpu.memory_space<vmem>>, vector<8x32xf32>,
    return
  }
  func.func @transform_0(%arg0: i32) -> (i32, i32) {
    %c0_i32 = arith.constant 0 : i32
    %c0_i32_0 = arith.constant 0 : i32
    return %arg0, %c0_i32 : i32, i32
  }
  func.func @transform_1(%arg0: i32) -> (i32, i32, i32) {
    %c0_i32 = arith.constant 0 : i32
    %c0_i32_0 = arith.constant 0 : i32
    %c0_i32_1 = arith.constant 0 : i32
    return %arg0, %c0_i32, %c0_i32_0 : i32, i32, i32
  }
  func.func @transform_2(%arg0: i32) -> (i32, i32) {
    %c0_i32 = arith.constant 0 : i32
    %c0_i32_0 = arith.constant 0 : i32
    return %arg0, %c0_i32 : i32, i32
  }
  func.func @transform_3(%arg0: i32) -> (i32, i32) {
    %c0_i32 = arith.constant 0 : i32
    %c0_i32_0 = arith.constant 0 : i32
    %c0_i32_1 = arith.constant 0 : i32
    return %c0_i32, %c0_i32_0 : i32, i32
  }
  func.func @transform_4(%arg0: i32) -> (i32, i32) {
    %c0_i32 = arith.constant 0 : i32
    %c0_i32_0 = arith.constant 0 : i32
    %c0_i32_1 = arith.constant 0 : i32
    return %c0_i32, %c0_i32_0 : i32, i32
  }
  func.func @transform_5(%arg0: i32) -> (i32, i32) {
    %c0_i32 = arith.constant 0 : i32
    %c0_i32_0 = arith.constant 0 : i32
    %c0_i32_1 = arith.constant 0 : i32
    return %c0_i32, %c0_i32_0 : i32, i32
  }
  func.func @transform_6(%arg0: i32) -> (i32, i32) {
    %c0_i32 = arith.constant 0 : i32
    %c0_i32_0 = arith.constant 0 : i32
    %c0_i32_1 = arith.constant 0 : i32
    return %c0_i32, %c0_i32_0 : i32, i32
  }
  func.func @transform_7(%arg0: i32) -> (i32, i32) {
    %c0_i32 = arith.constant 0 : i32
    %c0_i32_0 = arith.constant 0 : i32
    %c0_i32_1 = arith.constant 0 : i32
    return %c0_i32, %c0_i32_0 : i32, i32
  }
  func.func @transform_8(%arg0: i32) -> (i32, i32) {
    %c0_i32 = arith.constant 0 : i32
    %c0_i32_0 = arith.constant 0 : i32
    %c0_i32_1 = arith.constant 0 : i32
    return %c0_i32, %c0_i32_0 : i32, i32
  }
  func.func @transform_9(%arg0: i32) -> (i32, i32) {
    %c0_i32 = arith.constant 0 : i32
    %c0_i32_0 = arith.constant 0 : i32
    return %arg0, %c0_i32 : i32, i32
  }
  func.func @transform_10(%arg0: i32) -> (i32, i32, i32, i32) {
    %c0_i32 = arith.constant 0 : i32
    %c0_i32_0 = arith.constant 0 : i32
    %c0_i32_1 = arith.constant 0 : i32
    %c0_i32_2 = arith.constant 0 : i32
    return %arg0, %c0_i32, %c0_i32_0, %c0_i32_1 : i32, i32, i32, i32
  }
}

</mosaic_0001>

<bundles_post_ra>
// kernel: tpu_custom_call.1
= control target key start
LH: loop header
LB: loop body
LE: loop exit
PB: predicated region body
PF: predicated region fallthrough
CT: control target
= control target key end

     0   :  { %s2672_s0 = inlined_call_operand.vmem [shape: f32[16,32], index: 0, kind: input, shape index: {}]   ;;  %s2673_s1 = inlined_call_operand.hbm [shape: f32[2,1,8], index: 1, kind: input, shape index: {}]   ;;  %s2674_s2 = inlined_call_operand.vmem [shape: f32[16,32], index: 2, kind: input, shape index: {}]   ;;  %s2675_s3 = inlined_call_operand.vmem [shape: bf16[32,96], index: 3, kind: input, shape index: {}]   ;;  %s2676_s4 = inlined_call_operand.hbm [shape: bf16[32,32], index: 4, kind: input, shape index: {}]   ;;  %s2677_s5 = inlined_call_operand.hbm [shape: bf16[32,64], index: 5, kind: input, shape index: {}]   ;;  %s2678_s6 = inlined_call_operand.vmem [shape: bf16[64,32], index: 6, kind: input, shape index: {}]   ;;  %s2679_s7 = inlined_call_operand.hbm [shape: bf16[32,32], index: 7, kind: input, shape index: {}]   ;;  %s2680_s8 = inlined_call_operand.hbm [shape: f32[9,128], index: 8, kind: input, shape index: {}]   ;;  %s2681_s9 = inlined_call_operand.hbm [shape: f32[16,32], index: 9, kind: output, shape index: {0}]   ;;  %s2682_s10 = inlined_call_operand.hbm [shape: f32[2,4,8,128], index: 10, kind: output, shape index: {1}]  }
   0x1   :  { %2687 = sst [smem:[#allocation20_spill]] %s2676_s4 }
   0x2   :  { %2688 = sst [smem:[#allocation21_spill]] %s2677_s5 }
   0x3   :  { %2689 = sst [smem:[#allocation22_spill]] %s2679_s7 }
   0x4   :  { %2690 = sst [smem:[#allocation23_spill]] %s2680_s8 }
   0x5   :  { %16 = vsyncpa [#allocation3], 0 }
   0x6   :  { %18 = vsyncpa [#allocation3 + $0x1], 0 }
   0x7   :  { %19 = vsyncpa [#allocation6], 0 }
   0x8   :  { %20 = vsyncpa [#allocation9], 0 }
   0x9   :  { %21 = vsyncpa [#allocation4], 0 }
   0xa   :  { %23 = vsyncpa [#allocation4 + $0x1], 0 }
   0xb   :  { %24 = vsyncpa [#allocation13], 0 }
   0xc   :  { %26 = vsyncpa [#allocation13 + $0x1], 0  ;;  %s2231_s13 = smov 0   ;;  %s2233_s14 = smov 0  }
   0xd   :  { %s2235_s15 = smov 0   ;;  %s2237_s16 = smov 0  }
   0xe LB: > { %s2157_s17 = smov [#allocation5]   ;;  %s2252_s19 = sadd.s32 4294967295, %s2155_s16   ;;  %s2155_s16 = sphi %s2237_s16, %s2722_s16   ;;  %s2151_s15 = sphi %s2235_s15, %s2721_s15   ;;  %s2147_s14 = sphi %s2233_s14, %s2720_s14   ;;  %s2143_s13 = sphi %s2231_s13, %s2719_s13  }
   0xf   : > { %s308_s18 = sshll.u32 %s2157_s17, 4  ;;  %p1590_p0 = scmp.ge.s32.totalorder %s2155_s16, 1  ;;  %s309_s18 = int_to_ptr.vmem [resolvable:$true] %s308_s18 }
  0x10   : > { %p2683_p1 = scmp.eq.s32.totalorder %s2252_s19, 0  ;;  %p293_p2 = scmp.lt.s32.totalorder %s2155_s16, 3 }
  0x11   : > { %s2158_s21 = smov [#allocation8]   ;;  %s2159_s24 = smov [#allocation7]  }
  0x12   : > { %p2257_p3 = pnand %p1590_p0, %p293_p2  ;;  %s337_s22 = sshll.u32 %s2158_s21, 4  ;;  %s2270_s22 = int_to_ptr.vmem [resolvable:$true] %s337_s22 }
  0x13   : > { %s321_s25 = sshll.u32 %s2159_s24, 4  ;;  %s1932_s26 = scalar_lea.vmem %s309_s18, 256  ;;  %s2272_s25 = int_to_ptr.vmem [resolvable:$true] %s321_s25 }
  0x14   : > { %s2691_s20 = scalar_select %p2257_p3, 1, 0 }
  0x15   : > { %p1799_p5 = pneg %p2257_p3  ;;  %p1933_p8 = scmp.ne.s32.totalorder %s309_s18, %s1932_s26 }
  0x16   : > { %p1940_p11 = scmp.lt.s32.totalorder %s309_s18, %s309_s18  ;;  %p1941_p12 = scmp.lt.s32.totalorder %s1932_s26, %s1932_s26 }
  0x17   : > { %p2266_p6 = pnand %p1799_p5, %p2683_p1 }
  0x18   : > { %p1942_p13 = por %p1941_p12, %p1940_p11 }
  0x19   : > { %p1923_p7 = pneg %p2266_p6 }
  0x1b   : > { %p1935_p9 = pnand %p1933_p8, %p1923_p7 }
  0x1d   : > { %p1936_p10 = pneg %p1935_p9 }
  0x1f   : > { %p1943_p0 = pnand %p1942_p13, %p1936_p10 }
  0x21   : > { %1946 = shalt.err (!%p1943_p0)
}
  0x22   : > { %s2160_s27 = smov 64   ;;  %s2161_s28 = smov 4  }
  0x23   : > { %s2693_s4 = sld [smem:[#allocation20_spill]]  ;;  %s1958_s11 = scalar_lea.vmem %s2270_s22, 256 }
  0x24   : > { %p1959_p2 = scmp.ne.s32.totalorder %s2270_s22, %s1958_s11  ;;  %p1966_p9 = scmp.lt.s32.totalorder %s2270_s22, %s2270_s22 }
  0x25   : > { %p1967_p10 = scmp.lt.s32.totalorder %s1958_s11, %s1958_s11 }
  0x26   : > { %p1961_p5 = pnand %p1959_p2, %p1923_p7 }
  0x27   : > { %p1968_p11 = por %p1967_p10, %p1966_p9 }
  0x28   : > { %p1962_p8 = pneg %p1961_p5 }
  0x29   : > { %1802 = dma.hbm_to_vmem [thread:$0]  (!%p2266_p6), %s2693_s4, 256, %s309_s18, [#allocation6], %s2160_s27, %s2160_s27, %s2161_s28  }
  0x2a   : > { %p1969_p12 = pnand %p1968_p11, %p1962_p8 }
  0x2c   : > { %1972 = shalt.err (!%p1969_p12)
}
  0x2d   : > { %s2694_s7 = sld [smem:[#allocation22_spill]]  ;;  %s1984_s18 = scalar_lea.vmem %s2272_s25, 256 }
  0x2e   : > { %p1985_p13 = scmp.ne.s32.totalorder %s2272_s25, %s1984_s18  ;;  %p1992_p5 = scmp.lt.s32.totalorder %s2272_s25, %s2272_s25 }
  0x2f   : > { %p1993_p8 = scmp.lt.s32.totalorder %s1984_s18, %s1984_s18 }
  0x30   : > { %p1987_p0 = pnand %p1985_p13, %p1923_p7 }
  0x31   : > { %p1994_p9 = por %p1993_p8, %p1992_p5 }
  0x32   : > { %p1988_p2 = pneg %p1987_p0 }
  0x33   : > { %1808 = dma.hbm_to_vmem [thread:$0]  (!%p2266_p6), %s2694_s7, 256, %s2270_s22, [#allocation9], %s2160_s27, %s2160_s27, %s2161_s28  }
  0x34   : > { %p1995_p10 = pnand %p1994_p9, %p1988_p2 }
  0x36   : > { %1998 = shalt.err (!%p1995_p10)
}
  0x37   : > { %s2695_s5 = sld [smem:[#allocation21_spill]]  ;;  %s2162_s22 = smov [#allocation10]  }
  0x38   : > { %s350_s26 = sshll.u32 %s2162_s22, 4  ;;  %s351_s26 = int_to_ptr.vmem [resolvable:$true] %s350_s26 }
  0x39   : > { %s2010_s29 = scalar_lea.vmem %s351_s26, 256  ;;  %p2018_p0 = scmp.lt.s32.totalorder %s351_s26, %s351_s26 }
  0x3a   : > { %p2011_p11 = scmp.ne.s32.totalorder %s351_s26, %s2010_s29  ;;  %p2019_p2 = scmp.lt.s32.totalorder %s2010_s29, %s2010_s29 }
  0x3c   : > { %p2013_p12 = pnand %p2011_p11, %p1923_p7  ;;  %p2020_p5 = por %p2019_p2, %p2018_p0 }
  0x3d   : > { %1805 = dma.hbm_to_vmem [thread:$0]  (!%p2266_p6), %s2695_s5, 256, %s2272_s25, [#allocation6], %s2160_s27, %s2160_s27, %s2161_s28  }
  0x3e   : > { %p2014_p13 = pneg %p2013_p12 }
  0x40   : > { %p2021_p8 = pnand %p2020_p5, %p2014_p13 }
  0x42   : > { %2024 = shalt.err (!%p2021_p8)
}
  0x43   : > { %s2163_s30 = smov 128   ;;  %s2164_s25 = smov 8  }
  0x44   : > { %s2696_s8 = sld [smem:[#allocation23_spill]]  ;;  %s1589_s11 = sadd.s32 4294967294, %s2155_s16  }
  0x45   : > { %s2320_s12 = sadd.s32 1, %s2155_s16   ;;  %s65_s18 = sadd.s32 1, %s2151_s15 }
  0x46   : > { %s62_s17 = ssub.s32 %s2155_s16, %s2320_s12  ;;  %p72_p9 = scmp.ne.s32.totalorder %s2151_s15, %s2147_s14 }
  0x47   : > { %p63_p7 = scmp.eq.s32.totalorder %s62_s17, 0  ;;  %p73_p10 = scmp.eq.s32.totalorder %s2155_s16, 0 }
  0x48   : > { %p78_p11 = scmp.ne.s32.totalorder %s2147_s14, %s2143_s13  ;;  %p254_p13 = scmp.eq.s32.totalorder %s2252_s19, 1 }
  0x49   : > { %s2331_s21 = scalar_select %p63_p7, %s2151_s15, %s65_s18  }
  0x4a   : > { %1811 = dma.hbm_to_vmem [thread:$0]  (!%p2266_p6), %s2696_s8, 256, %s351_s26, [#allocation9], %s2163_s30, %s2163_s30, %s2164_s25  }
  0x4b   : > { %2697 = sst [smem:[#allocation19_spill]] %s2331_s21  ;;  %p2333_p12 = por %p73_p10, %p72_p9 }
  0x4c   : > { %p2339_p6 = por %p2683_p1, %p78_p11  ;;  %p260_p0 = scmp.eq.s32.totalorder %s1589_s11, 1 }
  0x4d   : > { %p1827_p2 = scmp.lt.s32.totalorder %s2155_s16, 2  ;;  %s371_s22 = sand.u32 1, %s2151_s15  }
  0x4e   : > { %s2699_s24 = scalar_select %p2339_p6, 1, 0 }
  0x4f   : > { %p2346_p5 = por %p254_p13, %p72_p9  ;;  %p2350_p8 = por %p260_p0, %p78_p11 }
  0x50   : > { %s1596_s30 = sshll.u32 %s2155_s16, 4  ;;  %s374_s25 = scalar_lea.vmem [#allocation2], %s371_s22 }
  0x51   : > { %s2700_s26 = scalar_select %p2346_p5, 1, 0 }
  0x52   : > { %s2701_s29 = scalar_select %p2350_p8, 1, 0 }
  0x53   : > { %s381_s27 = sshll.u32 %s374_s25, 4  ;;  %s2358_s18 = scalar_lea.hbm %s2673_s1, %s1596_s30  ;;  %s382_s27 = int_to_ptr.vmem [resolvable:$true] %s381_s27 }
  0x54   : > { %p2362_p7 = pnand %p1827_p2, %p2333_p12  ;;  %s372_s4 = scalar_lea.sflag [#allocation3], %s371_s22 }
  0x55   : > { %s2025_s5 = scalar_lea.hbm %s2358_s18, 16  ;;  %s2030_s28 = scalar_lea.hbm %s2673_s1, 32 }
  0x56   : > { %p2026_p9 = scmp.ne.s32.totalorder %s2358_s18, %s2025_s5  ;;  %p2027_p10 = pneg %p2362_p7 }
  0x57   : > { %p2031_p0 = scmp.lt.s32.totalorder %s2358_s18, %s2673_s1  ;;  %p2032_p12 = scmp.lt.s32.totalorder %s2030_s28, %s2025_s5 }
  0x58   : > { %p2028_p11 = pnand %p2027_p10, %p2026_p9 }
  0x59   : > { %p2033_p2 = por %p2032_p12, %p2031_p0 }
  0x5a   : > { %p2029_p13 = pneg %p2028_p11 }
  0x5c   : > { %p2034_p4 = pnand %p2033_p2, %p2029_p13 }
  0x5e   : > { %2037 = shalt.err (!%p2034_p4)
}
  0x5f   : > { %s2038_s23 = scalar_lea.vmem %s382_s27, 16  ;;  %s2165_s22 = smov [#allocation2]  }
  0x60   : > { %p2039_p1 = scmp.ne.s32.totalorder %s382_s27, %s2038_s23  ;;  %s2043_s8 = sshll.u32 %s2165_s22, 4  ;;  %s2044_s8 = int_to_ptr.vmem [resolvable:$false] %s2043_s8 }
  0x61   : > { %s2045_s21 = scalar_lea.vmem %s2044_s8, 32  ;;  %p2046_p9 = scmp.lt.s32.totalorder %s382_s27, %s2044_s8 }
  0x62   : > { %p2041_p8 = pnand %p2039_p1, %p2027_p10  ;;  %p2047_p11 = scmp.lt.s32.totalorder %s2045_s21, %s2038_s23 }
  0x64   : > { %p2042_p5 = pneg %p2041_p8  ;;  %p2048_p6 = por %p2047_p11, %p2046_p9 }
  0x66   : > { %p2049_p3 = pnand %p2048_p6, %p2042_p5 }
  0x68   : > { %2052 = shalt.err (!%p2049_p3)
}
  0x69   : > { %1815 = dma.hbm_to_vmem [thread:$0]  (!%p2362_p7), %s2358_s18, 16, %s382_s27, %s372_s4  }
  0x6a   : > { %p2703_p13 = scmp.ne.s32.totalorder %s2691_s20, 0 }
  0x6b   : > { %s2383_s5 = sand.u32 (!%p2703_p13), 1, %s2147_s14   ;;  %p2704_p1 = scmp.ne.s32.totalorder (!%p2703_p13), %s2699_s24, 0 }
  0x6c   : > { %397 = sbr.rel (%p2703_p13) target bundleno = 2955 (0xb8b), region = 56  ;;  %s400_s7 = scalar_lea.sflag (!%p2703_p13), [#allocation3], %s2383_s5 }
  0x6d   : > { %s402_s25 = scalar_lea.vmem (!%p2703_p13), [#allocation2], %s2383_s5 }
  0x71   : > { %2122 = dma.done.wait (%p2704_p1), %s400_s7, 16  }
  0x72   : > { %2124 = vsyncadd (%p2704_p1), %s400_s7, 4294967280  ;;  %p2705_p3 = scmp.eq.s32.totalorder %s2252_s19, 0 }
  0x74   : > { %2126 = dma.done.wait (%p2705_p3), [#allocation6], 512   ;;  %p2706_p4 = pmov %p2705_p3 }
  0x75   : > { %p2707_p6 = pmov %p2705_p3 }
  0x76   : > { %2128 = vsyncadd (%p2706_p4), [#allocation6], 4294966784 }
  0x77   : > { %2130 = dma.done.wait (%p2707_p6), [#allocation9], 512   ;;  %p2708_p5 = pmov %p2705_p3 }
  0x78   : > { %p467_p8 = scmp.lt.s32.totalorder %s2252_s19, 1  ;;  %vm487_vm0 = vcmask 261120   ;;  %v1881_v7 = vld [vmem:[%s2675_s3 + $0x8] sm:$0xff]   ;;  %v2166_v8 = vmov 0.0   ;;  %vm2167_vm1 = vmmov 0   ;;  %v1882_v9 = vld [vmem:[%s2675_s3] sm:$0xff]   ;;  %v579_v26 = vlaneseq }
  0x79   : > { %2132 = vsyncadd (%p2708_p5), [#allocation9], 4294966784  ;;  %1685 = vmatprep.subr.bf16.mxu0 %v2166_v8  ;;  %1689 = vmatprep.mubr.msk.bf16.mxu0 %vm2167_vm1, %v2166_v8  ;;  %v1606_v14 = vld [vmem:[#allocation10] ss:$0 sm:$0xff]  ;;  %v1607_v16 = vld [vmem:[#allocation10 + $0x1] ss:$0 sm:$0xff] }
  0x7a   : > { %s2401_s4 = scalar_select %p467_p8, %s2252_s19, 1  ;;  %1686 = vmatpush3.bf16.msra.mxu0 %v1881_v7  ;;  %1693 = vmatprep.subr.bf16.mxu1 %v2166_v8  ;;  %v1608_v20 = vld [vmem:[#allocation10 + $0x2] ss:$0 sm:$0xff]  ;;  %v2432_v27 = vand.u32 127, %v579_v26  ;;  %v578_v38 = vld [vmem:[%s402_s25] sm:$0x1] }
  0x7b   : > { %1687 = vmatprep.subr.bf16.mxu0 %v2166_v8  ;;  %1695 = vmatprep.mubr.msk.bf16.mxu1 %vm2167_vm1, %v2166_v8  ;;  %s2168_s28 = smov 96   ;;  %v646_v39 = vshrl.u32 %v579_v26, 7  ;;  %vm643_vm6 = vcmp.eq.f32.partialorder %v578_v38, 0.0  ;;  %v2169_v41 = vmov 0   ;;  %vm651_vm8 = vcmask 64512   ;;  %s2170_s17 = smov 64  }
  0x7c   : > { %s1604_s8 = sshll.u32 %s2401_s4, 3  ;;  %vm666_vm2 = vcmp.ge.s32.totalorder %v2432_v27, 8  ;;  %vm667_vm3 = vcmp.lt.s32.totalorder %v2432_v27, 16  ;;  %vm582_vm4 = vcmp.lt.s32.totalorder %v2432_v27, 8  ;;  %v644_v42 = vsel %vm643_vm6, 1, %v2169_v41  ;;  %s1603_s23 = sshll.u32 %s2383_s5, 5 }
  0x7d   : > { %s470_s24 = scalar_lea.vmem %s2672_s0, %s1604_s8  ;;  %vm2437_vm5 = vmand %vm666_vm2, %vm667_vm3  ;;  %v647_v40 = vsub.s32 0, %v646_v39  ;;  %vm827_vm9 = vcmp.ge.s32.totalorder %v2432_v27, 16  ;;  %vm828_vm10 = vcmp.lt.s32.totalorder %v2432_v27, 24  ;;  %vm942_vm11 = vcmp.ge.s32.totalorder %v2432_v27, 24  ;;  %s2506_s22 = scalar_lea.vmem [#allocation12], %s1603_s23 }
  0x7e   : > { %v2409_v0 = vld [vmem:[%s470_s24] sm:$0xff]  ;;  %1688 = vmatpush3.bf16.msra.mxu0 %v1882_v9  ;;  %vm943_vm12 = vcmp.lt.s32.totalorder %v2432_v27, 32  ;;  %vm2479_vm13 = vmand %vm827_vm9, %vm828_vm10  ;;  %vm737_vm14 = vcmask 1043456   ;;  %s474_s20 = scalar_lea.vmem %s2674_s2, %s1604_s8  ;;  %vm1273_vm2 = vcmask 523264   ;;  %p2715_p10 = scmp.ne.s32.totalorder %s2700_s26, 0 }
  0x7f   : > { %v488_v1 = vsel %vm487_vm0, %v2409_v0, 0.0  ;;  %1699 = vmatprep.subr.bf16.mxu0 %v2166_v8  ;;  %v2465_v43 = vrot.slane %v644_v42, %v647_v40  ;;  %vm2483_vm15 = vmand %vm942_vm11, %vm943_vm12  ;;  %s2172_s24 = smov [#allocation12]  }
  0x80   : > { %489 = vadd.xlane.f32.xlu0 %v488_v1  ;;  %s2057_s4 = sshll.u32 %s2172_s24, 4  ;;  %s2058_s4 = int_to_ptr.vmem [resolvable:$false] %s2057_s4 }
  0x81   : > { %vm649_vm7 = vcmp.eq.s32.totalorder %v2465_v43, 1 }
 0x109   : > { %v490_v2 = vpop.xlane.xlu0 %489 }
 0x10a   : > { %v492_v3 = vmul.f32 0.03125, %v490_v2 }
 0x10c   : > { %v493_v4 = vsub.f32 %v2409_v0, %v492_v3 }
 0x10e   : > { %v494_v5 = vmul.f32 %v493_v4, %v493_v4 }
 0x110   : > { %v495_v6 = vsel %vm487_vm0, %v494_v5, 0.0 }
 0x111   : > { %496 = vadd.xlane.f32.xlu0 %v495_v6 }
 0x19a   : > { %v497_v10 = vpop.xlane.xlu0 %496 }
 0x19b   : > { %v498_v11 = vmul.f32 0.03125, %v497_v10 }
 0x19d   : > { %v499_v12 = vadd.f32 1e-05, %v498_v11 }
 0x19f   : > { %1893 = vrsqrt.f32 %v499_v12 }
 0x1ac   : > { %v1894_v13 = vpop.eup %1893 }
 0x1ad   : > { %v501_v15 = vmul.f32 %v1894_v13, %v493_v4 }
 0x1af   : > { %v506_v17 = vmul.f32 %v1606_v14, %v501_v15 }
 0x1b1   : > { %v511_v18 = vadd.f32 %v1607_v16, %v506_v17 }
 0x1b3   : > { %v512_v19 = vpack.c.bf16 %v511_v18, %v511_v18 }
 0x1b5   : > { %1690 = vmatmul.mubr.msk.bf16.vlgmr.msra.gmra.mxu0 %vm487_vm0, %v512_v19 }
 0x1b6   : > { %1701 = vmatprep.mubr.msk.bf16.mxu0 %vm2167_vm1, %v2166_v8 }
 0x275   : > { %v570_v21 = vpop.f32.mrf.mxu0 }
 0x276   : > { %v571_v22 = vadd.f32 %v1608_v20, %v570_v21 }
 0x277   : > { %v1691_v23 = vpop.f32.mrf.mxu0 }
 0x278   : > { %587 = vrot.lane.b32.xlu1 %v571_v22, %s2168_s28  ;;  %v576_v36 = vmul.f32 0.35355338, %v571_v22  ;;  %s1651_s28 = sshll.u32 %s2252_s19, 9 }
 0x279   : > { %v573_v24 = vpop.f32.mrf.mxu0  ;;  %s2606_s25 = scalar_lea.hbm %s2682_s10, %s1651_s28 }
 0x27a   : > { %v2453_v37 = vpack.c.bf16 %v576_v36, %v576_v36 }
 0x27b   : > { %v1692_v25 = vpop.f32.mrf.mxu0 }
 0x2ea   : > { %v2441_v29 = vpop.permute.xlu1 %587 }
 0x2eb   : > { %v590_v30 = vsel %vm582_vm4, %v2441_v29, 0.0  ;;  %v671_v31 = vsel %vm2437_vm5, %v2441_v29, 0.0  ;;  %v832_v15 = vsel %vm2479_vm13, %v2441_v29, 0.0 }
 0x2ec   : > { %v591_v32 = vpack.c.bf16 %v590_v30, %v590_v30  ;;  %v672_v33 = vpack.c.bf16 %v671_v31, %v671_v31  ;;  %v833_v18 = vpack.c.bf16 %v832_v15, %v832_v15 }
 0x2ee   : > { %v601_v34 = vsel %vm487_vm0, %v591_v32, 0  ;;  %v676_v35 = vsel %vm487_vm0, %v672_v33, 0  ;;  %v837_v21 = vsel %vm487_vm0, %v833_v18, 0 }
 0x2ef   : > { %1694 = vmatpush3.bf16.xpose.msra.mxu1 %v601_v34  ;;  %1700 = vmatpush3.bf16.xpose.msra.mxu0 %v676_v35 }
 0x2f0   : > { %1705 = vmatprep.subr.bf16.mxu1 %v2166_v8  ;;  %1711 = vmatprep.subr.bf16.mxu0 %v2166_v8 }
 0x2f6   : > { %1696 = vmatmul.mubr.msk.bf16.vlgmr.msra.gmra.mxu1 %vm487_vm0, %v2453_v37  ;;  %1702 = vmatmul.mubr.msk.bf16.vlgmr.msra.gmra.mxu0 %vm487_vm0, %v2453_v37 }
 0x2f7   : > { %1707 = vmatprep.mubr.msk.bf16.mxu1 %vm2167_vm1, %v2166_v8  ;;  %1713 = vmatprep.mubr.msk.bf16.mxu0 %vm2167_vm1, %v2166_v8 }
 0x3b6   : > { %v637_v44 = vpop.f32.mrf.mxu1  ;;  %v712_v45 = vpop.f32.mrf.mxu0 }
 0x3b7   : > { %v718_v46 = vsel %vm649_vm7, -1e+09, %v712_v45  ;;  %v650_v59 = vsel %vm649_vm7, -1e+09, %v637_v44 }
 0x3b8   : > { %v1697_v47 = vpop.f32.mrf.mxu1  ;;  %v1703_v48 = vpop.f32.mrf.mxu0  ;;  %v719_v49 = vsel %vm651_vm8, %v718_v46, -inf  ;;  %v652_v60 = vsel %vm651_vm8, %v650_v59, -inf }
 0x3b9   : > { %720 = vmax.xlane.f32.xlu1 %v719_v49 }
 0x3ba   : > { %v640_v50 = vpop.f32.mrf.mxu1  ;;  %v715_v51 = vpop.f32.mrf.mxu0 }
 0x3bc   : > { %v1698_v52 = vpop.f32.mrf.mxu1  ;;  %v1704_v53 = vpop.f32.mrf.mxu0 }
 0x442   : > { %v721_v54 = vpop.xlane.xlu1 %720 }
 0x443   : > { %v722_v55 = vsub.f32 %v718_v46, %v721_v54 }
 0x445   : > { %v723_v56 = vmul.f32 1.442695, %v722_v55 }
 0x447   : > { %1895 = vpow2.f32 %v723_v56 }
 0x454   : > { %v1896_v57 = vpop.eup %1895 }
 0x455   : > { %v725_v58 = vsel %vm651_vm8, %v1896_v57, 0.0 }
 0x456   : > { %726 = vadd.xlane.f32.xlu0 %v725_v58 }
 0x46c   : > { %592 = vrot.lane.b32.xlu0 %v571_v22, %s2170_s17  ;;  %v947_v22 = vsel %vm2483_vm15, %v2441_v29, 0.0  ;;  %s1425_s17 = sshll.u32 %s2506_s22, 4  ;;  %s2608_s17 = int_to_ptr.vmem [resolvable:$true] %s1425_s17 }
 0x46d   : > { %v948_v23 = vpack.c.bf16 %v947_v22, %v947_v22  ;;  %s2053_s21 = scalar_lea.vmem %s2608_s17, 512  ;;  %p2060_p2 = scmp.lt.s32.totalorder %s2608_s17, %s2058_s4 }
 0x46e   : > { %p2054_p7 = scmp.ne.s32.totalorder %s2608_s17, %s2053_s21 }
 0x46f   : > { %v952_v24 = vsel %vm487_vm0, %v948_v23, 0 }
 0x470   : > { %p2055_p0 = pnand %p2054_p7, %p2715_p10 }
 0x472   : > { %p2056_p12 = pneg %p2055_p0 }
 0x48b   : > { %653 = vmax.xlane.f32.xlu0 %v652_v60 }
 0x4df   : > { %v727_v61 = vpop.xlane.xlu0 %726 }
 0x4e0   : > { %1897 = vrcp.f32 %v727_v61 }
 0x4e3   : > { %v593_v63 = vpop.permute.xlu0 %592 }
 0x4e4   : > { %v673_v2 = vsel %vm2437_vm5, %v593_v63, 0.0  ;;  %v595_v3 = vsel %vm582_vm4, %v593_v63, 0.0  ;;  %v834_v4 = vsel %vm2479_vm13, %v593_v63, 0.0  ;;  %v949_v5 = vsel %vm2483_vm15, %v593_v63, 0.0 }
 0x4e5   : > { %v674_v6 = vpack.c.bf16 %v673_v2, %v673_v2  ;;  %v596_v7 = vpack.c.bf16 %v595_v3, %v595_v3  ;;  %v835_v9 = vpack.c.bf16 %v834_v4, %v834_v4  ;;  %v950_v10 = vpack.c.bf16 %v949_v5, %v949_v5 }
 0x4e7   : > { %v739_v11 = vsel %vm737_vm14, %v674_v6, 0  ;;  %v785_v12 = vsel %vm737_vm14, %v596_v7, 0  ;;  %v2495_v13 = vsel %vm737_vm14, %v835_v9, 0  ;;  %v2497_v14 = vsel %vm737_vm14, %v950_v10, 0 }
 0x4e8   : > { %1706 = vmatpush3.bf16.msra.mxu1 %v739_v11  ;;  %1712 = vmatpush3.bf16.msra.mxu0 %v785_v12 }
 0x4e9   : > { %1717 = vmatprep.subr.bf16.mxu1 %v2166_v8  ;;  %1723 = vmatprep.subr.bf16.mxu0 %v2166_v8 }
 0x4ed   : > { %v1898_v16 = vpop.eup %1897 }
 0x4ee   : > { %v729_v17 = vmul.f32 %v1898_v16, %v1896_v57 }
 0x4f0   : > { %v730_v19 = vsel %vm651_vm8, %v729_v17, 0.0  ;;  %v733_v20 = vpack.c.bf16 %v729_v17, %v729_v17 }
 0x4f1   : > { %1614 = vst [vmem:[%s2506_s22 + $0x8] sm:$0xff] %v730_v19 }
 0x4f2   : > { %1708 = vmatmul.mubr.msk.bf16.vlgmr.msra.gmra.mxu1 %vm651_vm8, %v733_v20 }
 0x4f3   : > { %1718 = vmatpush3.bf16.xpose.msra.mxu1 %v837_v21  ;;  %1719 = vmatprep.mubr.msk.bf16.mxu1 %vm2167_vm1, %v2166_v8 }
 0x4f4   : > { %1729 = vmatprep.subr.bf16.mxu1 %v2166_v8 }
 0x4fa   : > { %1720 = vmatmul.mubr.msk.bf16.vlgmr.msra.gmra.mxu1 %vm487_vm0, %v2453_v37 }
 0x4fb   : > { %1730 = vmatpush3.bf16.xpose.msra.mxu1 %v952_v24  ;;  %1731 = vmatprep.mubr.msk.bf16.mxu1 %vm2167_vm1, %v2166_v8 }
 0x4fc   : > { %1741 = vmatprep.subr.bf16.mxu1 %v2166_v8 }
 0x502   : > { %1732 = vmatmul.mubr.msk.bf16.vlgmr.msra.gmra.mxu1 %vm487_vm0, %v2453_v37 }
 0x503   : > { %1745 = vmatprep.mubr.msk.bf16.mxu1 %vm2167_vm1, %v2166_v8 }
 0x514   : > { %v654_v25 = vpop.xlane.xlu0 %653 }
 0x515   : > { %v655_v26 = vsub.f32 %v650_v59, %v654_v25 }
 0x517   : > { %v656_v28 = vmul.f32 1.442695, %v655_v26 }
 0x519   : > { %1899 = vpow2.f32 %v656_v28  ;;  %v1623_v28 = vld [vmem:[#allocation10 + $0x3] ss:$0 sm:$0xff] }
 0x526   : > { %v1900_v42 = vpop.eup %1899 }
 0x527   : > { %v658_v46 = vsel %vm651_vm8, %v1900_v42, 0.0 }
 0x5b2   : > { %v2527_v27 = vpop.f32.mrf.mxu1 }
 0x5b4   : > { %v1709_v29 = vpop.f32.mrf.mxu1 }
 0x5b6   : > { %v778_v30 = vpop.f32.mrf.mxu1 }
 0x5b8   : > { %v1710_v31 = vpop.f32.mrf.mxu1 }
 0x5ba   : > { %v873_v32 = vpop.f32.mrf.mxu1 }
 0x5bb   : > { %v879_v33 = vsel %vm649_vm7, -1e+09, %v873_v32 }
 0x5bc   : > { %v1721_v34 = vpop.f32.mrf.mxu1  ;;  %v880_v35 = vsel %vm651_vm8, %v879_v33, -inf }
 0x5bd   : > { %881 = vmax.xlane.f32.xlu1 %v880_v35 }
 0x5be   : > { %v876_v36 = vpop.f32.mrf.mxu1 }
 0x5c0   : > { %v1722_v37 = vpop.f32.mrf.mxu1 }
 0x5c2   : > { %v988_v38 = vpop.f32.mrf.mxu1 }
 0x5c3   : > { %v994_v39 = vsel %vm649_vm7, -1e+09, %v988_v38 }
 0x5c4   : > { %v1733_v40 = vpop.f32.mrf.mxu1  ;;  %v995_v41 = vsel %vm651_vm8, %v994_v39, -inf }
 0x5c5   : > { %996 = vmax.xlane.f32.xlu1 %v995_v41  ;;  %v1885_v40 = vld [vmem:[#allocation7 + $0x8] sm:$0xff]   ;;  %v1886_v41 = vld [vmem:[#allocation7] sm:$0xff]  }
 0x5c6   : > { %v991_v44 = vpop.f32.mrf.mxu1 }
 0x5c8   : > { %v1734_v45 = vpop.f32.mrf.mxu1 }
 0x5c9   : > { %659 = vadd.xlane.f32.xlu1 %v658_v46  ;;  %v1627_v46 = vld [vmem:[#allocation10 + $0x4] ss:$0 sm:$0xff] }
 0x646   : > { %v882_v47 = vpop.xlane.xlu1 %881 }
 0x647   : > { %v883_v48 = vsub.f32 %v879_v33, %v882_v47 }
 0x649   : > { %v884_v49 = vmul.f32 1.442695, %v883_v48  ;;  %v1628_v48 = vld [vmem:[#allocation10 + $0x5] ss:$0 sm:$0xff] }
 0x64b   : > { %1901 = vpow2.f32 %v884_v49 }
 0x64e   : > { %v997_v50 = vpop.xlane.xlu1 %996 }
 0x64f   : > { %v998_v51 = vsub.f32 %v994_v39, %v997_v50 }
 0x651   : > { %v999_v52 = vmul.f32 1.442695, %v998_v51 }
 0x652   : > { %v660_v43 = vpop.xlane.xlu1 %659 }
 0x653   : > { %1903 = vpow2.f32 %v999_v52  ;;  %v1887_v52 = vld [vmem:[#allocation8 + $0x8] sm:$0xff]  }
 0x654   : > { %1905 = vrcp.f32 %v660_v43  ;;  %v2580_v43 = vld [vmem:[%s474_s20] sm:$0xff]  ;;  %s1399_s20 = scalar_lea.sflag [#allocation13], %s2383_s5 }
 0x658   : > { %v1902_v53 = vpop.eup %1901 }
 0x659   : > { %v886_v54 = vsel %vm651_vm8, %v1902_v53, 0.0 }
 0x65a   : > { %887 = vadd.xlane.f32.xlu1 %v886_v54  ;;  %v1317_v54 = vpack.c.bf16 %v2580_v43, %v2580_v43 }
 0x660   : > { %v1904_v55 = vpop.eup %1903 }
 0x661   : > { %v1906_v56 = vpop.eup %1905  ;;  %v1001_v57 = vsel %vm651_vm8, %v1904_v55, 0.0 }
 0x662   : > { %1002 = vadd.xlane.f32.xlu1 %v1001_v57  ;;  %v662_v58 = vmul.f32 %v1906_v56, %v1900_v42  ;;  %v1890_v56 = vld [vmem:[%s2678_s6 + $0x10] sm:$0xff]   ;;  %v1891_v57 = vld [vmem:[%s2678_s6 + $0x8] sm:$0xff]  }
 0x664   : > { %v663_v59 = vsel %vm651_vm8, %v662_v58, 0.0  ;;  %v665_v60 = vpack.c.bf16 %v662_v58, %v662_v58  ;;  %v1892_v58 = vld [vmem:[%s2678_s6] sm:$0xff]  }
 0x665   : > { %664 = vst [vmem:[%s2506_s22] sm:$0xff] %v663_v59  ;;  %v1629_v59 = vld [vmem:[#allocation10 + $0x6] ss:$0 sm:$0xff] }
 0x666   : > { %1714 = vmatmul.mubr.msk.bf16.vlgmr.msra.gmra.mxu0 %vm651_vm8, %v665_v60 }
 0x667   : > { %1724 = vmatpush3.bf16.msra.mxu0 %v2495_v13  ;;  %1725 = vmatprep.mubr.msk.bf16.mxu0 %vm2167_vm1, %v2166_v8  ;;  %v1883_v13 = vld [vmem:[#allocation5 + $0x8] sm:$0xff]  }
 0x668   : > { %1735 = vmatprep.subr.bf16.mxu0 %v2166_v8  ;;  %1742 = vmatpush3.bf16.msra.mxu1 %v1883_v13 }
 0x669   : > { %1743 = vmatprep.subr.bf16.mxu1 %v2166_v8 }
 0x6e3   : > { %v888_v61 = vpop.xlane.xlu1 %887 }
 0x6e4   : > { %1907 = vrcp.f32 %v888_v61 }
 0x6eb   : > { %v1003_v62 = vpop.xlane.xlu1 %1002 }
 0x6ec   : > { %1909 = vrcp.f32 %v1003_v62 }
 0x6f1   : > { %v1908_v63 = vpop.eup %1907 }
 0x6f2   : > { %v890_v1 = vmul.f32 %v1908_v63, %v1902_v53  ;;  %v1888_v53 = vld [vmem:[#allocation8] sm:$0xff]  }
 0x6f4   : > { %v891_v2 = vsel %vm651_vm8, %v890_v1, 0.0  ;;  %v894_v3 = vpack.c.bf16 %v890_v1, %v890_v1 }
 0x6f5   : > { %1618 = vst [vmem:[%s2506_s22 + $0x10] sm:$0xff] %v891_v2 }
 0x6f6   : > { %1726 = vmatmul.mubr.msk.bf16.vlgmr.msra.gmra.mxu0 %vm651_vm8, %v894_v3 }
 0x6f7   : > { %1736 = vmatpush3.bf16.msra.mxu0 %v2497_v14  ;;  %1737 = vmatprep.mubr.msk.bf16.mxu0 %vm2167_vm1, %v2166_v8  ;;  %v1884_v14 = vld [vmem:[#allocation5] sm:$0xff]  }
 0x6f8   : > { %1749 = vmatprep.subr.bf16.mxu0 %v2166_v8  ;;  %1744 = vmatpush3.bf16.msra.mxu1 %v1884_v14 }
 0x6f9   : > { %v1910_v4 = vpop.eup %1909  ;;  %1757 = vmatprep.subr.bf16.mxu1 %v2166_v8 }
 0x6fa   : > { %v1005_v5 = vmul.f32 %v1910_v4, %v1904_v55  ;;  %v1889_v55 = vld [vmem:[%s2678_s6 + $0x18] sm:$0xff]  }
 0x6fc   : > { %v1006_v6 = vsel %vm651_vm8, %v1005_v5, 0.0  ;;  %v1009_v7 = vpack.c.bf16 %v1005_v5, %v1005_v5 }
 0x6fd   : > { %1621 = vst [vmem:[%s2506_s22 + $0x18] sm:$0xff] %v1006_v6  ;;  %s2059_s22 = scalar_lea.vmem %s2058_s4, 1024 }
 0x6fe   : > { %1738 = vmatmul.mubr.msk.bf16.vlgmr.msra.gmra.mxu0 %vm651_vm8, %v1009_v7  ;;  %p2061_p9 = scmp.lt.s32.totalorder %s2059_s22, %s2053_s21 }
 0x6ff   : > { %1753 = vmatprep.mubr.msk.bf16.mxu0 %vm2167_vm1, %v2166_v8  ;;  %1750 = vmatpush3.bf16.msra.mxu0 %v1885_v40 }
 0x700   : > { %1751 = vmatprep.subr.bf16.mxu0 %v2166_v8  ;;  %p2062_p11 = por %p2061_p9, %p2060_p2 }
 0x702   : > { %p2063_p13 = pnand %p2062_p11, %p2056_p12 }
 0x703   : > { %1752 = vmatpush3.bf16.msra.mxu0 %v1886_v41 }
 0x704   : > { %1769 = vmatprep.subr.bf16.mxu0 %v2166_v8 }
 0x726   : > { %v821_v9 = vpop.f32.mrf.mxu0 }
 0x727   : > { %v822_v18 = vadd.f32 %v821_v9, %v2527_v27 }
 0x728   : > { %v1715_v10 = vpop.f32.mrf.mxu0 }
 0x72a   : > { %v824_v11 = vpop.f32.mrf.mxu0 }
 0x72c   : > { %v1716_v12 = vpop.f32.mrf.mxu0 }
 0x7b6   : > { %v935_v15 = vpop.f32.mrf.mxu0 }
 0x7b7   : > { %v941_v20 = vadd.f32 %v935_v15, %v822_v18 }
 0x7b8   : > { %v1727_v16 = vpop.f32.mrf.mxu0 }
 0x7ba   : > { %v938_v17 = vpop.f32.mrf.mxu0 }
 0x7bc   : > { %v1728_v19 = vpop.f32.mrf.mxu0 }
 0x7be   : > { %v1050_v21 = vpop.f32.mrf.mxu0 }
 0x7bf   : > { %v1056_v22 = vadd.f32 %v1050_v21, %v941_v20 }
 0x7c0   : > { %v1739_v23 = vpop.f32.mrf.mxu0 }
 0x7c1   : > { %v1057_v24 = vpack.c.bf16 %v1056_v22, %v1056_v22  ;;  %v2171_v22 = vmov -1.0  }
 0x7c2   : > { %v1053_v25 = vpop.f32.mrf.mxu0 }
 0x7c3   : > { %1746 = vmatmul.mubr.msk.bf16.vlgmr.msra.gmra.mxu1 %vm487_vm0, %v1057_v24 }
 0x7c4   : > { %v1740_v26 = vpop.f32.mrf.mxu0  ;;  %1765 = vmatprep.mubr.msk.bf16.mxu1 %vm2167_vm1, %v2166_v8  ;;  %1758 = vmatpush3.bf16.msra.mxu1 %v1889_v55 }
 0x7c5   : > { %1759 = vmatprep.subr.bf16.mxu1 %v2166_v8 }
 0x7c8   : > { %1760 = vmatpush3.bf16.msra.mxu1 %v1890_v56 }
 0x7c9   : > { %1761 = vmatprep.subr.bf16.mxu1 %v2166_v8 }
 0x7cc   : > { %1762 = vmatpush3.bf16.msra.mxu1 %v1891_v57 }
 0x7cd   : > { %1763 = vmatprep.subr.bf16.mxu1 %v2166_v8 }
 0x7d0   : > { %1764 = vmatpush3.bf16.msra.mxu1 %v1892_v58 }
 0x883   : > { %v1115_v29 = vpop.f32.mrf.mxu1 }
 0x884   : > { %v1116_v30 = vadd.f32 %v1623_v28, %v1115_v29 }
 0x885   : > { %v1747_v31 = vpop.f32.mrf.mxu1 }
 0x886   : > { %v2564_v32 = vadd.f32 %v1116_v30, %v2409_v0 }
 0x887   : > { %v1118_v27 = vpop.f32.mrf.mxu1 }
 0x888   : > { %v1122_v33 = vsel %vm487_vm0, %v2564_v32, 0.0 }
 0x889   : > { %1123 = vadd.xlane.f32.xlu1 %v1122_v33  ;;  %v1748_v34 = vpop.f32.mrf.mxu1 }
 0x912   : > { %v1124_v35 = vpop.xlane.xlu1 %1123 }
 0x913   : > { %v1125_v36 = vmul.f32 0.03125, %v1124_v35 }
 0x915   : > { %v1126_v37 = vsub.f32 %v2564_v32, %v1125_v36 }
 0x917   : > { %v1127_v38 = vmul.f32 %v1126_v37, %v1126_v37 }
 0x919   : > { %v1128_v39 = vsel %vm487_vm0, %v1127_v38, 0.0 }
 0x91a   : > { %1129 = vadd.xlane.f32.xlu1 %v1128_v39 }
 0x9a3   : > { %v1130_v0 = vpop.xlane.xlu1 %1129 }
 0x9a4   : > { %v1131_v42 = vmul.f32 0.03125, %v1130_v0 }
 0x9a6   : > { %v1132_v44 = vadd.f32 1e-05, %v1131_v42 }
 0x9a8   : > { %1911 = vrsqrt.f32 %v1132_v44 }
 0x9b5   : > { %v1912_v45 = vpop.eup %1911 }
 0x9b6   : > { %v1134_v47 = vmul.f32 %v1912_v45, %v1126_v37 }
 0x9b8   : > { %v1139_v49 = vmul.f32 %v1627_v46, %v1134_v47 }
 0x9ba   : > { %v1144_v50 = vadd.f32 %v1628_v48, %v1139_v49 }
 0x9bc   : > { %v1145_v51 = vpack.c.bf16 %v1144_v50, %v1144_v50 }
 0x9be   : > { %1754 = vmatmul.mubr.msk.bf16.vlgmr.msra.gmra.mxu0 %vm487_vm0, %v1145_v51 }
 0x9bf   : > { %1773 = vmatprep.mubr.msk.bf16.mxu0 %vm2167_vm1, %v2166_v8  ;;  %1770 = vmatpush3.bf16.msra.mxu0 %v1887_v52 }
 0x9c0   : > { %1771 = vmatprep.subr.bf16.mxu0 %v2166_v8 }
 0x9c3   : > { %1772 = vmatpush3.bf16.msra.mxu0 %v1888_v53 }
 0x9c6   : > { %1774 = vmatmul.mubr.msk.bf16.vlgmr.msra.gmra.mxu0 %vm487_vm0, %v1317_v54 }
 0xa7e   : > { %v1203_v60 = vpop.f32.mrf.mxu0 }
 0xa7f   : > { %v1204_v61 = vadd.f32 %v1629_v59, %v1203_v60 }
 0xa80   : > { %v1755_v62 = vpop.f32.mrf.mxu0 }
 0xa81   : > { %v1210_v63 = vmul.f32 0.70710677, %v1204_v61  ;;  %v1209_v25 = vmul.f32 0.5, %v1204_v61 }
 0xa82   : > { %v1206_v1 = vpop.f32.mrf.mxu0 }
 0xa83   : > { %v1213_v2 = vand.u32 2147483647, %v1210_v63  ;;  %vm1211_vm1 = vcmp.ge.f32.partialorder %v1210_v63, 0.0 }
 0xa84   : > { %v1756_v3 = vpop.f32.mrf.mxu0  ;;  %v1212_v23 = vsel %vm1211_vm1, 1.0, %v2171_v22 }
 0xa85   : > { %v1214_v4 = vmul.f32 0.3275911, %v1213_v2  ;;  %v1227_v6 = vsub.f32 0.0, %v1213_v2 }
 0xa86   : > { %v1375_v30 = vpop.f32.mrf.mxu0 }
 0xa87   : > { %v1215_v5 = vadd.f32 1.0, %v1214_v4  ;;  %v1228_v7 = vmul.f32 %v1227_v6, %v1213_v2 }
 0xa88   : > { %v1775_v31 = vpop.f32.mrf.mxu0 }
 0xa89   : > { %1913 = vrcp.f32 %v1215_v5  ;;  %v1229_v10 = vmul.f32 1.442695, %v1228_v7 }
 0xa8a   : > { %v1378_v27 = vpop.f32.mrf.mxu0 }
 0xa8b   : > { %1915 = vpow2.f32 %v1229_v10 }
 0xa8c   : > { %v1776_v33 = vpop.f32.mrf.mxu0 }
 0xa96   : > { %v1914_v9 = vpop.eup %1913 }
 0xa97   : > { %v1218_v8 = vmul.f32 1.0614054, %v1914_v9 }
 0xa98   : > { %v1916_v19 = vpop.eup %1915 }
 0xa99   : > { %v1219_v11 = vadd.f32 -1.4531521, %v1218_v8 }
 0xa9b   : > { %v1220_v12 = vmul.f32 %v1914_v9, %v1219_v11 }
 0xa9d   : > { %v1221_v13 = vadd.f32 1.4214138, %v1220_v12 }
 0xa9f   : > { %v1222_v14 = vmul.f32 %v1914_v9, %v1221_v13 }
 0xaa1   : > { %v1223_v15 = vadd.f32 -0.28449672, %v1222_v14 }
 0xaa3   : > { %v1224_v16 = vmul.f32 %v1914_v9, %v1223_v15 }
 0xaa5   : > { %v1225_v17 = vadd.f32 0.2548296, %v1224_v16 }
 0xaa7   : > { %v1226_v18 = vmul.f32 %v1914_v9, %v1225_v17 }
 0xaa9   : > { %v1231_v20 = vmul.f32 %v1916_v19, %v1226_v18 }
 0xaab   : > { %v1232_v21 = vsub.f32 1.0, %v1231_v20 }
 0xaad   : > { %v1233_v24 = vmul.f32 %v1232_v21, %v1212_v23 }
 0xaaf   : > { %v1234_v26 = vadd.f32 1.0, %v1233_v24 }
 0xab1   : > { %v1235_v28 = vmul.f32 %v1234_v26, %v1209_v25 }
 0xab3   : > { %v1236_v29 = vpack.c.bf16 %v1235_v28, %v1235_v28 }
 0xab5   : > { %1766 = vmatmul.mubr.msk.bf16.vlgmr.msra.gmra.mxu1 %vm1273_vm2, %v1236_v29 }
 0xab6   : > { %2066 = shalt.err (!%p2063_p13)
}
 0xab7   : > { %s2067_s8 = scalar_lea.hbm %s2606_s25, 512  ;;  %s2071_s11 = scalar_lea.hbm %s2682_s10, 1024 }
 0xab8   : > { %p2068_p1 = scmp.ne.s32.totalorder %s2606_s25, %s2067_s8  ;;  %p2072_p6 = scmp.lt.s32.totalorder %s2606_s25, %s2682_s10 }
 0xab9   : > { %p2073_p5 = scmp.lt.s32.totalorder %s2071_s11, %s2067_s8 }
 0xaba   : > { %p2069_p3 = pnand %p2068_p1, %p2715_p10 }
 0xabb   : > { %p2074_p8 = por %p2073_p5, %p2072_p6 }
 0xabc   : > { %p2070_p4 = pneg %p2069_p3 }
 0xabe   : > { %p2075_p7 = pnand %p2074_p8, %p2070_p4 }
 0xac0   : > { %2078 = shalt.err (!%p2075_p7)
}
 0xac1   : > { %s2173_s23 = smov 128   ;;  %s2174_s7 = smov 8   ;;  %v1639_v34 = vld [vmem:[#allocation10 + $0x8] ss:$0 sm:$0xff]  ;;  %v1633_v41 = vld [vmem:[#allocation10 + $0x7] ss:$0 sm:$0xff] }
 0xac2   : > { %1796 = dma.vmem_to_hbm [thread:$0]  (%p2715_p10), %s2608_s17, 512, %s2606_s25, %s1399_s20, %s2173_s23, %s2173_s23, %s2174_s7   ;;  %v1376_v35 = vadd.f32 %v1639_v34, %v1375_v30 }
 0xac3   : > { %s1602_s21 = sshll.u32 %s2383_s5, 3  ;;  %s1646_s17 = sshll.u32 %s2252_s19, 7 }
 0xac4   : > { %v1643_v36 = vmul.f32 -1.442695, %v1376_v35  ;;  %s459_s25 = scalar_lea.vmem [#allocation11], %s1602_s21  ;;  %s1410_s22 = scalar_lea.hbm %s2681_s9, %s1646_s17 }
 0xac5   : > { %s1412_s20 = sshll.u32 %s459_s25, 4  ;;  %s1394_s8 = scalar_lea.sflag [#allocation4], %s2383_s5  ;;  %s1413_s20 = int_to_ptr.vmem [resolvable:$true] %s1412_s20 }
 0xac6   : > { %1917 = vpow2.f32 %v1643_v36  ;;  %s2079_s27 = scalar_lea.vmem %s1413_s20, 128  ;;  %s2175_s19 = smov [#allocation11]  }
 0xac7   : > { %p2080_p0 = scmp.ne.s32.totalorder %s1413_s20, %s2079_s27  ;;  %s2083_s18 = sshll.u32 %s2175_s19, 4  ;;  %s2084_s18 = int_to_ptr.vmem [resolvable:$false] %s2083_s18 }
 0xac8   : > { %s2085_s11 = scalar_lea.vmem %s2084_s18, 256  ;;  %p2086_p9 = scmp.lt.s32.totalorder %s1413_s20, %s2084_s18 }
 0xac9   : > { %p2081_p12 = pnand %p2080_p0, %p2715_p10  ;;  %p2087_p11 = scmp.lt.s32.totalorder %s2085_s11, %s2079_s27 }
 0xacb   : > { %p2082_p2 = pneg %p2081_p12  ;;  %p2088_p13 = por %p2087_p11, %p2086_p9 }
 0xacd   : > { %p2089_p1 = pnand %p2088_p13, %p2082_p2 }
 0xad3   : > { %v1918_v37 = vpop.eup %1917 }
 0xad4   : > { %v1384_v38 = vadd.f32 1.0, %v1918_v37 }
 0xad6   : > { %1919 = vrcp.f32 %v1384_v38 }
 0xae3   : > { %v1920_v39 = vpop.eup %1919 }
 0xae4   : > { %v1388_v40 = vsub.f32 1.0, %v1920_v39 }
 0xae6   : > { %v1389_v44 = vmul.f32 %v1388_v40, %v2580_v43 }
 0xb75   : > { %v1311_v0 = vpop.f32.mrf.mxu1 }
 0xb76   : > { %v1312_v42 = vadd.f32 %v1633_v41, %v1311_v0 }
 0xb77   : > { %v1767_v45 = vpop.f32.mrf.mxu1 }
 0xb78   : > { %v1387_v46 = vmul.f32 %v1920_v39, %v1312_v42 }
 0xb79   : > { %v1314_v47 = vpop.f32.mrf.mxu1 }
 0xb7a   : > { %v1390_v48 = vadd.f32 %v1389_v44, %v1387_v46 }
 0xb7b   : > { %v1768_v49 = vpop.f32.mrf.mxu1 }
 0xb7c   : > { %v1391_v50 = vadd.f32 %v1390_v48, %v2564_v32 }
 0xb7e   : > { %1392 = vst.msk [vmem:[%s459_s25] sm:$0xff] %vm487_vm0, %v1391_v50 }
 0xb7f   : > { %2092 = shalt.err (!%p2089_p1)
}
 0xb80   : > { %s2093_s30 = scalar_lea.hbm %s1410_s22, 128  ;;  %s2097_s23 = scalar_lea.hbm %s2681_s9, 256 }
 0xb81   : > { %p2094_p3 = scmp.ne.s32.totalorder %s1410_s22, %s2093_s30  ;;  %p2098_p5 = scmp.lt.s32.totalorder %s1410_s22, %s2681_s9 }
 0xb82   : > { %p2099_p8 = scmp.lt.s32.totalorder %s2097_s23, %s2093_s30 }
 0xb83   : > { %p2095_p4 = pnand %p2094_p3, %p2715_p10 }
 0xb84   : > { %p2100_p7 = por %p2099_p8, %p2098_p5 }
 0xb85   : > { %p2096_p6 = pneg %p2095_p4 }
 0xb87   : > { %p2101_p0 = pnand %p2100_p7, %p2096_p6 }
 0xb89   : > { %2104 = shalt.err (!%p2101_p0)
}
 0xb8a   : > { %1795 = dma.vmem_to_hbm [thread:$0]  (%p2715_p10), %s1413_s20, 128, %s1410_s22, %s1394_s8  }
 0xb8b PF: > { %s1440_s17 = sand.u32 1, %s2143_s13   ;;  %p2716_p12 = scmp.ne.s32.totalorder %s2701_s29, 0 }
 0xb8c   : > { %p2717_p2 = scmp.ge.s32.totalorder %s2155_s16, 2  ;;  %s1441_s25 = scalar_lea.sflag [#allocation4], %s1440_s17 }
 0xb8e   : > { %p1817_p9 = pnand %p2717_p2, %p2716_p12 }
 0xb90   : > { %p1818_p11 = pneg %p1817_p9 }
 0xb92   : > { %2134 = dma.done.wait (%p1818_p11), %s1441_s25, 128  }
 0xb93   : > { %2136 = vsyncadd (%p1818_p11), %s1441_s25, 4294967168  ;;  %s1450_s24 = scalar_lea.sflag [#allocation13], %s1440_s17 }
 0xb94   : > { %2138 = dma.done.wait (%p1818_p11), %s1450_s24, 512  }
 0xb95   : > { %2140 = vsyncadd (%p1818_p11), %s1450_s24, 4294966784  ;;  %s2718_s26 = sld [smem:[#allocation19_spill]]  ;;  %p29_p10 = scmp.ge.s32.totalorder %s2320_s12, 4  }
 0xb96   : > { %s2719_s13 = smov %s2147_s14  ;;  %s2720_s14 = smov %s2151_s15 }
 0xb97   : > { %s2722_s16 = smov %s2320_s12  ;;  %31 = sbr.rel (!%p29_p10) target bundleno = 14 (0xe), region = 143 }
 0xb9b   : > { %s2721_s15 = smov %s2718_s26 }
 0xb9c   :  { %1455 = vsyncpa [#allocation3], 1 }
 0xb9d   :  { %1457 = vsyncpa [#allocation3 + $0x1], 1 }
 0xb9e   :  { %1458 = vsyncpa [#allocation6], 1 }
 0xb9f   :  { %1459 = vsyncpa [#allocation9], 1 }
 0xba0   :  { %1460 = vsyncpa [#allocation4], 1 }
 0xba1   :  { %1462 = vsyncpa [#allocation4 + $0x1], 1 }
 0xba2   :  { %1463 = vsyncpa [#allocation13], 1 }
 0xba3   :  { %1465 = vsyncpa [#allocation13 + $0x1], 1 }

// kernel: tpu_custom_call.1
= control target key start
LH: loop header
LB: loop body
LE: loop exit
PB: predicated region body
PF: predicated region fallthrough
CT: control target
= control target key end

     0   :  { %s2672_s0 = inlined_call_operand.vmem [shape: f32[16,32], index: 0, kind: input, shape index: {}]   ;;  %s2673_s1 = inlined_call_operand.hbm [shape: f32[2,1,8], index: 1, kind: input, shape index: {}]   ;;  %s2674_s2 = inlined_call_operand.vmem [shape: f32[16,32], index: 2, kind: input, shape index: {}]   ;;  %s2675_s3 = inlined_call_operand.vmem [shape: bf16[32,96], index: 3, kind: input, shape index: {}]   ;;  %s2676_s4 = inlined_call_operand.hbm [shape: bf16[32,32], index: 4, kind: input, shape index: {}]   ;;  %s2677_s5 = inlined_call_operand.hbm [shape: bf16[32,64], index: 5, kind: input, shape index: {}]   ;;  %s2678_s6 = inlined_call_operand.vmem [shape: bf16[64,32], index: 6, kind: input, shape index: {}]   ;;  %s2679_s7 = inlined_call_operand.hbm [shape: bf16[32,32], index: 7, kind: input, shape index: {}]   ;;  %s2680_s8 = inlined_call_operand.hbm [shape: f32[9,128], index: 8, kind: input, shape index: {}]   ;;  %s2681_s9 = inlined_call_operand.hbm [shape: f32[16,32], index: 9, kind: output, shape index: {0}]   ;;  %s2682_s10 = inlined_call_operand.hbm [shape: f32[2,4,8,128], index: 10, kind: output, shape index: {1}]  }
   0x1   :  { %2687 = sst [smem:[#allocation20_spill]] %s2676_s4 }
   0x2   :  { %2688 = sst [smem:[#allocation21_spill]] %s2677_s5 }
   0x3   :  { %2689 = sst [smem:[#allocation22_spill]] %s2679_s7 }
   0x4   :  { %2690 = sst [smem:[#allocation23_spill]] %s2680_s8 }
   0x5   :  { %16 = vsyncpa [#allocation3], 0 }
   0x6   :  { %18 = vsyncpa [#allocation3 + $0x1], 0 }
   0x7   :  { %19 = vsyncpa [#allocation6], 0 }
   0x8   :  { %20 = vsyncpa [#allocation9], 0 }
   0x9   :  { %21 = vsyncpa [#allocation4], 0 }
   0xa   :  { %23 = vsyncpa [#allocation4 + $0x1], 0 }
   0xb   :  { %24 = vsyncpa [#allocation13], 0 }
   0xc   :  { %26 = vsyncpa [#allocation13 + $0x1], 0  ;;  %s2231_s13 = smov 0   ;;  %s2233_s14 = smov 0  }
   0xd   :  { %s2235_s15 = smov 0   ;;  %s2237_s16 = smov 0  }
   0xe LB: > { %s2157_s17 = smov [#allocation5]   ;;  %s2252_s19 = sadd.s32 4294967295, %s2155_s16   ;;  %s2155_s16 = sphi %s2237_s16, %s2722_s16   ;;  %s2151_s15 = sphi %s2235_s15, %s2721_s15   ;;  %s2147_s14 = sphi %s2233_s14, %s2720_s14   ;;  %s2143_s13 = sphi %s2231_s13, %s2719_s13  }
   0xf   : > { %s308_s18 = sshll.u32 %s2157_s17, 4  ;;  %p1590_p0 = scmp.ge.s32.totalorder %s2155_s16, 1  ;;  %s309_s18 = int_to_ptr.vmem [resolvable:$true] %s308_s18 }
  0x10   : > { %p2683_p1 = scmp.eq.s32.totalorder %s2252_s19, 0  ;;  %p293_p2 = scmp.lt.s32.totalorder %s2155_s16, 3 }
  0x11   : > { %s2158_s21 = smov [#allocation8]   ;;  %s2159_s24 = smov [#allocation7]  }
  0x12   : > { %p2257_p3 = pnand %p1590_p0, %p293_p2  ;;  %s337_s22 = sshll.u32 %s2158_s21, 4  ;;  %s2270_s22 = int_to_ptr.vmem [resolvable:$true] %s337_s22 }
  0x13   : > { %s321_s25 = sshll.u32 %s2159_s24, 4  ;;  %s1932_s26 = scalar_lea.vmem %s309_s18, 256  ;;  %s2272_s25 = int_to_ptr.vmem [resolvable:$true] %s321_s25 }
  0x14   : > { %s2691_s20 = scalar_select %p2257_p3, 1, 0 }
  0x15   : > { %p1799_p5 = pneg %p2257_p3  ;;  %p1933_p8 = scmp.ne.s32.totalorder %s309_s18, %s1932_s26 }
  0x16   : > { %p1940_p11 = scmp.lt.s32.totalorder %s309_s18, %s309_s18  ;;  %p1941_p12 = scmp.lt.s32.totalorder %s1932_s26, %s1932_s26 }
  0x17   : > { %p2266_p6 = pnand %p1799_p5, %p2683_p1 }
  0x18   : > { %p1942_p13 = por %p1941_p12, %p1940_p11 }
  0x19   : > { %p1923_p7 = pneg %p2266_p6 }
  0x1b   : > { %p1935_p9 = pnand %p1933_p8, %p1923_p7 }
  0x1d   : > { %p1936_p10 = pneg %p1935_p9 }
  0x1f   : > { %p1943_p0 = pnand %p1942_p13, %p1936_p10 }
  0x21   : > { %1946 = shalt.err (!%p1943_p0)
}
  0x22   : > { %s2160_s27 = smov 64   ;;  %s2161_s28 = smov 4  }
  0x23   : > { %s2693_s4 = sld [smem:[#allocation20_spill]]  ;;  %s1958_s11 = scalar_lea.vmem %s2270_s22, 256 }
  0x24   : > { %p1959_p2 = scmp.ne.s32.totalorder %s2270_s22, %s1958_s11  ;;  %p1966_p9 = scmp.lt.s32.totalorder %s2270_s22, %s2270_s22 }
  0x25   : > { %p1967_p10 = scmp.lt.s32.totalorder %s1958_s11, %s1958_s11 }
  0x26   : > { %p1961_p5 = pnand %p1959_p2, %p1923_p7 }
  0x27   : > { %p1968_p11 = por %p1967_p10, %p1966_p9 }
  0x28   : > { %p1962_p8 = pneg %p1961_p5 }
  0x29   : > { %1802 = dma.hbm_to_vmem [thread:$0]  (!%p2266_p6), %s2693_s4, 256, %s309_s18, [#allocation6], %s2160_s27, %s2160_s27, %s2161_s28  }
  0x2a   : > { %p1969_p12 = pnand %p1968_p11, %p1962_p8 }
  0x2c   : > { %1972 = shalt.err (!%p1969_p12)
}
  0x2d   : > { %s2694_s7 = sld [smem:[#allocation22_spill]]  ;;  %s1984_s18 = scalar_lea.vmem %s2272_s25, 256 }
  0x2e   : > { %p1985_p13 = scmp.ne.s32.totalorder %s2272_s25, %s1984_s18  ;;  %p1992_p5 = scmp.lt.s32.totalorder %s2272_s25, %s2272_s25 }
  0x2f   : > { %p1993_p8 = scmp.lt.s32.totalorder %s1984_s18, %s1984_s18 }
  0x30   : > { %p1987_p0 = pnand %p1985_p13, %p1923_p7 }
  0x31   : > { %p1994_p9 = por %p1993_p8, %p1992_p5 }
  0x32   : > { %p1988_p2 = pneg %p1987_p0 }
  0x33   : > { %1808 = dma.hbm_to_vmem [thread:$0]  (!%p2266_p6), %s2694_s7, 256, %s2270_s22, [#allocation9], %s2160_s27, %s2160_s27, %s2161_s28  }
  0x34   : > { %p1995_p10 = pnand %p1994_p9, %p1988_p2 }
  0x36   : > { %1998 = shalt.err (!%p1995_p10)
}
  0x37   : > { %s2695_s5 = sld [smem:[#allocation21_spill]]  ;;  %s2162_s22 = smov [#allocation10]  }
  0x38   : > { %s350_s26 = sshll.u32 %s2162_s22, 4  ;;  %s351_s26 = int_to_ptr.vmem [resolvable:$true] %s350_s26 }
  0x39   : > { %s2010_s29 = scalar_lea.vmem %s351_s26, 256  ;;  %p2018_p0 = scmp.lt.s32.totalorder %s351_s26, %s351_s26 }
  0x3a   : > { %p2011_p11 = scmp.ne.s32.totalorder %s351_s26, %s2010_s29  ;;  %p2019_p2 = scmp.lt.s32.totalorder %s2010_s29, %s2010_s29 }
  0x3c   : > { %p2013_p12 = pnand %p2011_p11, %p1923_p7  ;;  %p2020_p5 = por %p2019_p2, %p2018_p0 }
  0x3d   : > { %1805 = dma.hbm_to_vmem [thread:$0]  (!%p2266_p6), %s2695_s5, 256, %s2272_s25, [#allocation6], %s2160_s27, %s2160_s27, %s2161_s28  }
  0x3e   : > { %p2014_p13 = pneg %p2013_p12 }
  0x40   : > { %p2021_p8 = pnand %p2020_p5, %p2014_p13 }
  0x42   : > { %2024 = shalt.err (!%p2021_p8)
}
  0x43   : > { %s2163_s30 = smov 128   ;;  %s2164_s25 = smov 8  }
  0x44   : > { %s2696_s8 = sld [smem:[#allocation23_spill]]  ;;  %s1589_s11 = sadd.s32 4294967294, %s2155_s16  }
  0x45   : > { %s2320_s12 = sadd.s32 1, %s2155_s16   ;;  %s65_s18 = sadd.s32 1, %s2151_s15 }
  0x46   : > { %s62_s17 = ssub.s32 %s2155_s16, %s2320_s12  ;;  %p72_p9 = scmp.ne.s32.totalorder %s2151_s15, %s2147_s14 }
  0x47   : > { %p63_p7 = scmp.eq.s32.totalorder %s62_s17, 0  ;;  %p73_p10 = scmp.eq.s32.totalorder %s2155_s16, 0 }
  0x48   : > { %p78_p11 = scmp.ne.s32.totalorder %s2147_s14, %s2143_s13  ;;  %p254_p13 = scmp.eq.s32.totalorder %s2252_s19, 1 }
  0x49   : > { %s2331_s21 = scalar_select %p63_p7, %s2151_s15, %s65_s18  }
  0x4a   : > { %1811 = dma.hbm_to_vmem [thread:$0]  (!%p2266_p6), %s2696_s8, 256, %s351_s26, [#allocation9], %s2163_s30, %s2163_s30, %s2164_s25  }
  0x4b   : > { %2697 = sst [smem:[#allocation19_spill]] %s2331_s21  ;;  %p2333_p12 = por %p73_p10, %p72_p9 }
  0x4c   : > { %p2339_p6 = por %p2683_p1, %p78_p11  ;;  %p260_p0 = scmp.eq.s32.totalorder %s1589_s11, 1 }
  0x4d   : > { %p1827_p2 = scmp.lt.s32.totalorder %s2155_s16, 2  ;;  %s371_s22 = sand.u32 1, %s2151_s15  }
  0x4e   : > { %s2699_s24 = scalar_select %p2339_p6, 1, 0 }
  0x4f   : > { %p2346_p5 = por %p254_p13, %p72_p9  ;;  %p2350_p8 = por %p260_p0, %p78_p11 }
  0x50   : > { %s1596_s30 = sshll.u32 %s2155_s16, 4  ;;  %s374_s25 = scalar_lea.vmem [#allocation2], %s371_s22 }
  0x51   : > { %s2700_s26 = scalar_select %p2346_p5, 1, 0 }
  0x52   : > { %s2701_s29 = scalar_select %p2350_p8, 1, 0 }
  0x53   : > { %s381_s27 = sshll.u32 %s374_s25, 4  ;;  %s2358_s18 = scalar_lea.hbm %s2673_s1, %s1596_s30  ;;  %s382_s27 = int_to_ptr.vmem [resolvable:$true] %s381_s27 }
  0x54   : > { %p2362_p7 = pnand %p1827_p2, %p2333_p12  ;;  %s372_s4 = scalar_lea.sflag [#allocation3], %s371_s22 }
  0x55   : > { %s2025_s5 = scalar_lea.hbm %s2358_s18, 16  ;;  %s2030_s28 = scalar_lea.hbm %s2673_s1, 32 }
  0x56   : > { %p2026_p9 = scmp.ne.s32.totalorder %s2358_s18, %s2025_s5  ;;  %p2027_p10 = pneg %p2362_p7 }
  0x57   : > { %p2031_p0 = scmp.lt.s32.totalorder %s2358_s18, %s2673_s1  ;;  %p2032_p12 = scmp.lt.s32.totalorder %s2030_s28, %s2025_s5 }
  0x58   : > { %p2028_p11 = pnand %p2027_p10, %p2026_p9 }
  0x59   : > { %p2033_p2 = por %p2032_p12, %p2031_p0 }
  0x5a   : > { %p2029_p13 = pneg %p2028_p11 }
  0x5c   : > { %p2034_p4 = pnand %p2033_p2, %p2029_p13 }
  0x5e   : > { %2037 = shalt.err (!%p2034_p4)
}
  0x5f   : > { %s2038_s23 = scalar_lea.vmem %s382_s27, 16  ;;  %s2165_s22 = smov [#allocation2]  }
  0x60   : > { %p2039_p1 = scmp.ne.s32.totalorder %s382_s27, %s2038_s23  ;;  %s2043_s8 = sshll.u32 %s2165_s22, 4  ;;  %s2044_s8 = int_to_ptr.vmem [resolvable:$false] %s2043_s8 }
  0x61   : > { %s2045_s21 = scalar_lea.vmem %s2044_s8, 32  ;;  %p2046_p9 = scmp.lt.s32.totalorder %s382_s27, %s2044_s8 }
  0x62   : > { %p2041_p8 = pnand %p2039_p1, %p2027_p10  ;;  %p2047_p11 = scmp.lt.s32.totalorder %s2045_s21, %s2038_s23 }
  0x64   : > { %p2042_p5 = pneg %p2041_p8  ;;  %p2048_p6 = por %p2047_p11, %p2046_p9 }
  0x66   : > { %p2049_p3 = pnand %p2048_p6, %p2042_p5 }
  0x68   : > { %2052 = shalt.err (!%p2049_p3)
}
  0x69   : > { %1815 = dma.hbm_to_vmem [thread:$0]  (!%p2362_p7), %s2358_s18, 16, %s382_s27, %s372_s4  }
  0x6a   : > { %p2703_p13 = scmp.ne.s32.totalorder %s2691_s20, 0 }
  0x6b   : > { %s2383_s5 = sand.u32 (!%p2703_p13), 1, %s2147_s14   ;;  %p2704_p1 = scmp.ne.s32.totalorder (!%p2703_p13), %s2699_s24, 0 }
  0x6c   : > { %397 = sbr.rel (%p2703_p13) target bundleno = 2955 (0xb8b), region = 56  ;;  %s400_s7 = scalar_lea.sflag (!%p2703_p13), [#allocation3], %s2383_s5 }
  0x6d   : > { %s402_s25 = scalar_lea.vmem (!%p2703_p13), [#allocation2], %s2383_s5 }
  0x71   : > { %2122 = dma.done.wait (%p2704_p1), %s400_s7, 16  }
  0x72   : > { %2124 = vsyncadd (%p2704_p1), %s400_s7, 4294967280  ;;  %p2705_p3 = scmp.eq.s32.totalorder %s2252_s19, 0 }
  0x74   : > { %2126 = dma.done.wait (%p2705_p3), [#allocation6], 512   ;;  %p2706_p4 = pmov %p2705_p3 }
  0x75   : > { %p2707_p6 = pmov %p2705_p3 }
  0x76   : > { %2128 = vsyncadd (%p2706_p4), [#allocation6], 4294966784 }
  0x77   : > { %2130 = dma.done.wait (%p2707_p6), [#allocation9], 512   ;;  %p2708_p5 = pmov %p2705_p3 }
  0x78   : > { %p467_p8 = scmp.lt.s32.totalorder %s2252_s19, 1  ;;  %vm487_vm0 = vcmask 261120   ;;  %v1881_v7 = vld [vmem:[%s2675_s3 + $0x8] sm:$0xff]   ;;  %v2166_v8 = vmov 0.0   ;;  %vm2167_vm1 = vmmov 0   ;;  %v1882_v9 = vld [vmem:[%s2675_s3] sm:$0xff]   ;;  %v579_v26 = vlaneseq }
  0x79   : > { %2132 = vsyncadd (%p2708_p5), [#allocation9], 4294966784  ;;  %1685 = vmatprep.subr.bf16.mxu0 %v2166_v8  ;;  %1689 = vmatprep.mubr.msk.bf16.mxu0 %vm2167_vm1, %v2166_v8  ;;  %v1606_v14 = vld [vmem:[#allocation10] ss:$0 sm:$0xff]  ;;  %v1607_v16 = vld [vmem:[#allocation10 + $0x1] ss:$0 sm:$0xff] }
  0x7a   : > { %s2401_s4 = scalar_select %p467_p8, %s2252_s19, 1  ;;  %1686 = vmatpush3.bf16.msra.mxu0 %v1881_v7  ;;  %1693 = vmatprep.subr.bf16.mxu1 %v2166_v8  ;;  %v1608_v20 = vld [vmem:[#allocation10 + $0x2] ss:$0 sm:$0xff]  ;;  %v2432_v27 = vand.u32 127, %v579_v26  ;;  %v578_v38 = vld [vmem:[%s402_s25] sm:$0x1] }
  0x7b   : > { %1687 = vmatprep.subr.bf16.mxu0 %v2166_v8  ;;  %1695 = vmatprep.mubr.msk.bf16.mxu1 %vm2167_vm1, %v2166_v8  ;;  %s2168_s28 = smov 96   ;;  %v646_v39 = vshrl.u32 %v579_v26, 7  ;;  %vm643_vm6 = vcmp.eq.f32.partialorder %v578_v38, 0.0  ;;  %v2169_v41 = vmov 0   ;;  %vm651_vm8 = vcmask 64512   ;;  %s2170_s17 = smov 64  }
  0x7c   : > { %s1604_s8 = sshll.u32 %s2401_s4, 3  ;;  %vm666_vm2 = vcmp.ge.s32.totalorder %v2432_v27, 8  ;;  %vm667_vm3 = vcmp.lt.s32.totalorder %v2432_v27, 16  ;;  %vm582_vm4 = vcmp.lt.s32.totalorder %v2432_v27, 8  ;;  %v644_v42 = vsel %vm643_vm6, 1, %v2169_v41  ;;  %s1603_s23 = sshll.u32 %s2383_s5, 5 }
  0x7d   : > { %s470_s24 = scalar_lea.vmem %s2672_s0, %s1604_s8  ;;  %vm2437_vm5 = vmand %vm666_vm2, %vm667_vm3  ;;  %v647_v40 = vsub.s32 0, %v646_v39  ;;  %vm827_vm9 = vcmp.ge.s32.totalorder %v2432_v27, 16  ;;  %vm828_vm10 = vcmp.lt.s32.totalorder %v2432_v27, 24  ;;  %vm942_vm11 = vcmp.ge.s32.totalorder %v2432_v27, 24  ;;  %s2506_s22 = scalar_lea.vmem [#allocation12], %s1603_s23 }
  0x7e   : > { %v2409_v0 = vld [vmem:[%s470_s24] sm:$0xff]  ;;  %1688 = vmatpush3.bf16.msra.mxu0 %v1882_v9  ;;  %vm943_vm12 = vcmp.lt.s32.totalorder %v2432_v27, 32  ;;  %vm2479_vm13 = vmand %vm827_vm9, %vm828_vm10  ;;  %vm737_vm14 = vcmask 1043456   ;;  %s474_s20 = scalar_lea.vmem %s2674_s2, %s1604_s8  ;;  %vm1273_vm2 = vcmask 523264   ;;  %p2715_p10 = scmp.ne.s32.totalorder %s2700_s26, 0 }
  0x7f   : > { %v488_v1 = vsel %vm487_vm0, %v2409_v0, 0.0  ;;  %1699 = vmatprep.subr.bf16.mxu0 %v2166_v8  ;;  %v2465_v43 = vrot.slane %v644_v42, %v647_v40  ;;  %vm2483_vm15 = vmand %vm942_vm11, %vm943_vm12  ;;  %s2172_s24 = smov [#allocation12]  }
  0x80   : > { %489 = vadd.xlane.f32.xlu0 %v488_v1  ;;  %s2057_s4 = sshll.u32 %s2172_s24, 4  ;;  %s2058_s4 = int_to_ptr.vmem [resolvable:$false] %s2057_s4 }
  0x81   : > { %vm649_vm7 = vcmp.eq.s32.totalorder %v2465_v43, 1 }
 0x109   : > { %v490_v2 = vpop.xlane.xlu0 %489 }
 0x10a   : > { %v492_v3 = vmul.f32 0.03125, %v490_v2 }
 0x10c   : > { %v493_v4 = vsub.f32 %v2409_v0, %v492_v3 }
 0x10e   : > { %v494_v5 = vmul.f32 %v493_v4, %v493_v4 }
 0x110   : > { %v495_v6 = vsel %vm487_vm0, %v494_v5, 0.0 }
 0x111   : > { %496 = vadd.xlane.f32.xlu0 %v495_v6 }
 0x19a   : > { %v497_v10 = vpop.xlane.xlu0 %496 }
 0x19b   : > { %v498_v11 = vmul.f32 0.03125, %v497_v10 }
 0x19d   : > { %v499_v12 = vadd.f32 1e-05, %v498_v11 }
 0x19f   : > { %1893 = vrsqrt.f32 %v499_v12 }
 0x1ac   : > { %v1894_v13 = vpop.eup %1893 }
 0x1ad   : > { %v501_v15 = vmul.f32 %v1894_v13, %v493_v4 }
 0x1af   : > { %v506_v17 = vmul.f32 %v1606_v14, %v501_v15 }
 0x1b1   : > { %v511_v18 = vadd.f32 %v1607_v16, %v506_v17 }
 0x1b3   : > { %v512_v19 = vpack.c.bf16 %v511_v18, %v511_v18 }
 0x1b5   : > { %1690 = vmatmul.mubr.msk.bf16.vlgmr.msra.gmra.mxu0 %vm487_vm0, %v512_v19 }
 0x1b6   : > { %1701 = vmatprep.mubr.msk.bf16.mxu0 %vm2167_vm1, %v2166_v8 }
 0x275   : > { %v570_v21 = vpop.f32.mrf.mxu0 }
 0x276   : > { %v571_v22 = vadd.f32 %v1608_v20, %v570_v21 }
 0x277   : > { %v1691_v23 = vpop.f32.mrf.mxu0 }
 0x278   : > { %587 = vrot.lane.b32.xlu1 %v571_v22, %s2168_s28  ;;  %v576_v36 = vmul.f32 0.35355338, %v571_v22  ;;  %s1651_s28 = sshll.u32 %s2252_s19, 9 }
 0x279   : > { %v573_v24 = vpop.f32.mrf.mxu0  ;;  %s2606_s25 = scalar_lea.hbm %s2682_s10, %s1651_s28 }
 0x27a   : > { %v2453_v37 = vpack.c.bf16 %v576_v36, %v576_v36 }
 0x27b   : > { %v1692_v25 = vpop.f32.mrf.mxu0 }
 0x2ea   : > { %v2441_v29 = vpop.permute.xlu1 %587 }
 0x2eb   : > { %v590_v30 = vsel %vm582_vm4, %v2441_v29, 0.0  ;;  %v671_v31 = vsel %vm2437_vm5, %v2441_v29, 0.0  ;;  %v832_v15 = vsel %vm2479_vm13, %v2441_v29, 0.0 }
 0x2ec   : > { %v591_v32 = vpack.c.bf16 %v590_v30, %v590_v30  ;;  %v672_v33 = vpack.c.bf16 %v671_v31, %v671_v31  ;;  %v833_v18 = vpack.c.bf16 %v832_v15, %v832_v15 }
 0x2ee   : > { %v601_v34 = vsel %vm487_vm0, %v591_v32, 0  ;;  %v676_v35 = vsel %vm487_vm0, %v672_v33, 0  ;;  %v837_v21 = vsel %vm487_vm0, %v833_v18, 0 }
 0x2ef   : > { %1694 = vmatpush3.bf16.xpose.msra.mxu1 %v601_v34  ;;  %1700 = vmatpush3.bf16.xpose.msra.mxu0 %v676_v35 }
 0x2f0   : > { %1705 = vmatprep.subr.bf16.mxu1 %v2166_v8  ;;  %1711 = vmatprep.subr.bf16.mxu0 %v2166_v8 }
 0x2f6   : > { %1696 = vmatmul.mubr.msk.bf16.vlgmr.msra.gmra.mxu1 %vm487_vm0, %v2453_v37  ;;  %1702 = vmatmul.mubr.msk.bf16.vlgmr.msra.gmra.mxu0 %vm487_vm0, %v2453_v37 }
 0x2f7   : > { %1707 = vmatprep.mubr.msk.bf16.mxu1 %vm2167_vm1, %v2166_v8  ;;  %1713 = vmatprep.mubr.msk.bf16.mxu0 %vm2167_vm1, %v2166_v8 }
 0x3b6   : > { %v637_v44 = vpop.f32.mrf.mxu1  ;;  %v712_v45 = vpop.f32.mrf.mxu0 }
 0x3b7   : > { %v718_v46 = vsel %vm649_vm7, -1e+09, %v712_v45  ;;  %v650_v59 = vsel %vm649_vm7, -1e+09, %v637_v44 }
 0x3b8   : > { %v1697_v47 = vpop.f32.mrf.mxu1  ;;  %v1703_v48 = vpop.f32.mrf.mxu0  ;;  %v719_v49 = vsel %vm651_vm8, %v718_v46, -inf  ;;  %v652_v60 = vsel %vm651_vm8, %v650_v59, -inf }
 0x3b9   : > { %720 = vmax.xlane.f32.xlu1 %v719_v49 }
 0x3ba   : > { %v640_v50 = vpop.f32.mrf.mxu1  ;;  %v715_v51 = vpop.f32.mrf.mxu0 }
 0x3bc   : > { %v1698_v52 = vpop.f32.mrf.mxu1  ;;  %v1704_v53 = vpop.f32.mrf.mxu0 }
 0x442   : > { %v721_v54 = vpop.xlane.xlu1 %720 }
 0x443   : > { %v722_v55 = vsub.f32 %v718_v46, %v721_v54 }
 0x445   : > { %v723_v56 = vmul.f32 1.442695, %v722_v55 }
 0x447   : > { %1895 = vpow2.f32 %v723_v56 }
 0x454   : > { %v1896_v57 = vpop.eup %1895 }
 0x455   : > { %v725_v58 = vsel %vm651_vm8, %v1896_v57, 0.0 }
 0x456   : > { %726 = vadd.xlane.f32.xlu0 %v725_v58 }
 0x46c   : > { %592 = vrot.lane.b32.xlu0 %v571_v22, %s2170_s17  ;;  %v947_v22 = vsel %vm2483_vm15, %v2441_v29, 0.0  ;;  %s1425_s17 = sshll.u32 %s2506_s22, 4  ;;  %s2608_s17 = int_to_ptr.vmem [resolvable:$true] %s1425_s17 }
 0x46d   : > { %v948_v23 = vpack.c.bf16 %v947_v22, %v947_v22  ;;  %s2053_s21 = scalar_lea.vmem %s2608_s17, 512  ;;  %p2060_p2 = scmp.lt.s32.totalorder %s2608_s17, %s2058_s4 }
 0x46e   : > { %p2054_p7 = scmp.ne.s32.totalorder %s2608_s17, %s2053_s21 }
 0x46f   : > { %v952_v24 = vsel %vm487_vm0, %v948_v23, 0 }
 0x470   : > { %p2055_p0 = pnand %p2054_p7, %p2715_p10 }
 0x472   : > { %p2056_p12 = pneg %p2055_p0 }
 0x48b   : > { %653 = vmax.xlane.f32.xlu0 %v652_v60 }
 0x4df   : > { %v727_v61 = vpop.xlane.xlu0 %726 }
 0x4e0   : > { %1897 = vrcp.f32 %v727_v61 }
 0x4e3   : > { %v593_v63 = vpop.permute.xlu0 %592 }
 0x4e4   : > { %v673_v2 = vsel %vm2437_vm5, %v593_v63, 0.0  ;;  %v595_v3 = vsel %vm582_vm4, %v593_v63, 0.0  ;;  %v834_v4 = vsel %vm2479_vm13, %v593_v63, 0.0  ;;  %v949_v5 = vsel %vm2483_vm15, %v593_v63, 0.0 }
 0x4e5   : > { %v674_v6 = vpack.c.bf16 %v673_v2, %v673_v2  ;;  %v596_v7 = vpack.c.bf16 %v595_v3, %v595_v3  ;;  %v835_v9 = vpack.c.bf16 %v834_v4, %v834_v4  ;;  %v950_v10 = vpack.c.bf16 %v949_v5, %v949_v5 }
 0x4e7   : > { %v739_v11 = vsel %vm737_vm14, %v674_v6, 0  ;;  %v785_v12 = vsel %vm737_vm14, %v596_v7, 0  ;;  %v2495_v13 = vsel %vm737_vm14, %v835_v9, 0  ;;  %v2497_v14 = vsel %vm737_vm14, %v950_v10, 0 }
 0x4e8   : > { %1706 = vmatpush3.bf16.msra.mxu1 %v739_v11  ;;  %1712 = vmatpush3.bf16.msra.mxu0 %v785_v12 }
 0x4e9   : > { %1717 = vmatprep.subr.bf16.mxu1 %v2166_v8  ;;  %1723 = vmatprep.subr.bf16.mxu0 %v2166_v8 }
 0x4ed   : > { %v1898_v16 = vpop.eup %1897 }
 0x4ee   : > { %v729_v17 = vmul.f32 %v1898_v16, %v1896_v57 }
 0x4f0   : > { %v730_v19 = vsel %vm651_vm8, %v729_v17, 0.0  ;;  %v733_v20 = vpack.c.bf16 %v729_v17, %v729_v17 }
 0x4f1   : > { %1614 = vst [vmem:[%s2506_s22 + $0x8] sm:$0xff] %v730_v19 }
 0x4f2   : > { %1708 = vmatmul.mubr.msk.bf16.vlgmr.msra.gmra.mxu1 %vm651_vm8, %v733_v20 }
 0x4f3   : > { %1718 = vmatpush3.bf16.xpose.msra.mxu1 %v837_v21  ;;  %1719 = vmatprep.mubr.msk.bf16.mxu1 %vm2167_vm1, %v2166_v8 }
 0x4f4   : > { %1729 = vmatprep.subr.bf16.mxu1 %v2166_v8 }
 0x4fa   : > { %1720 = vmatmul.mubr.msk.bf16.vlgmr.msra.gmra.mxu1 %vm487_vm0, %v2453_v37 }
 0x4fb   : > { %1730 = vmatpush3.bf16.xpose.msra.mxu1 %v952_v24  ;;  %1731 = vmatprep.mubr.msk.bf16.mxu1 %vm2167_vm1, %v2166_v8 }
 0x4fc   : > { %1741 = vmatprep.subr.bf16.mxu1 %v2166_v8 }
 0x502   : > { %1732 = vmatmul.mubr.msk.bf16.vlgmr.msra.gmra.mxu1 %vm487_vm0, %v2453_v37 }
 0x503   : > { %1745 = vmatprep.mubr.msk.bf16.mxu1 %vm2167_vm1, %v2166_v8 }
 0x514   : > { %v654_v25 = vpop.xlane.xlu0 %653 }
 0x515   : > { %v655_v26 = vsub.f32 %v650_v59, %v654_v25 }
 0x517   : > { %v656_v28 = vmul.f32 1.442695, %v655_v26 }
 0x519   : > { %1899 = vpow2.f32 %v656_v28  ;;  %v1623_v28 = vld [vmem:[#allocation10 + $0x3] ss:$0 sm:$0xff] }
 0x526   : > { %v1900_v42 = vpop.eup %1899 }
 0x527   : > { %v658_v46 = vsel %vm651_vm8, %v1900_v42, 0.0 }
 0x5b2   : > { %v2527_v27 = vpop.f32.mrf.mxu1 }
 0x5b4   : > { %v1709_v29 = vpop.f32.mrf.mxu1 }
 0x5b6   : > { %v778_v30 = vpop.f32.mrf.mxu1 }
 0x5b8   : > { %v1710_v31 = vpop.f32.mrf.mxu1 }
 0x5ba   : > { %v873_v32 = vpop.f32.mrf.mxu1 }
 0x5bb   : > { %v879_v33 = vsel %vm649_vm7, -1e+09, %v873_v32 }
 0x5bc   : > { %v1721_v34 = vpop.f32.mrf.mxu1  ;;  %v880_v35 = vsel %vm651_vm8, %v879_v33, -inf }
 0x5bd   : > { %881 = vmax.xlane.f32.xlu1 %v880_v35 }
 0x5be   : > { %v876_v36 = vpop.f32.mrf.mxu1 }
 0x5c0   : > { %v1722_v37 = vpop.f32.mrf.mxu1 }
 0x5c2   : > { %v988_v38 = vpop.f32.mrf.mxu1 }
 0x5c3   : > { %v994_v39 = vsel %vm649_vm7, -1e+09, %v988_v38 }
 0x5c4   : > { %v1733_v40 = vpop.f32.mrf.mxu1  ;;  %v995_v41 = vsel %vm651_vm8, %v994_v39, -inf }
 0x5c5   : > { %996 = vmax.xlane.f32.xlu1 %v995_v41  ;;  %v1885_v40 = vld [vmem:[#allocation7 + $0x8] sm:$0xff]   ;;  %v1886_v41 = vld [vmem:[#allocation7] sm:$0xff]  }
 0x5c6   : > { %v991_v44 = vpop.f32.mrf.mxu1 }
 0x5c8   : > { %v1734_v45 = vpop.f32.mrf.mxu1 }
 0x5c9   : > { %659 = vadd.xlane.f32.xlu1 %v658_v46  ;;  %v1627_v46 = vld [vmem:[#allocation10 + $0x4] ss:$0 sm:$0xff] }
 0x646   : > { %v882_v47 = vpop.xlane.xlu1 %881 }
 0x647   : > { %v883_v48 = vsub.f32 %v879_v33, %v882_v47 }
 0x649   : > { %v884_v49 = vmul.f32 1.442695, %v883_v48  ;;  %v1628_v48 = vld [vmem:[#allocation10 + $0x5] ss:$0 sm:$0xff] }
 0x64b   : > { %1901 = vpow2.f32 %v884_v49 }
 0x64e   : > { %v997_v50 = vpop.xlane.xlu1 %996 }
 0x64f   : > { %v998_v51 = vsub.f32 %v994_v39, %v997_v50 }
 0x651   : > { %v999_v52 = vmul.f32 1.442695, %v998_v51 }
 0x652   : > { %v660_v43 = vpop.xlane.xlu1 %659 }
 0x653   : > { %1903 = vpow2.f32 %v999_v52  ;;  %v1887_v52 = vld [vmem:[#allocation8 + $0x8] sm:$0xff]  }
 0x654   : > { %1905 = vrcp.f32 %v660_v43  ;;  %v2580_v43 = vld [vmem:[%s474_s20] sm:$0xff]  ;;  %s1399_s20 = scalar_lea.sflag [#allocation13], %s2383_s5 }
 0x658   : > { %v1902_v53 = vpop.eup %1901 }
 0x659   : > { %v886_v54 = vsel %vm651_vm8, %v1902_v53, 0.0 }
 0x65a   : > { %887 = vadd.xlane.f32.xlu1 %v886_v54  ;;  %v1317_v54 = vpack.c.bf16 %v2580_v43, %v2580_v43 }
 0x660   : > { %v1904_v55 = vpop.eup %1903 }
 0x661   : > { %v1906_v56 = vpop.eup %1905  ;;  %v1001_v57 = vsel %vm651_vm8, %v1904_v55, 0.0 }
 0x662   : > { %1002 = vadd.xlane.f32.xlu1 %v1001_v57  ;;  %v662_v58 = vmul.f32 %v1906_v56, %v1900_v42  ;;  %v1890_v56 = vld [vmem:[%s2678_s6 + $0x10] sm:$0xff]   ;;  %v1891_v57 = vld [vmem:[%s2678_s6 + $0x8] sm:$0xff]  }
 0x664   : > { %v663_v59 = vsel %vm651_vm8, %v662_v58, 0.0  ;;  %v665_v60 = vpack.c.bf16 %v662_v58, %v662_v58  ;;  %v1892_v58 = vld [vmem:[%s2678_s6] sm:$0xff]  }
 0x665   : > { %664 = vst [vmem:[%s2506_s22] sm:$0xff] %v663_v59  ;;  %v1629_v59 = vld [vmem:[#allocation10 + $0x6] ss:$0 sm:$0xff] }
 0x666   : > { %1714 = vmatmul.mubr.msk.bf16.vlgmr.msra.gmra.mxu0 %vm651_vm8, %v665_v60 }
 0x667   : > { %1724 = vmatpush3.bf16.msra.mxu0 %v2495_v13  ;;  %1725 = vmatprep.mubr.msk.bf16.mxu0 %vm2167_vm1, %v2166_v8  ;;  %v1883_v13 = vld [vmem:[#allocation5 + $0x8] sm:$0xff]  }
 0x668   : > { %1735 = vmatprep.subr.bf16.mxu0 %v2166_v8  ;;  %1742 = vmatpush3.bf16.msra.mxu1 %v1883_v13 }
 0x669   : > { %1743 = vmatprep.subr.bf16.mxu1 %v2166_v8 }
 0x6e3   : > { %v888_v61 = vpop.xlane.xlu1 %887 }
 0x6e4   : > { %1907 = vrcp.f32 %v888_v61 }
 0x6eb   : > { %v1003_v62 = vpop.xlane.xlu1 %1002 }
 0x6ec   : > { %1909 = vrcp.f32 %v1003_v62 }
 0x6f1   : > { %v1908_v63 = vpop.eup %1907 }
 0x6f2   : > { %v890_v1 = vmul.f32 %v1908_v63, %v1902_v53  ;;  %v1888_v53 = vld [vmem:[#allocation8] sm:$0xff]  }
 0x6f4   : > { %v891_v2 = vsel %vm651_vm8, %v890_v1, 0.0  ;;  %v894_v3 = vpack.c.bf16 %v890_v1, %v890_v1 }
 0x6f5   : > { %1618 = vst [vmem:[%s2506_s22 + $0x10] sm:$0xff] %v891_v2 }
 0x6f6   : > { %1726 = vmatmul.mubr.msk.bf16.vlgmr.msra.gmra.mxu0 %vm651_vm8, %v894_v3 }
 0x6f7   : > { %1736 = vmatpush3.bf16.msra.mxu0 %v2497_v14  ;;  %1737 = vmatprep.mubr.msk.bf16.mxu0 %vm2167_vm1, %v2166_v8  ;;  %v1884_v14 = vld [vmem:[#allocation5] sm:$0xff]  }
 0x6f8   : > { %1749 = vmatprep.subr.bf16.mxu0 %v2166_v8  ;;  %1744 = vmatpush3.bf16.msra.mxu1 %v1884_v14 }
 0x6f9   : > { %v1910_v4 = vpop.eup %1909  ;;  %1757 = vmatprep.subr.bf16.mxu1 %v2166_v8 }
 0x6fa   : > { %v1005_v5 = vmul.f32 %v1910_v4, %v1904_v55  ;;  %v1889_v55 = vld [vmem:[%s2678_s6 + $0x18] sm:$0xff]  }
 0x6fc   : > { %v1006_v6 = vsel %vm651_vm8, %v1005_v5, 0.0  ;;  %v1009_v7 = vpack.c.bf16 %v1005_v5, %v1005_v5 }
 0x6fd   : > { %1621 = vst [vmem:[%s2506_s22 + $0x18] sm:$0xff] %v1006_v6  ;;  %s2059_s22 = scalar_lea.vmem %s2058_s4, 1024 }
 0x6fe   : > { %1738 = vmatmul.mubr.msk.bf16.vlgmr.msra.gmra.mxu0 %vm651_vm8, %v1009_v7  ;;  %p2061_p9 = scmp.lt.s32.totalorder %s2059_s22, %s2053_s21 }
 0x6ff   : > { %1753 = vmatprep.mubr.msk.bf16.mxu0 %vm2167_vm1, %v2166_v8  ;;  %1750 = vmatpush3.bf16.msra.mxu0 %v1885_v40 }
 0x700   : > { %1751 = vmatprep.subr.bf16.mxu0 %v2166_v8  ;;  %p2062_p11 = por %p2061_p9, %p2060_p2 }
 0x702   : > { %p2063_p13 = pnand %p2062_p11, %p2056_p12 }
 0x703   : > { %1752 = vmatpush3.bf16.msra.mxu0 %v1886_v41 }
 0x704   : > { %1769 = vmatprep.subr.bf16.mxu0 %v2166_v8 }
 0x726   : > { %v821_v9 = vpop.f32.mrf.mxu0 }
 0x727   : > { %v822_v18 = vadd.f32 %v821_v9, %v2527_v27 }
 0x728   : > { %v1715_v10 = vpop.f32.mrf.mxu0 }
 0x72a   : > { %v824_v11 = vpop.f32.mrf.mxu0 }
 0x72c   : > { %v1716_v12 = vpop.f32.mrf.mxu0 }
 0x7b6   : > { %v935_v15 = vpop.f32.mrf.mxu0 }
 0x7b7   : > { %v941_v20 = vadd.f32 %v935_v15, %v822_v18 }
 0x7b8   : > { %v1727_v16 = vpop.f32.mrf.mxu0 }
 0x7ba   : > { %v938_v17 = vpop.f32.mrf.mxu0 }
 0x7bc   : > { %v1728_v19 = vpop.f32.mrf.mxu0 }
 0x7be   : > { %v1050_v21 = vpop.f32.mrf.mxu0 }
 0x7bf   : > { %v1056_v22 = vadd.f32 %v1050_v21, %v941_v20 }
 0x7c0   : > { %v1739_v23 = vpop.f32.mrf.mxu0 }
 0x7c1   : > { %v1057_v24 = vpack.c.bf16 %v1056_v22, %v1056_v22  ;;  %v2171_v22 = vmov -1.0  }
 0x7c2   : > { %v1053_v25 = vpop.f32.mrf.mxu0 }
 0x7c3   : > { %1746 = vmatmul.mubr.msk.bf16.vlgmr.msra.gmra.mxu1 %vm487_vm0, %v1057_v24 }
 0x7c4   : > { %v1740_v26 = vpop.f32.mrf.mxu0  ;;  %1765 = vmatprep.mubr.msk.bf16.mxu1 %vm2167_vm1, %v2166_v8  ;;  %1758 = vmatpush3.bf16.msra.mxu1 %v1889_v55 }
 0x7c5   : > { %1759 = vmatprep.subr.bf16.mxu1 %v2166_v8 }
 0x7c8   : > { %1760 = vmatpush3.bf16.msra.mxu1 %v1890_v56 }
 0x7c9   : > { %1761 = vmatprep.subr.bf16.mxu1 %v2166_v8 }
 0x7cc   : > { %1762 = vmatpush3.bf16.msra.mxu1 %v1891_v57 }
 0x7cd   : > { %1763 = vmatprep.subr.bf16.mxu1 %v2166_v8 }
 0x7d0   : > { %1764 = vmatpush3.bf16.msra.mxu1 %v1892_v58 }
 0x883   : > { %v1115_v29 = vpop.f32.mrf.mxu1 }
 0x884   : > { %v1116_v30 = vadd.f32 %v1623_v28, %v1115_v29 }
 0x885   : > { %v1747_v31 = vpop.f32.mrf.mxu1 }
 0x886   : > { %v2564_v32 = vadd.f32 %v1116_v30, %v2409_v0 }
 0x887   : > { %v1118_v27 = vpop.f32.mrf.mxu1 }
 0x888   : > { %v1122_v33 = vsel %vm487_vm0, %v2564_v32, 0.0 }
 0x889   : > { %1123 = vadd.xlane.f32.xlu1 %v1122_v33  ;;  %v1748_v34 = vpop.f32.mrf.mxu1 }
 0x912   : > { %v1124_v35 = vpop.xlane.xlu1 %1123 }
 0x913   : > { %v1125_v36 = vmul.f32 0.03125, %v1124_v35 }
 0x915   : > { %v1126_v37 = vsub.f32 %v2564_v32, %v1125_v36 }
 0x917   : > { %v1127_v38 = vmul.f32 %v1126_v37, %v1126_v37 }
 0x919   : > { %v1128_v39 = vsel %vm487_vm0, %v1127_v38, 0.0 }
 0x91a   : > { %1129 = vadd.xlane.f32.xlu1 %v1128_v39 }
 0x9a3   : > { %v1130_v0 = vpop.xlane.xlu1 %1129 }
 0x9a4   : > { %v1131_v42 = vmul.f32 0.03125, %v1130_v0 }
 0x9a6   : > { %v1132_v44 = vadd.f32 1e-05, %v1131_v42 }
 0x9a8   : > { %1911 = vrsqrt.f32 %v1132_v44 }
 0x9b5   : > { %v1912_v45 = vpop.eup %1911 }
 0x9b6   : > { %v1134_v47 = vmul.f32 %v1912_v45, %v1126_v37 }
 0x9b8   : > { %v1139_v49 = vmul.f32 %v1627_v46, %v1134_v47 }
 0x9ba   : > { %v1144_v50 = vadd.f32 %v1628_v48, %v1139_v49 }
 0x9bc   : > { %v1145_v51 = vpack.c.bf16 %v1144_v50, %v1144_v50 }
 0x9be   : > { %1754 = vmatmul.mubr.msk.bf16.vlgmr.msra.gmra.mxu0 %vm487_vm0, %v1145_v51 }
 0x9bf   : > { %1773 = vmatprep.mubr.msk.bf16.mxu0 %vm2167_vm1, %v2166_v8  ;;  %1770 = vmatpush3.bf16.msra.mxu0 %v1887_v52 }
 0x9c0   : > { %1771 = vmatprep.subr.bf16.mxu0 %v2166_v8 }
 0x9c3   : > { %1772 = vmatpush3.bf16.msra.mxu0 %v1888_v53 }
 0x9c6   : > { %1774 = vmatmul.mubr.msk.bf16.vlgmr.msra.gmra.mxu0 %vm487_vm0, %v1317_v54 }
 0xa7e   : > { %v1203_v60 = vpop.f32.mrf.mxu0 }
 0xa7f   : > { %v1204_v61 = vadd.f32 %v1629_v59, %v1203_v60 }
 0xa80   : > { %v1755_v62 = vpop.f32.mrf.mxu0 }
 0xa81   : > { %v1210_v63 = vmul.f32 0.70710677, %v1204_v61  ;;  %v1209_v25 = vmul.f32 0.5, %v1204_v61 }
 0xa82   : > { %v1206_v1 = vpop.f32.mrf.mxu0 }
 0xa83   : > { %v1213_v2 = vand.u32 2147483647, %v1210_v63  ;;  %vm1211_vm1 = vcmp.ge.f32.partialorder %v1210_v63, 0.0 }
 0xa84   : > { %v1756_v3 = vpop.f32.mrf.mxu0  ;;  %v1212_v23 = vsel %vm1211_vm1, 1.0, %v2171_v22 }
 0xa85   : > { %v1214_v4 = vmul.f32 0.3275911, %v1213_v2  ;;  %v1227_v6 = vsub.f32 0.0, %v1213_v2 }
 0xa86   : > { %v1375_v30 = vpop.f32.mrf.mxu0 }
 0xa87   : > { %v1215_v5 = vadd.f32 1.0, %v1214_v4  ;;  %v1228_v7 = vmul.f32 %v1227_v6, %v1213_v2 }
 0xa88   : > { %v1775_v31 = vpop.f32.mrf.mxu0 }
 0xa89   : > { %1913 = vrcp.f32 %v1215_v5  ;;  %v1229_v10 = vmul.f32 1.442695, %v1228_v7 }
 0xa8a   : > { %v1378_v27 = vpop.f32.mrf.mxu0 }
 0xa8b   : > { %1915 = vpow2.f32 %v1229_v10 }
 0xa8c   : > { %v1776_v33 = vpop.f32.mrf.mxu0 }
 0xa96   : > { %v1914_v9 = vpop.eup %1913 }
 0xa97   : > { %v1218_v8 = vmul.f32 1.0614054, %v1914_v9 }
 0xa98   : > { %v1916_v19 = vpop.eup %1915 }
 0xa99   : > { %v1219_v11 = vadd.f32 -1.4531521, %v1218_v8 }
 0xa9b   : > { %v1220_v12 = vmul.f32 %v1914_v9, %v1219_v11 }
 0xa9d   : > { %v1221_v13 = vadd.f32 1.4214138, %v1220_v12 }
 0xa9f   : > { %v1222_v14 = vmul.f32 %v1914_v9, %v1221_v13 }
 0xaa1   : > { %v1223_v15 = vadd.f32 -0.28449672, %v1222_v14 }
 0xaa3   : > { %v1224_v16 = vmul.f32 %v1914_v9, %v1223_v15 }
 0xaa5   : > { %v1225_v17 = vadd.f32 0.2548296, %v1224_v16 }
 0xaa7   : > { %v1226_v18 = vmul.f32 %v1914_v9, %v1225_v17 }
 0xaa9   : > { %v1231_v20 = vmul.f32 %v1916_v19, %v1226_v18 }
 0xaab   : > { %v1232_v21 = vsub.f32 1.0, %v1231_v20 }
 0xaad   : > { %v1233_v24 = vmul.f32 %v1232_v21, %v1212_v23 }
 0xaaf   : > { %v1234_v26 = vadd.f32 1.0, %v1233_v24 }
 0xab1   : > { %v1235_v28 = vmul.f32 %v1234_v26, %v1209_v25 }
 0xab3   : > { %v1236_v29 = vpack.c.bf16 %v1235_v28, %v1235_v28 }
 0xab5   : > { %1766 = vmatmul.mubr.msk.bf16.vlgmr.msra.gmra.mxu1 %vm1273_vm2, %v1236_v29 }
 0xab6   : > { %2066 = shalt.err (!%p2063_p13)
}
 0xab7   : > { %s2067_s8 = scalar_lea.hbm %s2606_s25, 512  ;;  %s2071_s11 = scalar_lea.hbm %s2682_s10, 1024 }
 0xab8   : > { %p2068_p1 = scmp.ne.s32.totalorder %s2606_s25, %s2067_s8  ;;  %p2072_p6 = scmp.lt.s32.totalorder %s2606_s25, %s2682_s10 }
 0xab9   : > { %p2073_p5 = scmp.lt.s32.totalorder %s2071_s11, %s2067_s8 }
 0xaba   : > { %p2069_p3 = pnand %p2068_p1, %p2715_p10 }
 0xabb   : > { %p2074_p8 = por %p2073_p5, %p2072_p6 }
 0xabc   : > { %p2070_p4 = pneg %p2069_p3 }
 0xabe   : > { %p2075_p7 = pnand %p2074_p8, %p2070_p4 }
 0xac0   : > { %2078 = shalt.err (!%p2075_p7)
}
 0xac1   : > { %s2173_s23 = smov 128   ;;  %s2174_s7 = smov 8   ;;  %v1639_v34 = vld [vmem:[#allocation10 + $0x8] ss:$0 sm:$0xff]  ;;  %v1633_v41 = vld [vmem:[#allocation10 + $0x7] ss:$0 sm:$0xff] }
 0xac2   : > { %1796 = dma.vmem_to_hbm [thread:$0]  (%p2715_p10), %s2608_s17, 512, %s2606_s25, %s1399_s20, %s2173_s23, %s2173_s23, %s2174_s7   ;;  %v1376_v35 = vadd.f32 %v1639_v34, %v1375_v30 }
 0xac3   : > { %s1602_s21 = sshll.u32 %s2383_s5, 3  ;;  %s1646_s17 = sshll.u32 %s2252_s19, 7 }
 0xac4   : > { %v1643_v36 = vmul.f32 -1.442695, %v1376_v35  ;;  %s459_s25 = scalar_lea.vmem [#allocation11], %s1602_s21  ;;  %s1410_s22 = scalar_lea.hbm %s2681_s9, %s1646_s17 }
 0xac5   : > { %s1412_s20 = sshll.u32 %s459_s25, 4  ;;  %s1394_s8 = scalar_lea.sflag [#allocation4], %s2383_s5  ;;  %s1413_s20 = int_to_ptr.vmem [resolvable:$true] %s1412_s20 }
 0xac6   : > { %1917 = vpow2.f32 %v1643_v36  ;;  %s2079_s27 = scalar_lea.vmem %s1413_s20, 128  ;;  %s2175_s19 = smov [#allocation11]  }
 0xac7   : > { %p2080_p0 = scmp.ne.s32.totalorder %s1413_s20, %s2079_s27  ;;  %s2083_s18 = sshll.u32 %s2175_s19, 4  ;;  %s2084_s18 = int_to_ptr.vmem [resolvable:$false] %s2083_s18 }
 0xac8   : > { %s2085_s11 = scalar_lea.vmem %s2084_s18, 256  ;;  %p2086_p9 = scmp.lt.s32.totalorder %s1413_s20, %s2084_s18 }
 0xac9   : > { %p2081_p12 = pnand %p2080_p0, %p2715_p10  ;;  %p2087_p11 = scmp.lt.s32.totalorder %s2085_s11, %s2079_s27 }
 0xacb   : > { %p2082_p2 = pneg %p2081_p12  ;;  %p2088_p13 = por %p2087_p11, %p2086_p9 }
 0xacd   : > { %p2089_p1 = pnand %p2088_p13, %p2082_p2 }
 0xad3   : > { %v1918_v37 = vpop.eup %1917 }
 0xad4   : > { %v1384_v38 = vadd.f32 1.0, %v1918_v37 }
 0xad6   : > { %1919 = vrcp.f32 %v1384_v38 }
 0xae3   : > { %v1920_v39 = vpop.eup %1919 }
 0xae4   : > { %v1388_v40 = vsub.f32 1.0, %v1920_v39 }
 0xae6   : > { %v1389_v44 = vmul.f32 %v1388_v40, %v2580_v43 }
 0xb75   : > { %v1311_v0 = vpop.f32.mrf.mxu1 }
 0xb76   : > { %v1312_v42 = vadd.f32 %v1633_v41, %v1311_v0 }
 0xb77   : > { %v1767_v45 = vpop.f32.mrf.mxu1 }
 0xb78   : > { %v1387_v46 = vmul.f32 %v1920_v39, %v1312_v42 }
 0xb79   : > { %v1314_v47 = vpop.f32.mrf.mxu1 }
 0xb7a   : > { %v1390_v48 = vadd.f32 %v1389_v44, %v1387_v46 }
 0xb7b   : > { %v1768_v49 = vpop.f32.mrf.mxu1 }
 0xb7c   : > { %v1391_v50 = vadd.f32 %v1390_v48, %v2564_v32 }
 0xb7e   : > { %1392 = vst.msk [vmem:[%s459_s25] sm:$0xff] %vm487_vm0, %v1391_v50 }
 0xb7f   : > { %2092 = shalt.err (!%p2089_p1)
}
 0xb80   : > { %s2093_s30 = scalar_lea.hbm %s1410_s22, 128  ;;  %s2097_s23 = scalar_lea.hbm %s2681_s9, 256 }
 0xb81   : > { %p2094_p3 = scmp.ne.s32.totalorder %s1410_s22, %s2093_s30  ;;  %p2098_p5 = scmp.lt.s32.totalorder %s1410_s22, %s2681_s9 }
 0xb82   : > { %p2099_p8 = scmp.lt.s32.totalorder %s2097_s23, %s2093_s30 }
 0xb83   : > { %p2095_p4 = pnand %p2094_p3, %p2715_p10 }
 0xb84   : > { %p2100_p7 = por %p2099_p8, %p2098_p5 }
 0xb85   : > { %p2096_p6 = pneg %p2095_p4 }
 0xb87   : > { %p2101_p0 = pnand %p2100_p7, %p2096_p6 }
 0xb89   : > { %2104 = shalt.err (!%p2101_p0)
}
 0xb8a   : > { %1795 = dma.vmem_to_hbm [thread:$0]  (%p2715_p10), %s1413_s20, 128, %s1410_s22, %s1394_s8  }
 0xb8b PF: > { %s1440_s17 = sand.u32 1, %s2143_s13   ;;  %p2716_p12 = scmp.ne.s32.totalorder %s2701_s29, 0 }
 0xb8c   : > { %p2717_p2 = scmp.ge.s32.totalorder %s2155_s16, 2  ;;  %s1441_s25 = scalar_lea.sflag [#allocation4], %s1440_s17 }
 0xb8e   : > { %p1817_p9 = pnand %p2717_p2, %p2716_p12 }
 0xb90   : > { %p1818_p11 = pneg %p1817_p9 }
 0xb92   : > { %2134 = dma.done.wait (%p1818_p11), %s1441_s25, 128  }
 0xb93   : > { %2136 = vsyncadd (%p1818_p11), %s1441_s25, 4294967168  ;;  %s1450_s24 = scalar_lea.sflag [#allocation13], %s1440_s17 }
 0xb94   : > { %2138 = dma.done.wait (%p1818_p11), %s1450_s24, 512  }
 0xb95   : > { %2140 = vsyncadd (%p1818_p11), %s1450_s24, 4294966784  ;;  %s2718_s26 = sld [smem:[#allocation19_spill]]  ;;  %p29_p10 = scmp.ge.s32.totalorder %s2320_s12, 4  }
 0xb96   : > { %s2719_s13 = smov %s2147_s14  ;;  %s2720_s14 = smov %s2151_s15 }
 0xb97   : > { %s2722_s16 = smov %s2320_s12  ;;  %31 = sbr.rel (!%p29_p10) target bundleno = 14 (0xe), region = 143 }
 0xb9b   : > { %s2721_s15 = smov %s2718_s26 }
 0xb9c   :  { %1455 = vsyncpa [#allocation3], 1 }
 0xb9d   :  { %1457 = vsyncpa [#allocation3 + $0x1], 1 }
 0xb9e   :  { %1458 = vsyncpa [#allocation6], 1 }
 0xb9f   :  { %1459 = vsyncpa [#allocation9], 1 }
 0xba0   :  { %1460 = vsyncpa [#allocation4], 1 }
 0xba1   :  { %1462 = vsyncpa [#allocation4 + $0x1], 1 }
 0xba2   :  { %1463 = vsyncpa [#allocation13], 1 }
 0xba3   :  { %1465 = vsyncpa [#allocation13 + $0x1], 1 }

</bundles_post_ra>
